<compile_context>
chip_gen: v5e
topology: v5e:2x2
jax: 0.10.0
libtpu: 0.0.40
codegen_flags: <defaults>
</compile_context>

<pallas_src>
import functools

import jax
import jax.numpy as jnp
import numpy as np
from jax import lax
from jax.experimental import pallas as pl
from jax.experimental.pallas import tpu as pltpu

EPS = 1e-5          # nn.BatchNorm2d default eps
ROW_TILE = 512      # row tile for the memory-bound elementwise kernel


# ---------------------------------------------------------------- kernels ---

def _conv3x3_kernel(xp_ref, w_ref, *rest, H, W, apply_bn_relu):
    """3x3 conv (stride 1) over one zero-padded NHWC image, + BN-stats epilogue.

    xp_ref   : (1, H+2, W+2, Cin)  bf16 raw input, or f32 pre-BN activation
    w_ref    : (9, Cin, Cout)      bf16, k = kh*3 + kw
    optional : scale/shift (1, Cin) f32 -> fused bn+relu applied to the input
    o_ref    : (1, H, W, Cout)     f32 conv output
    stats_ref: (1, 8, Cout)        f32, row 0 = sum, row 1 = sum of squares
    """
    if apply_bn_relu:
        scale_ref, shift_ref, o_ref, stats_ref = rest
    else:
        o_ref, stats_ref = rest

    Cin = xp_ref.shape[-1]
    Cout = w_ref.shape[-1]
    xp = xp_ref[0]                                          # (H+2, W+2, Cin)

    if apply_bn_relu:
        # bn + relu fused into the load path (f32), then re-zero the padding
        # ring so the conv's zero-padding semantics survive the affine map.
        t = jnp.maximum(xp * scale_ref[...] + shift_ref[...], 0.0)
        ri = lax.broadcasted_iota(jnp.int32, (H + 2, W + 2, 1), 0)
        ci = lax.broadcasted_iota(jnp.int32, (H + 2, W + 2, 1), 1)
        interior = (ri >= 1) & (ri <= H) & (ci >= 1) & (ci <= W)
        t = jnp.where(interior, t, 0.0).astype(jnp.bfloat16)
    else:
        t = xp                                              # bf16, zero-padded

    # 9 shifted bf16 matmuls accumulated in f32 on the MXU (no HBM im2col).
    acc = jnp.zeros((H * W, Cout), jnp.float32)
    for k in range(9):
        dh, dw = k // 3, k % 3
        patch = t[dh:dh + H, dw:dw + W, :].reshape(H * W, Cin)
        acc = acc + jnp.dot(patch, w_ref[k], preferred_element_type=jnp.float32)

    o_ref[...] = acc.reshape(1, H, W, Cout)

    # BN-stats epilogue while the f32 tile is still in VMEM (saves a full
    # memory-bound pass over the activation).
    s = jnp.sum(acc, axis=0, keepdims=True)                 # (1, Cout)
    sq = jnp.sum(acc * acc, axis=0, keepdims=True)          # (1, Cout)
    row = lax.broadcasted_iota(jnp.int32, (8, Cout), 0)
    stats = jnp.where(row == 0, s, jnp.where(row == 1, sq, 0.0))
    stats_ref[...] = stats.reshape(1, 8, Cout)


def _bn_add_relu_kernel(y_ref, res_ref, scale_ref, shift_ref, o_ref):
    # lane-dense fused bn2 + residual add + relu
    o_ref[...] = jnp.maximum(
        y_ref[...] * scale_ref[...] + shift_ref[...] + res_ref[...], 0.0)


# --------------------------------------------------------------- wrappers ---

def conv3x3_bn_stats(xp, w9, scale=None, shift=None):
    """Per-image 3x3 conv with fused (optional) input-BN+ReLU and stats epilogue.

    xp : (N, H+2, W+2, Cin) zero-padded NHWC input (bf16, or f32 when fusing BN)
    w9 : (9, Cin, Cout) bf16 weights, k = kh*3 + kw
    Returns y (N, H, W, Cout) f32 and stats (N, 8, Cout) f32.
    """
    N, Hp, Wp, Cin = xp.shape
    H, W = Hp - 2, Wp - 2
    Cout = w9.shape[-1]
    fuse = scale is not None

    in_specs = [pl.BlockSpec((1, Hp, Wp, Cin), lambda n: (n, 0, 0, 0)),
                pl.BlockSpec((9, Cin, Cout), lambda n: (0, 0, 0))]
    args = [xp, w9]
    if fuse:
        in_specs += [pl.BlockSpec((1, Cin), lambda n: (0, 0)),
                     pl.BlockSpec((1, Cin), lambda n: (0, 0))]
        args += [scale.reshape(1, Cin), shift.reshape(1, Cin)]

    kernel = functools.partial(_conv3x3_kernel, H=H, W=W, apply_bn_relu=fuse)
    y, stats = pl.pallas_call(
        kernel,
        out_shape=(jax.ShapeDtypeStruct((N, H, W, Cout), jnp.float32),
                   jax.ShapeDtypeStruct((N, 8, Cout), jnp.float32)),
        grid_spec=pltpu.PrefetchScalarGridSpec(
            num_scalar_prefetch=0,
            grid=(N,),
            in_specs=in_specs,
            out_specs=(pl.BlockSpec((1, H, W, Cout), lambda n: (n, 0, 0, 0)),
                       pl.BlockSpec((1, 8, Cout), lambda n: (n, 0, 0)))),
        compiler_params=pltpu.CompilerParams(
            dimension_semantics=("parallel",)),     # megacore over images
    )(*args)
    return y, stats


def bn_add_relu(y, res, scale, shift):
    """relu(y*scale + shift + res) over (M, C), using a lane-dense (rows, >=128)
    view so stores are unmasked full-lane writes."""
    M, C = y.shape
    r = 1
    if C < 128:
        r = -(-128 // C)                  # pack r rows into the lane dim
        if M % r:
            r = 1                         # fallback: natural (masked) layout
    rows, L = M // r, C * r
    yv = y.reshape(rows, L)
    rv = res.reshape(rows, L)
    sc = jnp.tile(scale, r).reshape(1, L)
    sh = jnp.tile(shift, r).reshape(1, L)
    tb = rows if rows <= ROW_TILE else ROW_TILE

    out = pl.pallas_call(
        _bn_add_relu_kernel,
        out_shape=jax.ShapeDtypeStruct((rows, L), jnp.float32),
        grid_spec=pltpu.PrefetchScalarGridSpec(
            num_scalar_prefetch=0,
            grid=(pl.cdiv(rows, tb),),
            in_specs=[pl.BlockSpec((tb, L), lambda i: (i, 0)),
                      pl.BlockSpec((tb, L), lambda i: (i, 0)),
                      pl.BlockSpec((1, L), lambda i: (0, 0)),
                      pl.BlockSpec((1, L), lambda i: (0, 0))],
            out_specs=pl.BlockSpec((tb, L), lambda i: (i, 0))),
        compiler_params=pltpu.CompilerParams(
            dimension_semantics=("parallel",)),
    )(yv, rv, sc, sh)
    return out.reshape(M, C)


# ------------------------------------------------------------------- glue ---

def _weight_to_k9(w_oihw):
    """(Cout, Cin, 3, 3) -> (9, Cin, Cout) bf16, k = kh*3 + kw."""
    Cout, Cin = w_oihw.shape[:2]
    return (jnp.transpose(w_oihw, (2, 3, 1, 0))
            .reshape(9, Cin, Cout).astype(jnp.bfloat16))


def _bn_affine_from_stats(stats, gamma, beta, count):
    """Combine per-image (sum, sumsq) partials -> per-channel scale/shift."""
    s = jnp.sum(stats[:, 0, :], axis=0)
    sq = jnp.sum(stats[:, 1, :], axis=0)
    mean = s / count
    var = sq / count - mean * mean        # biased variance (PyTorch BN norm)
    scale = gamma / jnp.sqrt(var + EPS)
    shift = beta - mean * scale
    return scale, shift


def basic_block_forward(x_nchw, params):
    w1, g1, b1, w2, g2, b2 = params
    N, C, H, W = x_nchw.shape
    planes = w1.shape[0]
    M = N * H * W

    x = jnp.transpose(x_nchw, (0, 2, 3, 1)).astype(jnp.float32)      # NHWC
    pad = ((0, 0), (1, 1), (1, 1), (0, 0))

    # conv1 (+ fused BN-stats epilogue); raw input cast to bf16 for the MXU.
    xp = jnp.pad(x.astype(jnp.bfloat16), pad)
    y1, stats1 = conv3x3_bn_stats(xp, _weight_to_k9(w1))
    scale1, shift1 = _bn_affine_from_stats(stats1, g1, b1, M)

    # conv2 with bn1 + ReLU fused into its load path (+ BN-stats epilogue).
    y1p = jnp.pad(y1, pad)                                           # f32
    y2, stats2 = conv3x3_bn_stats(y1p, _weight_to_k9(w2), scale1, shift1)
    scale2, shift2 = _bn_affine_from_stats(stats2, g2, b2, M)

    # bn2 + residual add + relu (identity = x; no downsample at defaults).
    out = bn_add_relu(y2.reshape(M, planes), x.reshape(M, C), scale2, shift2)
    return jnp.transpose(out.reshape(N, H, W, planes), (0, 3, 1, 2))  # NCHW


# -------------------------------------------------------- pure-JAX reference

def basic_block_reference(x, params):
    w1, g1, b1, w2, g2, b2 = params

    def conv(x, w):
        # Mirrors the kernel's MXU precision: bf16 operands, f32 accumulation.
        return lax.conv_general_dilated(
            x.astype(jnp.bfloat16), w.astype(jnp.bfloat16), (1, 1),
            ((1, 1), (1, 1)), dimension_numbers=("NCHW", "OIHW", "NCHW"),
            preferred_element_type=jnp.float32)

    def bn(y, g, b):
        mean = jnp.mean(y, axis=(0, 2, 3), keepdims=True)
        var = jnp.mean((y - mean) ** 2, axis=(0, 2, 3), keepdims=True)
        return (g[None, :, None, None] * (y - mean) / jnp.sqrt(var + EPS)
                + b[None, :, None, None])

    out = jax.nn.relu(bn(conv(x, w1), g1, b1))
    out = bn(conv(out, w2), g2, b2) + x
    return jax.nn.relu(out)


# ------------------------------------------------------------------- main ---

if __name__ == "__main__":
    key = jax.random.PRNGKey(0)
    k_x, k_w1, k_w2, k_g1, k_b1, k_g2, k_b2 = jax.random.split(key, 7)

    N, inplanes, planes, H, W = 2, 8, 8, 16, 16   # stride=1, downsample=None
    x = jax.random.normal(k_x, (N, inplanes, H, W), dtype=jnp.float32)

    w1 = 0.1 * jax.random.normal(k_w1, (planes, inplanes, 3, 3), jnp.float32)
    w2 = 0.1 * jax.random.normal(k_w2, (planes, planes, 3, 3), jnp.float32)
    g1 = 1.0 + 0.1 * jax.random.normal(k_g1, (planes,), jnp.float32)
    b1 = 0.1 * jax.random.normal(k_b1, (planes,), jnp.float32)
    g2 = 1.0 + 0.1 * jax.random.normal(k_g2, (planes,), jnp.float32)
    b2 = 0.1 * jax.random.normal(k_b2, (planes,), jnp.float32)
    params = (w1, g1, b1, w2, g2, b2)

    out = jax.block_until_ready(jax.jit(basic_block_forward)(x, params))
    ref = jax.block_until_ready(basic_block_reference(x, params))

    assert out.shape == (N, planes, H, W)
    np.testing.assert_allclose(np.asarray(out), np.asarray(ref),
                               rtol=2e-3, atol=2e-3)
    print("KERNEL_OK")
</pallas_src>

<mosaic_0001>
module attributes {stable_mosaic.version = 11 : i64} {
  func.func @_conv3x3_kernel(%arg0: i32, %arg1: memref<1x18x18x8xbf16, #tpu.memory_space<vmem>>, %arg2: memref<9x8x8xbf16, #tpu.memory_space<vmem>>, %arg3: memref<1x16x16x8xf32, #tpu.memory_space<vmem>>, %arg4: memref<1x8x8xf32, #tpu.memory_space<vmem>>) attributes {dimension_semantics = [#tpu.dimension_semantics<parallel>], iteration_bounds = array<i64: 2>, scalar_prefetch = 0 : i64, scratch_operands = 0 : i64, tpu.core_type = #tpu.core_type<tc>, window_params = [{transform_indices = @transform_0, window_bounds = array<i64: 1, 18, 18, 8>}, {pipeline_mode = #tpu.pipeline_mode<synchronous>, transform_indices = @transform_1, window_bounds = array<i64: 9, 8, 8>}, {transform_indices = @transform_2, window_bounds = array<i64: 1, 16, 16, 8>}, {transform_indices = @transform_3, window_bounds = array<i64: 1, 8, 8>}]} {
    %c0 = arith.constant 0 : index
    %c0_0 = arith.constant 0 : index
    %c0_1 = arith.constant 0 : index
    %c0_2 = arith.constant 0 : index
    %0 = vector.load %arg1[%c0, %c0_0, %c0_1, %c0_2] : memref<1x18x18x8xbf16, #tpu.memory_space<vmem>>, vector<1x18x18x8xbf16>
    %1 = vector.shape_cast %0 : vector<1x18x18x8xbf16> to vector<18x18x8xbf16>
    %cst = arith.constant 0.000000e+00 : f32
    %2 = vector.broadcast %cst : f32 to vector<256x8xf32>
    %3 = vector.extract_strided_slice %1 {offsets = [0, 0, 0], sizes = [16, 16, 8], strides = [1, 1, 1]} : vector<18x18x8xbf16> to vector<16x16x8xbf16>
    %4 = vector.shape_cast %3 : vector<16x16x8xbf16> to vector<256x8xbf16>
    %c0_3 = arith.constant 0 : index
    %c0_4 = arith.constant 0 : index
    %c0_5 = arith.constant 0 : index
    %5 = vector.load %arg2[%c0_3, %c0_4, %c0_5] : memref<9x8x8xbf16, #tpu.memory_space<vmem>>, vector<1x8x8xbf16>
    %6 = vector.shape_cast %5 : vector<1x8x8xbf16> to vector<8x8xbf16>
    %cst_6 = arith.constant dense<0.000000e+00> : vector<256x8xf32>
    %7 = tpu.matmul %4, %6, %cst_6 {dimension_numbers = #tpu.dot_dimension_numbers<[1], [0], [0], [1], [0, 0, 1, 1], [], []>} : vector<256x8xbf16>, vector<8x8xbf16>, vector<256x8xf32> -> vector<256x8xf32>
    %8 = arith.addf %2, %7 : vector<256x8xf32>
    %9 = vector.extract_strided_slice %1 {offsets = [0, 1, 0], sizes = [16, 16, 8], strides = [1, 1, 1]} : vector<18x18x8xbf16> to vector<16x16x8xbf16>
    %10 = vector.shape_cast %9 : vector<16x16x8xbf16> to vector<256x8xbf16>
    %c1 = arith.constant 1 : index
    %c0_7 = arith.constant 0 : index
    %c0_8 = arith.constant 0 : index
    %11 = vector.load %arg2[%c1, %c0_7, %c0_8] : memref<9x8x8xbf16, #tpu.memory_space<vmem>>, vector<1x8x8xbf16>
    %12 = vector.shape_cast %11 : vector<1x8x8xbf16> to vector<8x8xbf16>
    %cst_9 = arith.constant dense<0.000000e+00> : vector<256x8xf32>
    %13 = tpu.matmul %10, %12, %cst_9 {dimension_numbers = #tpu.dot_dimension_numbers<[1], [0], [0], [1], [0, 0, 1, 1], [], []>} : vector<256x8xbf16>, vector<8x8xbf16>, vector<256x8xf32> -> vector<256x8xf32>
    %14 = arith.addf %8, %13 : vector<256x8xf32>
    %15 = vector.extract_strided_slice %1 {offsets = [0, 2, 0], sizes = [16, 16, 8], strides = [1, 1, 1]} : vector<18x18x8xbf16> to vector<16x16x8xbf16>
    %16 = vector.shape_cast %15 : vector<16x16x8xbf16> to vector<256x8xbf16>
    %c2 = arith.constant 2 : index
    %c0_10 = arith.constant 0 : index
    %c0_11 = arith.constant 0 : index
    %17 = vector.load %arg2[%c2, %c0_10, %c0_11] : memref<9x8x8xbf16, #tpu.memory_space<vmem>>, vector<1x8x8xbf16>
    %18 = vector.shape_cast %17 : vector<1x8x8xbf16> to vector<8x8xbf16>
    %cst_12 = arith.constant dense<0.000000e+00> : vector<256x8xf32>
    %19 = tpu.matmul %16, %18, %cst_12 {dimension_numbers = #tpu.dot_dimension_numbers<[1], [0], [0], [1], [0, 0, 1, 1], [], []>} : vector<256x8xbf16>, vector<8x8xbf16>, vector<256x8xf32> -> vector<256x8xf32>
    %20 = arith.addf %14, %19 : vector<256x8xf32>
    %21 = vector.extract_strided_slice %1 {offsets = [1, 0, 0], sizes = [16, 16, 8], strides = [1, 1, 1]} : vector<18x18x8xbf16> to vector<16x16x8xbf16>
    %22 = vector.shape_cast %21 : vector<16x16x8xbf16> to vector<256x8xbf16>
    %c3 = arith.constant 3 : index
    %c0_13 = arith.constant 0 : index
    %c0_14 = arith.constant 0 : index
    %23 = vector.load %arg2[%c3, %c0_13, %c0_14] : memref<9x8x8xbf16, #tpu.memory_space<vmem>>, vector<1x8x8xbf16>
    %24 = vector.shape_cast %23 : vector<1x8x8xbf16> to vector<8x8xbf16>
    %cst_15 = arith.constant dense<0.000000e+00> : vector<256x8xf32>
    %25 = tpu.matmul %22, %24, %cst_15 {dimension_numbers = #tpu.dot_dimension_numbers<[1], [0], [0], [1], [0, 0, 1, 1], [], []>} : vector<256x8xbf16>, vector<8x8xbf16>, vector<256x8xf32> -> vector<256x8xf32>
    %26 = arith.addf %20, %25 : vector<256x8xf32>
    %27 = vector.extract_strided_slice %1 {offsets = [1, 1, 0], sizes = [16, 16, 8], strides = [1, 1, 1]} : vector<18x18x8xbf16> to vector<16x16x8xbf16>
    %28 = vector.shape_cast %27 : vector<16x16x8xbf16> to vector<256x8xbf16>
    %c4 = arith.constant 4 : index
    %c0_16 = arith.constant 0 : index
    %c0_17 = arith.constant 0 : index
    %29 = vector.load %arg2[%c4, %c0_16, %c0_17] : memref<9x8x8xbf16, #tpu.memory_space<vmem>>, vector<1x8x8xbf16>
    %30 = vector.shape_cast %29 : vector<1x8x8xbf16> to vector<8x8xbf16>
    %cst_18 = arith.constant dense<0.000000e+00> : vector<256x8xf32>
    %31 = tpu.matmul %28, %30, %cst_18 {dimension_numbers = #tpu.dot_dimension_numbers<[1], [0], [0], [1], [0, 0, 1, 1], [], []>} : vector<256x8xbf16>, vector<8x8xbf16>, vector<256x8xf32> -> vector<256x8xf32>
    %32 = arith.addf %26, %31 : vector<256x8xf32>
    %33 = vector.extract_strided_slice %1 {offsets = [1, 2, 0], sizes = [16, 16, 8], strides = [1, 1, 1]} : vector<18x18x8xbf16> to vector<16x16x8xbf16>
    %34 = vector.shape_cast %33 : vector<16x16x8xbf16> to vector<256x8xbf16>
    %c5 = arith.constant 5 : index
    %c0_19 = arith.constant 0 : index
    %c0_20 = arith.constant 0 : index
    %35 = vector.load %arg2[%c5, %c0_19, %c0_20] : memref<9x8x8xbf16, #tpu.memory_space<vmem>>, vector<1x8x8xbf16>
    %36 = vector.shape_cast %35 : vector<1x8x8xbf16> to vector<8x8xbf16>
    %cst_21 = arith.constant dense<0.000000e+00> : vector<256x8xf32>
    %37 = tpu.matmul %34, %36, %cst_21 {dimension_numbers = #tpu.dot_dimension_numbers<[1], [0], [0], [1], [0, 0, 1, 1], [], []>} : vector<256x8xbf16>, vector<8x8xbf16>, vector<256x8xf32> -> vector<256x8xf32>
    %38 = arith.addf %32, %37 : vector<256x8xf32>
    %39 = vector.extract_strided_slice %1 {offsets = [2, 0, 0], sizes = [16, 16, 8], strides = [1, 1, 1]} : vector<18x18x8xbf16> to vector<16x16x8xbf16>
    %40 = vector.shape_cast %39 : vector<16x16x8xbf16> to vector<256x8xbf16>
    %c6 = arith.constant 6 : index
    %c0_22 = arith.constant 0 : index
    %c0_23 = arith.constant 0 : index
    %41 = vector.load %arg2[%c6, %c0_22, %c0_23] : memref<9x8x8xbf16, #tpu.memory_space<vmem>>, vector<1x8x8xbf16>
    %42 = vector.shape_cast %41 : vector<1x8x8xbf16> to vector<8x8xbf16>
    %cst_24 = arith.constant dense<0.000000e+00> : vector<256x8xf32>
    %43 = tpu.matmul %40, %42, %cst_24 {dimension_numbers = #tpu.dot_dimension_numbers<[1], [0], [0], [1], [0, 0, 1, 1], [], []>} : vector<256x8xbf16>, vector<8x8xbf16>, vector<256x8xf32> -> vector<256x8xf32>
    %44 = arith.addf %38, %43 : vector<256x8xf32>
    %45 = vector.extract_strided_slice %1 {offsets = [2, 1, 0], sizes = [16, 16, 8], strides = [1, 1, 1]} : vector<18x18x8xbf16> to vector<16x16x8xbf16>
    %46 = vector.shape_cast %45 : vector<16x16x8xbf16> to vector<256x8xbf16>
    %c7 = arith.constant 7 : index
    %c0_25 = arith.constant 0 : index
    %c0_26 = arith.constant 0 : index
    %47 = vector.load %arg2[%c7, %c0_25, %c0_26] : memref<9x8x8xbf16, #tpu.memory_space<vmem>>, vector<1x8x8xbf16>
    %48 = vector.shape_cast %47 : vector<1x8x8xbf16> to vector<8x8xbf16>
    %cst_27 = arith.constant dense<0.000000e+00> : vector<256x8xf32>
    %49 = tpu.matmul %46, %48, %cst_27 {dimension_numbers = #tpu.dot_dimension_numbers<[1], [0], [0], [1], [0, 0, 1, 1], [], []>} : vector<256x8xbf16>, vector<8x8xbf16>, vector<256x8xf32> -> vector<256x8xf32>
    %50 = arith.addf %44, %49 : vector<256x8xf32>
    %51 = vector.extract_strided_slice %1 {offsets = [2, 2, 0], sizes = [16, 16, 8], strides = [1, 1, 1]} : vector<18x18x8xbf16> to vector<16x16x8xbf16>
    %52 = vector.shape_cast %51 : vector<16x16x8xbf16> to vector<256x8xbf16>
    %c8 = arith.constant 8 : index
    %c0_28 = arith.constant 0 : index
    %c0_29 = arith.constant 0 : index
    %53 = vector.load %arg2[%c8, %c0_28, %c0_29] : memref<9x8x8xbf16, #tpu.memory_space<vmem>>, vector<1x8x8xbf16>
    %54 = vector.shape_cast %53 : vector<1x8x8xbf16> to vector<8x8xbf16>
    %cst_30 = arith.constant dense<0.000000e+00> : vector<256x8xf32>
    %55 = tpu.matmul %52, %54, %cst_30 {dimension_numbers = #tpu.dot_dimension_numbers<[1], [0], [0], [1], [0, 0, 1, 1], [], []>} : vector<256x8xbf16>, vector<8x8xbf16>, vector<256x8xf32> -> vector<256x8xf32>
    %56 = arith.addf %50, %55 : vector<256x8xf32>
    %57 = vector.shape_cast %56 : vector<256x8xf32> to vector<1x16x16x8xf32>
    %c0_31 = arith.constant 0 : index
    %c0_32 = arith.constant 0 : index
    %c0_33 = arith.constant 0 : index
    %c0_34 = arith.constant 0 : index
    %58 = vector.load %arg3[%c0_31, %c0_32, %c0_33, %c0_34] : memref<1x16x16x8xf32, #tpu.memory_space<vmem>>, vector<1x16x16x8xf32>
    tpu.vector_store %arg3[%c0_31, %c0_32, %c0_33, %c0_34], %57 {strides = array<i32>} : memref<1x16x16x8xf32, #tpu.memory_space<vmem>>, vector<1x16x16x8xf32>,
    %cst_35 = arith.constant dense<0.000000e+00> : vector<8xf32>
    %59 = vector.multi_reduction <add>, %56, %cst_35 [0] : vector<256x8xf32> to vector<8xf32>
    %60 = vector.shape_cast %59 : vector<8xf32> to vector<1x8xf32>
    %61 = arith.mulf %56, %56 : vector<256x8xf32>
    %cst_36 = arith.constant dense<0.000000e+00> : vector<8xf32>
    %62 = vector.multi_reduction <add>, %61, %cst_36 [0] : vector<256x8xf32> to vector<8xf32>
    %63 = vector.shape_cast %62 : vector<8xf32> to vector<1x8xf32>
    %64 = tpu.iota {dimensions = array<i32: 0>} : vector<8x8xi32>
    %c0_i32 = arith.constant 0 : i32
    %65 = vector.broadcast %c0_i32 : i32 to vector<8x8xi32>
    %66 = arith.cmpi eq, %64, %65 : vector<8x8xi32>
    %c1_i32 = arith.constant 1 : i32
    %67 = vector.broadcast %c1_i32 : i32 to vector<8x8xi32>
    %68 = arith.cmpi eq, %64, %67 : vector<8x8xi32>
    %cst_37 = arith.constant 0.000000e+00 : f32
    %69 = vector.shape_cast %63 : vector<1x8xf32> to vector<1x8xf32>
    %70 = vector.broadcast %69 : vector<1x8xf32> to vector<8x8xf32>
    %71 = vector.broadcast %cst_37 : f32 to vector<8x8xf32>
    %72 = arith.select %68, %70, %71 : vector<8x8xi1>, vector<8x8xf32>
    %73 = vector.shape_cast %60 : vector<1x8xf32> to vector<1x8xf32>
    %74 = vector.broadcast %73 : vector<1x8xf32> to vector<8x8xf32>
    %75 = arith.select %66, %74, %72 : vector<8x8xi1>, vector<8x8xf32>
    %76 = vector.shape_cast %75 : vector<8x8xf32> to vector<1x8x8xf32>
    %c0_38 = arith.constant 0 : index
    %c0_39 = arith.constant 0 : index
    %c0_40 = arith.constant 0 : index
    %77 = vector.load %arg4[%c0_38, %c0_39, %c0_40] : memref<1x8x8xf32, #tpu.memory_space<vmem>>, vector<1x8x8xf32>
    tpu.vector_store %arg4[%c0_38, %c0_39, %c0_40], %76 {strides = array<i32>} : memref<1x8x8xf32, #tpu.memory_space<vmem>>, vector<1x8x8xf32>,
    return
  }
  func.func @transform_0(%arg0: i32) -> (i32, i32, i32, i32) {
    %c0_i32 = arith.constant 0 : i32
    %c0_i32_0 = arith.constant 0 : i32
    %c0_i32_1 = arith.constant 0 : i32
    %c0_i32_2 = arith.constant 0 : i32
    return %arg0, %c0_i32, %c0_i32_0, %c0_i32_1 : i32, i32, i32, i32
  }
  func.func @transform_1(%arg0: i32) -> (i32, i32, i32) {
    %c0_i32 = arith.constant 0 : i32
    %c0_i32_0 = arith.constant 0 : i32
    %c0_i32_1 = arith.constant 0 : i32
    %c0_i32_2 = arith.constant 0 : i32
    return %c0_i32, %c0_i32_0, %c0_i32_1 : i32, i32, i32
  }
  func.func @transform_2(%arg0: i32) -> (i32, i32, i32, i32) {
    %c0_i32 = arith.constant 0 : i32
    %c0_i32_0 = arith.constant 0 : i32
    %c0_i32_1 = arith.constant 0 : i32
    %c0_i32_2 = arith.constant 0 : i32
    return %arg0, %c0_i32, %c0_i32_0, %c0_i32_1 : i32, i32, i32, i32
  }
  func.func @transform_3(%arg0: i32) -> (i32, i32, i32) {
    %c0_i32 = arith.constant 0 : i32
    %c0_i32_0 = arith.constant 0 : i32
    %c0_i32_1 = arith.constant 0 : i32
    return %arg0, %c0_i32, %c0_i32_0 : i32, i32, i32
  }
}

module attributes {stable_mosaic.version = 11 : i64} {
  func.func @_conv3x3_kernel(%arg0: i32, %arg1: memref<1x18x18x8xf32, #tpu.memory_space<vmem>>, %arg2: memref<9x8x8xbf16, #tpu.memory_space<vmem>>, %arg3: memref<1x8xf32, #tpu.memory_space<vmem>>, %arg4: memref<1x8xf32, #tpu.memory_space<vmem>>, %arg5: memref<1x16x16x8xf32, #tpu.memory_space<vmem>>, %arg6: memref<1x8x8xf32, #tpu.memory_space<vmem>>) attributes {dimension_semantics = [#tpu.dimension_semantics<parallel>], iteration_bounds = array<i64: 2>, scalar_prefetch = 0 : i64, scratch_operands = 0 : i64, tpu.core_type = #tpu.core_type<tc>, window_params = [{transform_indices = @transform_0, window_bounds = array<i64: 1, 18, 18, 8>}, {pipeline_mode = #tpu.pipeline_mode<synchronous>, transform_indices = @transform_1, window_bounds = array<i64: 9, 8, 8>}, {pipeline_mode = #tpu.pipeline_mode<synchronous>, transform_indices = @transform_2, window_bounds = array<i64: 1, 8>}, {pipeline_mode = #tpu.pipeline_mode<synchronous>, transform_indices = @transform_3, window_bounds = array<i64: 1, 8>}, {transform_indices = @transform_4, window_bounds = array<i64: 1, 16, 16, 8>}, {transform_indices = @transform_5, window_bounds = array<i64: 1, 8, 8>}]} {
    %c0 = arith.constant 0 : index
    %c0_0 = arith.constant 0 : index
    %c0_1 = arith.constant 0 : index
    %c0_2 = arith.constant 0 : index
    %0 = vector.load %arg1[%c0, %c0_0, %c0_1, %c0_2] : memref<1x18x18x8xf32, #tpu.memory_space<vmem>>, vector<1x18x18x8xf32>
    %1 = vector.shape_cast %0 : vector<1x18x18x8xf32> to vector<18x18x8xf32>
    %c0_3 = arith.constant 0 : index
    %c0_4 = arith.constant 0 : index
    %2 = vector.load %arg3[%c0_3, %c0_4] : memref<1x8xf32, #tpu.memory_space<vmem>>, vector<1x8xf32>
    %3 = vector.shape_cast %2 : vector<1x8xf32> to vector<1x1x8xf32>
    %4 = vector.broadcast %3 : vector<1x1x8xf32> to vector<18x18x8xf32>
    %5 = arith.mulf %1, %4 : vector<18x18x8xf32>
    %c0_5 = arith.constant 0 : index
    %c0_6 = arith.constant 0 : index
    %6 = vector.load %arg4[%c0_5, %c0_6] : memref<1x8xf32, #tpu.memory_space<vmem>>, vector<1x8xf32>
    %7 = vector.shape_cast %6 : vector<1x8xf32> to vector<1x1x8xf32>
    %8 = vector.broadcast %7 : vector<1x1x8xf32> to vector<18x18x8xf32>
    %9 = arith.addf %5, %8 : vector<18x18x8xf32>
    %cst = arith.constant 0.000000e+00 : f32
    %10 = vector.broadcast %cst : f32 to vector<18x18x8xf32>
    %11 = arith.maximumf %9, %10 : vector<18x18x8xf32>
    %12 = tpu.iota {dimensions = array<i32: 0>} : vector<18x18x1xi32>
    %13 = tpu.iota {dimensions = array<i32: 1>} : vector<18x18x1xi32>
    %c1_i32 = arith.constant 1 : i32
    %14 = vector.broadcast %c1_i32 : i32 to vector<18x18x1xi32>
    %15 = arith.cmpi sge, %12, %14 : vector<18x18x1xi32>
    %c16_i32 = arith.constant 16 : i32
    %16 = vector.broadcast %c16_i32 : i32 to vector<18x18x1xi32>
    %17 = arith.cmpi sle, %12, %16 : vector<18x18x1xi32>
    %18 = arith.andi %15, %17 : vector<18x18x1xi1>
    %c1_i32_7 = arith.constant 1 : i32
    %19 = vector.broadcast %c1_i32_7 : i32 to vector<18x18x1xi32>
    %20 = arith.cmpi sge, %13, %19 : vector<18x18x1xi32>
    %21 = arith.andi %18, %20 : vector<18x18x1xi1>
    %c16_i32_8 = arith.constant 16 : i32
    %22 = vector.broadcast %c16_i32_8 : i32 to vector<18x18x1xi32>
    %23 = arith.cmpi sle, %13, %22 : vector<18x18x1xi32>
    %24 = arith.andi %21, %23 : vector<18x18x1xi1>
    %cst_9 = arith.constant 0.000000e+00 : f32
    %25 = vector.shape_cast %24 : vector<18x18x1xi1> to vector<18x18x1xi1>
    %26 = vector.broadcast %25 : vector<18x18x1xi1> to vector<18x18x8xi1>
    %27 = vector.broadcast %cst_9 : f32 to vector<18x18x8xf32>
    %28 = arith.select %26, %11, %27 : vector<18x18x8xi1>, vector<18x18x8xf32>
    %29 = arith.truncf %28 : vector<18x18x8xf32> to vector<18x18x8xbf16>
    %cst_10 = arith.constant 0.000000e+00 : f32
    %30 = vector.broadcast %cst_10 : f32 to vector<256x8xf32>
    %31 = vector.extract_strided_slice %29 {offsets = [0, 0, 0], sizes = [16, 16, 8], strides = [1, 1, 1]} : vector<18x18x8xbf16> to vector<16x16x8xbf16>
    %32 = vector.shape_cast %31 : vector<16x16x8xbf16> to vector<256x8xbf16>
    %c0_11 = arith.constant 0 : index
    %c0_12 = arith.constant 0 : index
    %c0_13 = arith.constant 0 : index
    %33 = vector.load %arg2[%c0_11, %c0_12, %c0_13] : memref<9x8x8xbf16, #tpu.memory_space<vmem>>, vector<1x8x8xbf16>
    %34 = vector.shape_cast %33 : vector<1x8x8xbf16> to vector<8x8xbf16>
    %cst_14 = arith.constant dense<0.000000e+00> : vector<256x8xf32>
    %35 = tpu.matmul %32, %34, %cst_14 {dimension_numbers = #tpu.dot_dimension_numbers<[1], [0], [0], [1], [0, 0, 1, 1], [], []>} : vector<256x8xbf16>, vector<8x8xbf16>, vector<256x8xf32> -> vector<256x8xf32>
    %36 = arith.addf %30, %35 : vector<256x8xf32>
    %37 = vector.extract_strided_slice %29 {offsets = [0, 1, 0], sizes = [16, 16, 8], strides = [1, 1, 1]} : vector<18x18x8xbf16> to vector<16x16x8xbf16>
    %38 = vector.shape_cast %37 : vector<16x16x8xbf16> to vector<256x8xbf16>
    %c1 = arith.constant 1 : index
    %c0_15 = arith.constant 0 : index
    %c0_16 = arith.constant 0 : index
    %39 = vector.load %arg2[%c1, %c0_15, %c0_16] : memref<9x8x8xbf16, #tpu.memory_space<vmem>>, vector<1x8x8xbf16>
    %40 = vector.shape_cast %39 : vector<1x8x8xbf16> to vector<8x8xbf16>
    %cst_17 = arith.constant dense<0.000000e+00> : vector<256x8xf32>
    %41 = tpu.matmul %38, %40, %cst_17 {dimension_numbers = #tpu.dot_dimension_numbers<[1], [0], [0], [1], [0, 0, 1, 1], [], []>} : vector<256x8xbf16>, vector<8x8xbf16>, vector<256x8xf32> -> vector<256x8xf32>
    %42 = arith.addf %36, %41 : vector<256x8xf32>
    %43 = vector.extract_strided_slice %29 {offsets = [0, 2, 0], sizes = [16, 16, 8], strides = [1, 1, 1]} : vector<18x18x8xbf16> to vector<16x16x8xbf16>
    %44 = vector.shape_cast %43 : vector<16x16x8xbf16> to vector<256x8xbf16>
    %c2 = arith.constant 2 : index
    %c0_18 = arith.constant 0 : index
    %c0_19 = arith.constant 0 : index
    %45 = vector.load %arg2[%c2, %c0_18, %c0_19] : memref<9x8x8xbf16, #tpu.memory_space<vmem>>, vector<1x8x8xbf16>
    %46 = vector.shape_cast %45 : vector<1x8x8xbf16> to vector<8x8xbf16>
    %cst_20 = arith.constant dense<0.000000e+00> : vector<256x8xf32>
    %47 = tpu.matmul %44, %46, %cst_20 {dimension_numbers = #tpu.dot_dimension_numbers<[1], [0], [0], [1], [0, 0, 1, 1], [], []>} : vector<256x8xbf16>, vector<8x8xbf16>, vector<256x8xf32> -> vector<256x8xf32>
    %48 = arith.addf %42, %47 : vector<256x8xf32>
    %49 = vector.extract_strided_slice %29 {offsets = [1, 0, 0], sizes = [16, 16, 8], strides = [1, 1, 1]} : vector<18x18x8xbf16> to vector<16x16x8xbf16>
    %50 = vector.shape_cast %49 : vector<16x16x8xbf16> to vector<256x8xbf16>
    %c3 = arith.constant 3 : index
    %c0_21 = arith.constant 0 : index
    %c0_22 = arith.constant 0 : index
    %51 = vector.load %arg2[%c3, %c0_21, %c0_22] : memref<9x8x8xbf16, #tpu.memory_space<vmem>>, vector<1x8x8xbf16>
    %52 = vector.shape_cast %51 : vector<1x8x8xbf16> to vector<8x8xbf16>
    %cst_23 = arith.constant dense<0.000000e+00> : vector<256x8xf32>
    %53 = tpu.matmul %50, %52, %cst_23 {dimension_numbers = #tpu.dot_dimension_numbers<[1], [0], [0], [1], [0, 0, 1, 1], [], []>} : vector<256x8xbf16>, vector<8x8xbf16>, vector<256x8xf32> -> vector<256x8xf32>
    %54 = arith.addf %48, %53 : vector<256x8xf32>
    %55 = vector.extract_strided_slice %29 {offsets = [1, 1, 0], sizes = [16, 16, 8], strides = [1, 1, 1]} : vector<18x18x8xbf16> to vector<16x16x8xbf16>
    %56 = vector.shape_cast %55 : vector<16x16x8xbf16> to vector<256x8xbf16>
    %c4 = arith.constant 4 : index
    %c0_24 = arith.constant 0 : index
    %c0_25 = arith.constant 0 : index
    %57 = vector.load %arg2[%c4, %c0_24, %c0_25] : memref<9x8x8xbf16, #tpu.memory_space<vmem>>, vector<1x8x8xbf16>
    %58 = vector.shape_cast %57 : vector<1x8x8xbf16> to vector<8x8xbf16>
    %cst_26 = arith.constant dense<0.000000e+00> : vector<256x8xf32>
    %59 = tpu.matmul %56, %58, %cst_26 {dimension_numbers = #tpu.dot_dimension_numbers<[1], [0], [0], [1], [0, 0, 1, 1], [], []>} : vector<256x8xbf16>, vector<8x8xbf16>, vector<256x8xf32> -> vector<256x8xf32>
    %60 = arith.addf %54, %59 : vector<256x8xf32>
    %61 = vector.extract_strided_slice %29 {offsets = [1, 2, 0], sizes = [16, 16, 8], strides = [1, 1, 1]} : vector<18x18x8xbf16> to vector<16x16x8xbf16>
    %62 = vector.shape_cast %61 : vector<16x16x8xbf16> to vector<256x8xbf16>
    %c5 = arith.constant 5 : index
    %c0_27 = arith.constant 0 : index
    %c0_28 = arith.constant 0 : index
    %63 = vector.load %arg2[%c5, %c0_27, %c0_28] : memref<9x8x8xbf16, #tpu.memory_space<vmem>>, vector<1x8x8xbf16>
    %64 = vector.shape_cast %63 : vector<1x8x8xbf16> to vector<8x8xbf16>
    %cst_29 = arith.constant dense<0.000000e+00> : vector<256x8xf32>
    %65 = tpu.matmul %62, %64, %cst_29 {dimension_numbers = #tpu.dot_dimension_numbers<[1], [0], [0], [1], [0, 0, 1, 1], [], []>} : vector<256x8xbf16>, vector<8x8xbf16>, vector<256x8xf32> -> vector<256x8xf32>
    %66 = arith.addf %60, %65 : vector<256x8xf32>
    %67 = vector.extract_strided_slice %29 {offsets = [2, 0, 0], sizes = [16, 16, 8], strides = [1, 1, 1]} : vector<18x18x8xbf16> to vector<16x16x8xbf16>
    %68 = vector.shape_cast %67 : vector<16x16x8xbf16> to vector<256x8xbf16>
    %c6 = arith.constant 6 : index
    %c0_30 = arith.constant 0 : index
    %c0_31 = arith.constant 0 : index
    %69 = vector.load %arg2[%c6, %c0_30, %c0_31] : memref<9x8x8xbf16, #tpu.memory_space<vmem>>, vector<1x8x8xbf16>
    %70 = vector.shape_cast %69 : vector<1x8x8xbf16> to vector<8x8xbf16>
    %cst_32 = arith.constant dense<0.000000e+00> : vector<256x8xf32>
    %71 = tpu.matmul %68, %70, %cst_32 {dimension_numbers = #tpu.dot_dimension_numbers<[1], [0], [0], [1], [0, 0, 1, 1], [], []>} : vector<256x8xbf16>, vector<8x8xbf16>, vector<256x8xf32> -> vector<256x8xf32>
    %72 = arith.addf %66, %71 : vector<256x8xf32>
    %73 = vector.extract_strided_slice %29 {offsets = [2, 1, 0], sizes = [16, 16, 8], strides = [1, 1, 1]} : vector<18x18x8xbf16> to vector<16x16x8xbf16>
    %74 = vector.shape_cast %73 : vector<16x16x8xbf16> to vector<256x8xbf16>
    %c7 = arith.constant 7 : index
    %c0_33 = arith.constant 0 : index
    %c0_34 = arith.constant 0 : index
    %75 = vector.load %arg2[%c7, %c0_33, %c0_34] : memref<9x8x8xbf16, #tpu.memory_space<vmem>>, vector<1x8x8xbf16>
    %76 = vector.shape_cast %75 : vector<1x8x8xbf16> to vector<8x8xbf16>
    %cst_35 = arith.constant dense<0.000000e+00> : vector<256x8xf32>
    %77 = tpu.matmul %74, %76, %cst_35 {dimension_numbers = #tpu.dot_dimension_numbers<[1], [0], [0], [1], [0, 0, 1, 1], [], []>} : vector<256x8xbf16>, vector<8x8xbf16>, vector<256x8xf32> -> vector<256x8xf32>
    %78 = arith.addf %72, %77 : vector<256x8xf32>
    %79 = vector.extract_strided_slice %29 {offsets = [2, 2, 0], sizes = [16, 16, 8], strides = [1, 1, 1]} : vector<18x18x8xbf16> to vector<16x16x8xbf16>
    %80 = vector.shape_cast %79 : vector<16x16x8xbf16> to vector<256x8xbf16>
    %c8 = arith.constant 8 : index
    %c0_36 = arith.constant 0 : index
    %c0_37 = arith.constant 0 : index
    %81 = vector.load %arg2[%c8, %c0_36, %c0_37] : memref<9x8x8xbf16, #tpu.memory_space<vmem>>, vector<1x8x8xbf16>
    %82 = vector.shape_cast %81 : vector<1x8x8xbf16> to vector<8x8xbf16>
    %cst_38 = arith.constant dense<0.000000e+00> : vector<256x8xf32>
    %83 = tpu.matmul %80, %82, %cst_38 {dimension_numbers = #tpu.dot_dimension_numbers<[1], [0], [0], [1], [0, 0, 1, 1], [], []>} : vector<256x8xbf16>, vector<8x8xbf16>, vector<256x8xf32> -> vector<256x8xf32>
    %84 = arith.addf %78, %83 : vector<256x8xf32>
    %85 = vector.shape_cast %84 : vector<256x8xf32> to vector<1x16x16x8xf32>
    %c0_39 = arith.constant 0 : index
    %c0_40 = arith.constant 0 : index
    %c0_41 = arith.constant 0 : index
    %c0_42 = arith.constant 0 : index
    %86 = vector.load %arg5[%c0_39, %c0_40, %c0_41, %c0_42] : memref<1x16x16x8xf32, #tpu.memory_space<vmem>>, vector<1x16x16x8xf32>
    tpu.vector_store %arg5[%c0_39, %c0_40, %c0_41, %c0_42], %85 {strides = array<i32>} : memref<1x16x16x8xf32, #tpu.memory_space<vmem>>, vector<1x16x16x8xf32>,
    %cst_43 = arith.constant dense<0.000000e+00> : vector<8xf32>
    %87 = vector.multi_reduction <add>, %84, %cst_43 [0] : vector<256x8xf32> to vector<8xf32>
    %88 = vector.shape_cast %87 : vector<8xf32> to vector<1x8xf32>
    %89 = arith.mulf %84, %84 : vector<256x8xf32>
    %cst_44 = arith.constant dense<0.000000e+00> : vector<8xf32>
    %90 = vector.multi_reduction <add>, %89, %cst_44 [0] : vector<256x8xf32> to vector<8xf32>
    %91 = vector.shape_cast %90 : vector<8xf32> to vector<1x8xf32>
    %92 = tpu.iota {dimensions = array<i32: 0>} : vector<8x8xi32>
    %c0_i32 = arith.constant 0 : i32
    %93 = vector.broadcast %c0_i32 : i32 to vector<8x8xi32>
    %94 = arith.cmpi eq, %92, %93 : vector<8x8xi32>
    %c1_i32_45 = arith.constant 1 : i32
    %95 = vector.broadcast %c1_i32_45 : i32 to vector<8x8xi32>
    %96 = arith.cmpi eq, %92, %95 : vector<8x8xi32>
    %cst_46 = arith.constant 0.000000e+00 : f32
    %97 = vector.shape_cast %91 : vector<1x8xf32> to vector<1x8xf32>
    %98 = vector.broadcast %97 : vector<1x8xf32> to vector<8x8xf32>
    %99 = vector.broadcast %cst_46 : f32 to vector<8x8xf32>
    %100 = arith.select %96, %98, %99 : vector<8x8xi1>, vector<8x8xf32>
    %101 = vector.shape_cast %88 : vector<1x8xf32> to vector<1x8xf32>
    %102 = vector.broadcast %101 : vector<1x8xf32> to vector<8x8xf32>
    %103 = arith.select %94, %102, %100 : vector<8x8xi1>, vector<8x8xf32>
    %104 = vector.shape_cast %103 : vector<8x8xf32> to vector<1x8x8xf32>
    %c0_47 = arith.constant 0 : index
    %c0_48 = arith.constant 0 : index
    %c0_49 = arith.constant 0 : index
    %105 = vector.load %arg6[%c0_47, %c0_48, %c0_49] : memref<1x8x8xf32, #tpu.memory_space<vmem>>, vector<1x8x8xf32>
    tpu.vector_store %arg6[%c0_47, %c0_48, %c0_49], %104 {strides = array<i32>} : memref<1x8x8xf32, #tpu.memory_space<vmem>>, vector<1x8x8xf32>,
    return
  }
  func.func @transform_0(%arg0: i32) -> (i32, i32, i32, i32) {
    %c0_i32 = arith.constant 0 : i32
    %c0_i32_0 = arith.constant 0 : i32
    %c0_i32_1 = arith.constant 0 : i32
    %c0_i32_2 = arith.constant 0 : i32
    return %arg0, %c0_i32, %c0_i32_0, %c0_i32_1 : i32, i32, i32, i32
  }
  func.func @transform_1(%arg0: i32) -> (i32, i32, i32) {
    %c0_i32 = arith.constant 0 : i32
    %c0_i32_0 = arith.constant 0 : i32
    %c0_i32_1 = arith.constant 0 : i32
    %c0_i32_2 = arith.constant 0 : i32
    return %c0_i32, %c0_i32_0, %c0_i32_1 : i32, i32, i32
  }
  func.func @transform_2(%arg0: i32) -> (i32, i32) {
    %c0_i32 = arith.constant 0 : i32
    %c0_i32_0 = arith.constant 0 : i32
    %c0_i32_1 = arith.constant 0 : i32
    return %c0_i32, %c0_i32_0 : i32, i32
  }
  func.func @transform_3(%arg0: i32) -> (i32, i32) {
    %c0_i32 = arith.constant 0 : i32
    %c0_i32_0 = arith.constant 0 : i32
    %c0_i32_1 = arith.constant 0 : i32
    return %c0_i32, %c0_i32_0 : i32, i32
  }
  func.func @transform_4(%arg0: i32) -> (i32, i32, i32, i32) {
    %c0_i32 = arith.constant 0 : i32
    %c0_i32_0 = arith.constant 0 : i32
    %c0_i32_1 = arith.constant 0 : i32
    %c0_i32_2 = arith.constant 0 : i32
    return %arg0, %c0_i32, %c0_i32_0, %c0_i32_1 : i32, i32, i32, i32
  }
  func.func @transform_5(%arg0: i32) -> (i32, i32, i32) {
    %c0_i32 = arith.constant 0 : i32
    %c0_i32_0 = arith.constant 0 : i32
    %c0_i32_1 = arith.constant 0 : i32
    return %arg0, %c0_i32, %c0_i32_0 : i32, i32, i32
  }
}

module attributes {stable_mosaic.version = 11 : i64} {
  func.func @_bn_add_relu_kernel(%arg0: i32, %arg1: memref<32x128xf32, #tpu.memory_space<vmem>>, %arg2: memref<32x128xf32, #tpu.memory_space<vmem>>, %arg3: memref<1x128xf32, #tpu.memory_space<vmem>>, %arg4: memref<1x128xf32, #tpu.memory_space<vmem>>, %arg5: memref<32x128xf32, #tpu.memory_space<vmem>>) attributes {dimension_semantics = [#tpu.dimension_semantics<parallel>], iteration_bounds = array<i64: 1>, scalar_prefetch = 0 : i64, scratch_operands = 0 : i64, tpu.core_type = #tpu.core_type<tc>, window_params = [{transform_indices = @transform_0, window_bounds = array<i64: 32, 128>}, {transform_indices = @transform_1, window_bounds = array<i64: 32, 128>}, {pipeline_mode = #tpu.pipeline_mode<synchronous>, transform_indices = @transform_2, window_bounds = array<i64: 1, 128>}, {pipeline_mode = #tpu.pipeline_mode<synchronous>, transform_indices = @transform_3, window_bounds = array<i64: 1, 128>}, {transform_indices = @transform_4, window_bounds = array<i64: 32, 128>}]} {
    %c0 = arith.constant 0 : index
    %c0_0 = arith.constant 0 : index
    %0 = vector.load %arg1[%c0, %c0_0] : memref<32x128xf32, #tpu.memory_space<vmem>>, vector<32x128xf32>
    %c0_1 = arith.constant 0 : index
    %c0_2 = arith.constant 0 : index
    %1 = vector.load %arg3[%c0_1, %c0_2] : memref<1x128xf32, #tpu.memory_space<vmem>>, vector<1x128xf32>
    %2 = vector.broadcast %1 : vector<1x128xf32> to vector<32x128xf32>
    %3 = arith.mulf %0, %2 : vector<32x128xf32>
    %c0_3 = arith.constant 0 : index
    %c0_4 = arith.constant 0 : index
    %4 = vector.load %arg4[%c0_3, %c0_4] : memref<1x128xf32, #tpu.memory_space<vmem>>, vector<1x128xf32>
    %5 = vector.broadcast %4 : vector<1x128xf32> to vector<32x128xf32>
    %6 = arith.addf %3, %5 : vector<32x128xf32>
    %c0_5 = arith.constant 0 : index
    %c0_6 = arith.constant 0 : index
    %7 = vector.load %arg2[%c0_5, %c0_6] : memref<32x128xf32, #tpu.memory_space<vmem>>, vector<32x128xf32>
    %8 = arith.addf %6, %7 : vector<32x128xf32>
    %cst = arith.constant 0.000000e+00 : f32
    %9 = vector.broadcast %cst : f32 to vector<32x128xf32>
    %10 = arith.maximumf %8, %9 : vector<32x128xf32>
    %c0_7 = arith.constant 0 : index
    %c0_8 = arith.constant 0 : index
    %11 = vector.load %arg5[%c0_7, %c0_8] : memref<32x128xf32, #tpu.memory_space<vmem>>, vector<32x128xf32>
    tpu.vector_store %arg5[%c0_7, %c0_8], %10 {strides = array<i32>} : memref<32x128xf32, #tpu.memory_space<vmem>>, vector<32x128xf32>,
    return
  }
  func.func @transform_0(%arg0: i32) -> (i32, i32) {
    %c0_i32 = arith.constant 0 : i32
    %c0_i32_0 = arith.constant 0 : i32
    return %arg0, %c0_i32 : i32, i32
  }
  func.func @transform_1(%arg0: i32) -> (i32, i32) {
    %c0_i32 = arith.constant 0 : i32
    %c0_i32_0 = arith.constant 0 : i32
    return %arg0, %c0_i32 : i32, i32
  }
  func.func @transform_2(%arg0: i32) -> (i32, i32) {
    %c0_i32 = arith.constant 0 : i32
    %c0_i32_0 = arith.constant 0 : i32
    %c0_i32_1 = arith.constant 0 : i32
    return %c0_i32, %c0_i32_0 : i32, i32
  }
  func.func @transform_3(%arg0: i32) -> (i32, i32) {
    %c0_i32 = arith.constant 0 : i32
    %c0_i32_0 = arith.constant 0 : i32
    %c0_i32_1 = arith.constant 0 : i32
    return %c0_i32, %c0_i32_0 : i32, i32
  }
  func.func @transform_4(%arg0: i32) -> (i32, i32) {
    %c0_i32 = arith.constant 0 : i32
    %c0_i32_0 = arith.constant 0 : i32
    return %arg0, %c0_i32 : i32, i32
  }
}

</mosaic_0001>

<bundles_post_ra>
// kernel: tile.13
= control target key start
LH: loop header
LB: loop body
LE: loop exit
PB: predicated region body
PF: predicated region fallthrough
CT: control target
= control target key end

     0   :  { %s28_s0 = inlined_call_operand.vmem [shape: f32[8], index: 0, kind: input, shape index: {}]   ;;  %s29_s1 = inlined_call_operand.vmem [shape: f32[16,8], index: 1, kind: output, shape index: {}]  }
   0x1   :  { %v4_v0 = vld [vmem:[%s28_s0] ss:$0 sm:$0xff] }
   0x2   :  { %5 = vst [vmem:[%s29_s1] sm:$0xff] %v4_v0 }
   0x3   :  { %8 = vst [vmem:[%s29_s1 + $0x8] sm:$0xff] %v4_v0 }

// kernel: tile.14
= control target key start
LH: loop header
LB: loop body
LE: loop exit
PB: predicated region body
PF: predicated region fallthrough
CT: control target
= control target key end

     0   :  { %s131_s10 = smov 120   ;;  %s132_s11 = smov 104   ;;  %vm3_vm0 = vcmask 64512   ;;  %vm9_vm1 = vcmask 1048512   ;;  %vm15_vm2 = vcmask 982912   ;;  %vm21_vm3 = vcmask 917312   ;;  %s207_s0 = inlined_call_operand.vmem [shape: f32[16,8], index: 0, kind: input, shape index: {}]   ;;  %s208_s1 = inlined_call_operand.vmem [shape: f32[1,128], index: 1, kind: output, shape index: {}]  }
   0x1   :  { %v101_v0 = vld [vmem:[%s207_s0 + $0xf] sm:$0x1]   ;;  %v103_v1 = vld [vmem:[%s207_s0 + $0xd] sm:$0x1]   ;;  %v105_v2 = vld [vmem:[%s207_s0 + $0xb] sm:$0x1]  }
   0x2   :  { %7 = vrot.lane.b32.xlu0 %v101_v0, %s131_s10  ;;  %19 = vrot.lane.b32.xlu1 %v103_v1, %s132_s11  ;;  %s133_s14 = smov 88   ;;  %v102_v3 = vld [vmem:[%s207_s0 + $0xe] sm:$0x1]   ;;  %v104_v4 = vld [vmem:[%s207_s0 + $0xc] sm:$0x1]   ;;  %s134_s19 = smov 112  }
   0x3   :  { %31 = vrot.lane.b32.xlu2 %v105_v2, %s133_s14  ;;  %s135_s20 = smov 96   ;;  %v106_v5 = vld [vmem:[%s207_s0 + $0xa] sm:$0x1]   ;;  %s136_s23 = smov 80   ;;  %v107_v6 = vld [vmem:[%s207_s0 + $0x9] sm:$0x1]  }
   0x4   :  { %v108_v7 = vld [vmem:[%s207_s0 + $0x8] sm:$0x1]   ;;  %s137_s28 = smov 72   ;;  %s138_s29 = smov 64   ;;  %v109_v8 = vld [vmem:[%s207_s0 + $0x7] sm:$0x1]  }
   0x5   :  { %s139_s3 = smov 56   ;;  %v110_v9 = vld [vmem:[%s207_s0 + $0x6] sm:$0x1]   ;;  %v111_v10 = vld [vmem:[%s207_s0 + $0x5] sm:$0x1]   ;;  %s140_s8 = smov 48  }
   0x6   :  { %s141_s9 = smov 40   ;;  %v112_v11 = vld [vmem:[%s207_s0 + $0x4] sm:$0x1]   ;;  %s142_s12 = smov 32   ;;  %v113_v12 = vld [vmem:[%s207_s0 + $0x3] sm:$0x1]  }
   0x7   :  { %v114_v13 = vld [vmem:[%s207_s0 + $0x2] sm:$0x1]   ;;  %s143_s17 = smov 24   ;;  %s144_s18 = smov 16   ;;  %v115_v14 = vld [vmem:[%s207_s0 + $0x1] sm:$0x1]  }
   0x8   :  { %s145_s21 = smov 8   ;;  %v2_v15 = vld [vmem:[%s207_s0] sm:$0x1]   ;;  %vm27_vm4 = vcmask 851712   ;;  %vm33_vm5 = vcmask 786112   ;;  %vm39_vm6 = vcmask 720512  }
   0x9   :  { %4 = vst.msk [vmem:[#allocation0] sm:$0x1] %vm3_vm0, %v2_v15   ;;  %vm45_vm7 = vcmask 654912   ;;  %vm51_vm8 = vcmask 589312   ;;  %vm57_vm9 = vcmask 523712   ;;  %vm63_vm10 = vcmask 458112  }
   0xa   :  { %13 = vrot.lane.b32.xlu0 %v102_v3, %s134_s19  ;;  %25 = vrot.lane.b32.xlu1 %v104_v4, %s135_s20  ;;  %vm69_vm11 = vcmask 392512   ;;  %vm75_vm12 = vcmask 326912   ;;  %vm81_vm13 = vcmask 261312   ;;  %vm87_vm14 = vcmask 195712  }
   0xb   :  { %37 = vrot.lane.b32.xlu2 %v106_v5, %s136_s23  ;;  %vm93_vm15 = vcmask 130112  }
  0x12   :  { %43 = vrot.lane.b32.xlu0 %v107_v6, %s137_s28  ;;  %49 = vrot.lane.b32.xlu1 %v108_v7, %s138_s29 }
  0x13   :  { %55 = vrot.lane.b32.xlu2 %v109_v8, %s139_s3 }
  0x1a   :  { %61 = vrot.lane.b32.xlu0 %v110_v9, %s140_s8  ;;  %67 = vrot.lane.b32.xlu1 %v111_v10, %s141_s9 }
  0x1b   :  { %73 = vrot.lane.b32.xlu2 %v112_v11, %s142_s12 }
  0x22   :  { %79 = vrot.lane.b32.xlu0 %v113_v12, %s143_s17  ;;  %85 = vrot.lane.b32.xlu1 %v114_v13, %s144_s18 }
  0x23   :  { %91 = vrot.lane.b32.xlu2 %v115_v14, %s145_s21 }
  0x5d   :  { %v32_v16 = vpop.permute.xlu2 %31  }
  0x65   :  { %v38_v17 = vpop.permute.xlu2 %37  }
  0x6d   :  { %v56_v18 = vpop.permute.xlu2 %55  }
  0x74   :  { %v8_v19 = vpop.permute.xlu0 %7   ;;  %v20_v20 = vpop.permute.xlu1 %19  }
  0x75   :  { %10 = vst.msk [vmem:[#allocation0] sm:$0x1] %vm9_vm1, %v8_v19   ;;  %v74_v21 = vpop.permute.xlu2 %73  }
  0x7c   :  { %v14_v22 = vpop.permute.xlu0 %13   ;;  %v26_v23 = vpop.permute.xlu1 %25  }
  0x7d   :  { %16 = vst.msk [vmem:[#allocation0] sm:$0x1] %vm15_vm2, %v14_v22   ;;  %v92_v24 = vpop.permute.xlu2 %91  }
  0x7e   :  { %22 = vst.msk [vmem:[#allocation0] sm:$0x1] %vm21_vm3, %v20_v20  }
  0x7f   :  { %28 = vst.msk [vmem:[#allocation0] sm:$0x1] %vm27_vm4, %v26_v23  }
  0x80   :  { %34 = vst.msk [vmem:[#allocation0] sm:$0x1] %vm33_vm5, %v32_v16  }
  0x81   :  { %40 = vst.msk [vmem:[#allocation0] sm:$0x1] %vm39_vm6, %v38_v17  }
  0x84   :  { %v44_v25 = vpop.permute.xlu0 %43   ;;  %v50_v26 = vpop.permute.xlu1 %49  }
  0x85   :  { %46 = vst.msk [vmem:[#allocation0] sm:$0x1] %vm45_vm7, %v44_v25  }
  0x86   :  { %52 = vst.msk [vmem:[#allocation0] sm:$0x1] %vm51_vm8, %v50_v26  }
  0x87   :  { %58 = vst.msk [vmem:[#allocation0] sm:$0x1] %vm57_vm9, %v56_v18  }
  0x8c   :  { %v62_v27 = vpop.permute.xlu0 %61   ;;  %v68_v28 = vpop.permute.xlu1 %67  }
  0x8d   :  { %64 = vst.msk [vmem:[#allocation0] sm:$0x1] %vm63_vm10, %v62_v27  }
  0x8e   :  { %70 = vst.msk [vmem:[#allocation0] sm:$0x1] %vm69_vm11, %v68_v28  }
  0x8f   :  { %76 = vst.msk [vmem:[#allocation0] sm:$0x1] %vm75_vm12, %v74_v21  }
  0x94   :  { %v80_v29 = vpop.permute.xlu0 %79   ;;  %v86_v30 = vpop.permute.xlu1 %85  }
  0x95   :  { %82 = vst.msk [vmem:[#allocation0] sm:$0x1] %vm81_vm13, %v80_v29  }
  0x96   :  { %88 = vst.msk [vmem:[#allocation0] sm:$0x1] %vm87_vm14, %v86_v30  }
  0x97   :  { %94 = vst.msk [vmem:[#allocation0] sm:$0x1] %vm93_vm15, %v92_v24  }
  0x9e   :  { %v97_v31 = vld [vmem:[#allocation0] sm:$0x1] }
  0x9f   :  { %100 = vst [vmem:[%s208_s1] sm:$0x1] %v97_v31 }

// kernel: basic_block_forward.5
= control target key start
LH: loop header
LB: loop body
LE: loop exit
PB: predicated region body
PF: predicated region fallthrough
CT: control target
= control target key end

     0   :  { %s126_s0 = inlined_call_operand.vmem [shape: f32[32,128], index: 0, kind: input, shape index: {}]   ;;  %s127_s2 = inlined_call_operand.vmem [shape: f32[1,128], index: 2, kind: input, shape index: {}]   ;;  %s128_s3 = inlined_call_operand.vmem [shape: f32[1,128], index: 3, kind: input, shape index: {}]   ;;  %s129_s1 = inlined_call_operand.vmem [shape: f32[32,128], index: 1, kind: input, shape index: {}]   ;;  %s130_s4 = inlined_call_operand.vmem [shape: f32[32,128], index: 4, kind: output, shape index: {}]  }
   0x1   :  { %v17_v0 = vld [vmem:[%s126_s0] sm:$0xff]  ;;  %v18_v4 = vld [vmem:[%s126_s0 + $0x8] sm:$0xff]  ;;  %v19_v5 = vld [vmem:[%s126_s0 + $0x10] sm:$0xff] }
   0x2   :  { %v57_v1 = vld [vmem:[%s127_s2] ss:$0 sm:$0xff]  ;;  %v20_v9 = vld [vmem:[%s126_s0 + $0x18] sm:$0xff]  ;;  %v38_v11 = vld [vmem:[%s129_s1 + $0x8] sm:$0xff] }
   0x3   :  { %v58_v2 = vld [vmem:[%s128_s3] ss:$0 sm:$0xff]  ;;  %v25_v3 = vmul.f32 %v57_v1, %v17_v0  ;;  %v26_v7 = vmul.f32 %v57_v1, %v18_v4  ;;  %v27_v8 = vmul.f32 %v57_v1, %v19_v5  ;;  %v39_v12 = vld [vmem:[%s129_s1 + $0x10] sm:$0xff]  ;;  %v28_v13 = vmul.f32 %v57_v1, %v20_v9  ;;  %v40_v16 = vld [vmem:[%s129_s1 + $0x18] sm:$0xff] }
   0x4   :  { %v37_v6 = vld [vmem:[%s129_s1] sm:$0xff] }
   0x5   :  { %v33_v10 = vadd.f32 %v58_v2, %v25_v3  ;;  %v34_v14 = vadd.f32 %v58_v2, %v26_v7  ;;  %v35_v15 = vadd.f32 %v58_v2, %v27_v8  ;;  %v36_v18 = vadd.f32 %v58_v2, %v28_v13 }
   0x7   :  { %v41_v17 = vadd.f32 %v37_v6, %v33_v10  ;;  %v42_v19 = vadd.f32 %v38_v11, %v34_v14  ;;  %v43_v20 = vadd.f32 %v39_v12, %v35_v15  ;;  %v44_v22 = vadd.f32 %v40_v16, %v36_v18 }
   0x9   :  { %v45_v21 = vmax.f32 %v41_v17, 0.0  ;;  %v46_v23 = vmax.f32 %v42_v19, 0.0  ;;  %v47_v24 = vmax.f32 %v43_v20, 0.0  ;;  %v48_v25 = vmax.f32 %v44_v22, 0.0 }
   0xb   :  { %49 = vst [vmem:[%s130_s4] sm:$0xff] %v45_v21 }
   0xc   :  { %50 = vst [vmem:[%s130_s4 + $0x8] sm:$0xff] %v46_v23 }
   0xd   :  { %51 = vst [vmem:[%s130_s4 + $0x10] sm:$0xff] %v47_v24 }
   0xe   :  { %52 = vst [vmem:[%s130_s4 + $0x18] sm:$0xff] %v48_v25 }

// kernel: basic_block_forward.4
= control target key start
LH: loop header
LB: loop body
LE: loop exit
PB: predicated region body
PF: predicated region fallthrough
CT: control target
= control target key end

     0   :  { %s3149_s18 = smov 0   ;;  %s4561_s0 = inlined_call_operand.vmem [shape: f32[2,18,18,8], index: 0, kind: input, shape index: {}]   ;;  %s4562_s1 = inlined_call_operand.vmem [shape: bf16[9,8,8], index: 1, kind: input, shape index: {}]   ;;  %s4563_s2 = inlined_call_operand.vmem [shape: f32[1,8], index: 2, kind: input, shape index: {}]   ;;  %s4564_s3 = inlined_call_operand.vmem [shape: f32[1,8], index: 3, kind: input, shape index: {}]   ;;  %s4565_s4 = inlined_call_operand.vmem [shape: f32[2,16,16,8], index: 4, kind: output, shape index: {0}]   ;;  %s4566_s5 = inlined_call_operand.vmem [shape: f32[2,8,8], index: 5, kind: output, shape index: {1}]  }
   0x1 LB: > { %s2909_s19 = sadd.s32 4294967295, %s3115_s18   ;;  %p2913_p0 = scmp.ge.s32.totalorder %s3115_s18, 1  ;;  %s3115_s18 = sphi %s3149_s18, %s16_s18  }
   0x2   : > { %p190_p1 = scmp.lt.s32.totalorder %s3115_s18, 3 }
   0x4   : > { %p191_p2 = pnand %p2913_p0, %p190_p1 }
   0x6   : > { %194 = sbr.rel (%p191_p2) target bundleno = 823 (0x337), region = 36 }
   0xb   : > { %v2918_v0 = vld [vmem:[%s4562_s1 + $0x4] sm:$0xf]  ;;  %vm1090_vm0 = vcmask 1043456   ;;  %p222_p3 = scmp.lt.s32.totalorder %s2909_s19, 1  ;;  %v461_v1 = vlaneseq  ;;  %v3169_v4 = vld [vmem:[%s4563_s2] ss:$0 sm:$0xff] }
   0xc   : > { %v1092_v2 = vsel %vm1090_vm0, %v2918_v0, 0  ;;  %v3117_v6 = vmov 0   ;;  %v3184_v9 = vld [vmem:[%s4564_s3] ss:$0 sm:$0xff]  ;;  %vm604_vm3 = vsmask.f32 3328 }
   0xd   : > { %3091 = vmatpush.bf16.msra.mxu1 %v1092_v2  ;;  %3092 = vmatpush.bf16.msra.mxu2 %v1092_v2  ;;  %s4756_s19 = smov (!%p222_p3, %s2909_s19), 1  ;;  %v3163_v3 = vshrl.u32 %v461_v1, 7  ;;  %v610_v7 = vrot.slane %v3117_v6, 4  ;;  %v3174_v8 = vrot.slane %v3117_v6, 5  ;;  %vm605_vm4 = vsmask.f32 7440 }
   0xe   : > { %3093 = vmatpush.bf16.msra.mxu3 %v1092_v2  ;;  %1101 = vmatpush.bf16.msra.mxu0 %v1092_v2  ;;  %s3094_s22 = smul.u32 432, %s4756_s19  ;;  %vm1041_vm5 = vcmask 64512   ;;  %vm3248_vm6 = vmor %vm604_vm3, %vm605_vm4  ;;  %vm1419_vm7 = vcmask 1042432   ;;  %vm1420_vm8 = vcmask 1046532   ;;  %s2917_s6 = sshll.u32 %s4756_s19, 3 }
   0xf   : > { %4629 = vst [vmem:[#allocation2_spill] sm:$0xff] %v3163_v3  ;;  %v3172_v5 = vadd.s32 16, %v3163_v3  ;;  %v614_v10 = vor.u32 %v3174_v8, %v610_v7  ;;  %vm465_vm1 = vcmp.ge.s32.totalorder %v3163_v3, 1  ;;  %vm3712_vm9 = vmor %vm1419_vm7, %vm1420_vm8  ;;  %s235_s9 = scalar_lea.vmem %s4566_s5, %s2917_s6 }
  0x10   : > { %s3179_s27 = scalar_lea.vmem %s4561_s0, %s3094_s22 }
  0x11   : > { %4630 = vst [vmem:[#allocation3_spill] sm:$0xff] %v3172_v5  ;;  %v249_v11 = vld [vmem:[%s3179_s27 + $0x60] sm:$0xff]  ;;  %v250_v12 = vld [vmem:[%s3179_s27 + $0x68] sm:$0xff]  ;;  %v251_v13 = vld [vmem:[%s3179_s27 + $0x70] sm:$0x3]  ;;  %vm476_vm2 = vcmp.le.s32.totalorder %v3172_v5, 16 }
  0x12   : > { %v307_v14 = vmul.f32 %v3169_v4, %v249_v11  ;;  %v308_v15 = vmul.f32 %v3169_v4, %v250_v12  ;;  %v309_v16 = vmul.f32 %v3169_v4, %v251_v13  ;;  %v261_v17 = vld [vmem:[%s3179_s27 + $0xc0] sm:$0xff]  ;;  %v262_v18 = vld [vmem:[%s3179_s27 + $0xc8] sm:$0xff]  ;;  %v263_v19 = vld [vmem:[%s3179_s27 + $0xd0] sm:$0x3]  ;;  %v3204_v26 = vrot.slane %v614_v10, 4 }
  0x13   : > { %v319_v20 = vmul.f32 %v3169_v4, %v261_v17  ;;  %v320_v21 = vmul.f32 %v3169_v4, %v262_v18  ;;  %v321_v22 = vmul.f32 %v3169_v4, %v263_v19  ;;  %v273_v23 = vld [vmem:[%s3179_s27 + $0x120] sm:$0xff]  ;;  %v274_v24 = vld [vmem:[%s3179_s27 + $0x128] sm:$0xff]  ;;  %v275_v25 = vld [vmem:[%s3179_s27 + $0x130] sm:$0x3] }
  0x14   : > { %v365_v27 = vadd.f32 %v3184_v9, %v307_v14  ;;  %v366_v28 = vadd.f32 %v3184_v9, %v308_v15  ;;  %v367_v29 = vadd.f32 %v3184_v9, %v309_v16  ;;  %v331_v30 = vmul.f32 %v3169_v4, %v273_v23 }
  0x15   : > { %v377_v31 = vadd.f32 %v3184_v9, %v319_v20  ;;  %v378_v32 = vadd.f32 %v3184_v9, %v320_v21  ;;  %v379_v33 = vadd.f32 %v3184_v9, %v321_v22  ;;  %v332_v34 = vmul.f32 %v3169_v4, %v274_v24 }
  0x16   : > { %v419_v35 = vmax.f32 %v365_v27, 0.0  ;;  %v420_v36 = vmax.f32 %v366_v28, 0.0  ;;  %v421_v37 = vmax.f32 %v367_v29, 0.0  ;;  %v333_v38 = vmul.f32 %v3169_v4, %v275_v25 }
  0x17   : > { %v431_v39 = vmax.f32 %v377_v31, 0.0  ;;  %v432_v40 = vmax.f32 %v378_v32, 0.0  ;;  %v433_v41 = vmax.f32 %v379_v33, 0.0  ;;  %v389_v42 = vadd.f32 %v3184_v9, %v331_v30 }
  0x18   : > { %v507_v43 = vsel %vm465_vm1, %v419_v35, 0.0  ;;  %v509_v44 = vsel %vm476_vm2, %v421_v37, 0.0  ;;  %v3220_v45 = vpack.c.bf16 %v420_v36, %v420_v36  ;;  %v390_v46 = vadd.f32 %v3184_v9, %v332_v34 }
  0x19   : > { %v3223_v47 = vpack.c.bf16 %v507_v43, %v507_v43  ;;  %v3225_v48 = vpack.c.bf16 %v509_v44, %v509_v44  ;;  %v519_v49 = vsel %vm465_vm1, %v431_v39, 0.0  ;;  %v521_v50 = vsel %vm476_vm2, %v433_v41, 0.0 }
  0x1a   : > { %v713_v51 = vshll.u32 %v3220_v45, 16  ;;  %v717_v52 = vshrl.u32 %v3220_v45, 16  ;;  %v3233_v53 = vpack.c.bf16 %v519_v49, %v519_v49  ;;  %v3235_v54 = vpack.c.bf16 %v432_v40, %v432_v40 }
  0x1b   : > { %v704_v55 = vshrl.u32 %v3223_v47, 16  ;;  %v707_v56 = vshll.u32 %v3223_v47, 16  ;;  %v723_v57 = vshll.u32 %v3225_v48, 16  ;;  %v3240_v58 = vpack.c.bf16 %v521_v50, %v521_v50  ;;  %v2984_v50 = vld [vmem:[%s4562_s1 + $0xc] sm:$0xf] }
  0x1c   : > { %v715_v59 = vrot.slane %v713_v51, 5  ;;  %v719_v60 = vrot.slane %v717_v52, 4  ;;  %v800_v61 = vshrl.u32 %v3233_v53, 16  ;;  %v803_v62 = vshll.u32 %v3233_v53, 16  ;;  %v603_v51 = vld [vmem:[%s4562_s1] sm:$0xf] }
  0x1d   : > { %v706_v63 = vrot.slane %v704_v55, 4  ;;  %v709_v0 = vrot.slane %v707_v56, 5  ;;  %v725_v1 = vrot.slane %v723_v57, 5  ;;  %v809_v2 = vshll.u32 %v3235_v54, 16 }
  0x1e   : > { %v720_v6 = vor.u32 %v719_v60, %v715_v59  ;;  %v802_v7 = vrot.slane %v800_v61, 4  ;;  %v805_v10 = vrot.slane %v803_v62, 5  ;;  %v813_v11 = vshrl.u32 %v3235_v54, 16 }
  0x1f   : > { %v710_v13 = vor.u32 %v709_v0, %v706_v63  ;;  %v811_v14 = vrot.slane %v809_v2, 5  ;;  %v819_v15 = vshll.u32 %v3240_v58, 16  ;;  %v391_v16 = vadd.f32 %v3184_v9, %v333_v38  ;;  %v252_v0 = vld [vmem:[%s3179_s27 + $0x78] sm:$0xff] }
  0x20   : > { %v721_v17 = vrot.slane %v720_v6, 4  ;;  %v806_v18 = vor.u32 %v805_v10, %v802_v7  ;;  %v815_v19 = vrot.slane %v813_v11, 4  ;;  %v443_v20 = vmax.f32 %v389_v42, 0.0  ;;  %v2967_v42 = vld [vmem:[%s4562_s1 + $0x8] sm:$0xf] }
  0x21   : > { %v711_v21 = vrot.slane %v710_v13, 4  ;;  %v821_v22 = vrot.slane %v819_v15, 5  ;;  %v444_v23 = vmax.f32 %v390_v46, 0.0  ;;  %v445_v24 = vmax.f32 %v391_v16, 0.0  ;;  %v254_v11 = vld [vmem:[%s3179_s27 + $0x88] sm:$0x3] }
  0x22   : > { %v726_v25 = vsel %vm3248_vm6, %v721_v17, %v725_v1  ;;  %v807_v27 = vrot.slane %v806_v18, 4  ;;  %v816_v28 = vor.u32 %v815_v19, %v811_v14  ;;  %v531_v29 = vsel %vm465_vm1, %v443_v20, 0.0  ;;  %v253_v1 = vld [vmem:[%s3179_s27 + $0x80] sm:$0xff]  ;;  %v264_v13 = vld [vmem:[%s3179_s27 + $0xd8] sm:$0xff]  ;;  %v266_v19 = vld [vmem:[%s3179_s27 + $0xe8] sm:$0x3] }
  0x23   : > { %v716_v30 = vsel %vm3248_vm6, %v711_v21, %v715_v59  ;;  %v1002_v31 = vunpack.c.l.b16 %v726_v25  ;;  %v533_v32 = vsel %vm476_vm2, %v445_v24, 0.0  ;;  %v3262_v33 = vpack.c.bf16 %v531_v29, %v531_v29  ;;  %v3001_v59 = vld [vmem:[%s4562_s1 + $0x10] sm:$0xf] }
  0x24   : > { %v1001_v34 = vunpack.c.l.b16 %v716_v30  ;;  %v812_v35 = vsel %vm3248_vm6, %v807_v27, %v811_v14  ;;  %v817_v36 = vrot.slane %v816_v28, 4  ;;  %v3266_v37 = vpack.c.bf16 %v444_v23, %v444_v23  ;;  %v265_v14 = vld [vmem:[%s3179_s27 + $0xe0] sm:$0xff] }
  0x25   : > { %4633 = vst [vmem:[#allocation4_spill] sm:$0xff] %v3262_v33  ;;  %v1009_v38 = vunpack.c.l.b16 %v812_v35  ;;  %v3268_v39 = vpack.c.bf16 %v533_v32, %v533_v32  ;;  %v896_v40 = vshrl.u32 %v3262_v33, 16  ;;  %v899_v41 = vshll.u32 %v3262_v33, 16 }
  0x26   : > { %4634 = vst [vmem:[#allocation5_spill] sm:$0xff] %v3266_v37  ;;  %v3275_v43 = vpack.c.b16 %v1002_v31, %v1001_v34  ;;  %v822_v44 = vsel %vm3248_vm6, %v817_v36, %v821_v22  ;;  %v905_v46 = vshll.u32 %v3266_v37, 16  ;;  %v909_v49 = vshrl.u32 %v3266_v37, 16  ;;  %v276_v31 = vld [vmem:[%s3179_s27 + $0x138] sm:$0xff] }
  0x27   : > { %4635 = vst [vmem:[#allocation6_spill] sm:$0xff] %v3268_v39  ;;  %v1010_v52 = vunpack.c.l.b16 %v822_v44  ;;  %v898_v55 = vrot.slane %v896_v40, 4  ;;  %v901_v56 = vrot.slane %v899_v41, 5  ;;  %v915_v57 = vshll.u32 %v3268_v39, 16  ;;  %v272_v39 = vld [vmem:[%s3179_s27 + $0x118] sm:$0x3] }
  0x28   : > { %2923 = vmatmul.msk.bf16.vlgmr.msra.gmra.mxu1 %vm1041_vm5, %v3275_v43  ;;  %v907_v60 = vrot.slane %v905_v46, 5  ;;  %v911_v61 = vrot.slane %v909_v49, 4  ;;  %v1633_v62 = vsel %vm1090_vm0, %v2967_v42, 0  ;;  %v620_v63 = vsel %vm3248_vm6, %v3204_v26, %v3174_v8 }
  0x29   : > { %v3300_v2 = vpack.c.b16 %v1010_v52, %v1009_v38  ;;  %v902_v6 = vor.u32 %v901_v56, %v898_v55  ;;  %v917_v7 = vrot.slane %v915_v57, 5  ;;  %1642 = vmatpush.bf16.msrb.mxu2 %v1633_v62  ;;  %v993_v10 = vunpack.c.l.b16 %v620_v63 }
  0x2a   : > { %v912_v15 = vor.u32 %v911_v61, %v907_v60  ;;  %v1767_v16 = vsel %vm1090_vm0, %v2984_v50, 0  ;;  %v1312_v17 = vsel %vm1090_vm0, %v603_v51, 0  ;;  %v1923_v18 = vsel %vm1090_vm0, %v3001_v59, 0 }
  0x2b   : > { %4636 = vst [vmem:[#allocation7_spill] sm:$0xff] %v3300_v2  ;;  %2927 = vmatmul.msk.bf16.vlgmr.msra.gmra.mxu2 %vm1041_vm5, %v3300_v2  ;;  %v903_v8 = vrot.slane %v902_v6, 4  ;;  %v3311_v26 = vpack.c.b16 %v993_v10, %v993_v10  ;;  %1776 = vmatpush.bf16.msrb.mxu3 %v1767_v16  ;;  %v310_v20 = vmul.f32 %v3169_v4, %v252_v0 }
  0x2c   : > { %v311_v21 = vmul.f32 %v3169_v4, %v253_v1  ;;  %v913_v22 = vrot.slane %v912_v15, 4  ;;  %1321 = vmatpush.bf16.msrb.mxu1 %v1312_v17  ;;  %1932 = vmatpush.bf16.msrb.mxu0 %v1923_v18  ;;  %v312_v23 = vmul.f32 %v3169_v4, %v254_v11  ;;  %v322_v24 = vmul.f32 %v3169_v4, %v264_v13 }
  0x2d   : > { %4637 = vst [vmem:[#allocation8_spill] sm:$0xff] %v3311_v26  ;;  %v323_v25 = vmul.f32 %v3169_v4, %v265_v14  ;;  %v908_v27 = vsel %vm3248_vm6, %v903_v8, %v907_v60  ;;  %2919 = vmatmul.msk.bf16.vlgmr.msra.gmra.mxu0 %vm1041_vm5, %v3311_v26  ;;  %v368_v28 = vadd.f32 %v3184_v9, %v310_v20  ;;  %v277_v20 = vld [vmem:[%s3179_s27 + $0x140] sm:$0xff] }
  0x2e   : > { %v369_v29 = vadd.f32 %v3184_v9, %v311_v21  ;;  %v324_v30 = vmul.f32 %v3169_v4, %v266_v19  ;;  %v918_v32 = vsel %vm3248_vm6, %v913_v22, %v917_v7  ;;  %v1017_v34 = vunpack.c.l.b16 %v908_v27 }
  0x2f   : > { %v370_v35 = vadd.f32 %v3184_v9, %v312_v23  ;;  %v380_v36 = vadd.f32 %v3184_v9, %v322_v24  ;;  %v1018_v38 = vunpack.c.l.b16 %v918_v32  ;;  %v422_v40 = vmax.f32 %v368_v28, 0.0 }
  0x30   : > { %v423_v41 = vmax.f32 %v369_v29, 0.0  ;;  %v381_v42 = vadd.f32 %v3184_v9, %v323_v25  ;;  %v382_v46 = vadd.f32 %v3184_v9, %v324_v30  ;;  %v334_v50 = vmul.f32 %v3169_v4, %v276_v31  ;;  %v278_v25 = vld [vmem:[%s3179_s27 + $0x148] sm:$0x3] }
  0x31   : > { %v424_v44 = vmax.f32 %v370_v35, 0.0  ;;  %v434_v49 = vmax.f32 %v380_v36, 0.0  ;;  %v3333_v51 = vpack.c.b16 %v1018_v38, %v1017_v34  ;;  %v510_v52 = vsel %vm465_vm1, %v422_v40, 0.0 }
  0x32   : > { %v3337_v55 = vpack.c.bf16 %v423_v41, %v423_v41  ;;  %v435_v56 = vmax.f32 %v381_v42, 0.0  ;;  %v3341_v59 = vpack.c.bf16 %v510_v52, %v510_v52  ;;  %v436_v60 = vmax.f32 %v382_v46, 0.0  ;;  %v240_v52 = vld [vmem:[%s3179_s27 + $0x18] sm:$0xff] }
  0x33   : > { %4638 = vst [vmem:[#allocation9_spill] sm:$0xff] %v3333_v51  ;;  %v512_v57 = vsel %vm476_vm2, %v424_v44, 0.0  ;;  %v522_v61 = vsel %vm465_vm1, %v434_v49, 0.0  ;;  %2931 = vmatmul.msk.bf16.vlgmr.msra.gmra.mxu3 %vm1041_vm5, %v3333_v51  ;;  %v335_v35 = vmul.f32 %v3169_v4, %v277_v20  ;;  %v336_v41 = vmul.f32 %v3169_v4, %v278_v25 }
  0x34   : > { %v3347_v62 = vpack.c.bf16 %v512_v57, %v512_v57  ;;  %v737_v63 = vshll.u32 %v3337_v55, 16  ;;  %v741_v0 = vshrl.u32 %v3337_v55, 16  ;;  %v3351_v1 = vpack.c.bf16 %v522_v61, %v522_v61 }
  0x35   : > { %v728_v6 = vshrl.u32 %v3341_v59, 16  ;;  %v731_v7 = vshll.u32 %v3341_v59, 16  ;;  %v524_v10 = vsel %vm476_vm2, %v436_v60, 0.0  ;;  %v3357_v11 = vpack.c.bf16 %v435_v56, %v435_v56  ;;  %v241_v56 = vld [vmem:[%s3179_s27 + $0x20] sm:$0xff] }
  0x36   : > { %v739_v13 = vrot.slane %v737_v63, 5  ;;  %v743_v14 = vrot.slane %v741_v0, 4  ;;  %v747_v15 = vshll.u32 %v3347_v62, 16  ;;  %v3360_v16 = vpack.c.bf16 %v524_v10, %v524_v10 }
  0x37   : > { %v730_v17 = vrot.slane %v728_v6, 4  ;;  %v733_v18 = vrot.slane %v731_v7, 5  ;;  %v824_v19 = vshrl.u32 %v3351_v1, 16  ;;  %v827_v8 = vshll.u32 %v3351_v1, 16 }
  0x38   : > { %v744_v21 = vor.u32 %v743_v14, %v739_v13  ;;  %v749_v22 = vrot.slane %v747_v15, 5  ;;  %v833_v23 = vshll.u32 %v3357_v11, 16  ;;  %v837_v24 = vshrl.u32 %v3357_v11, 16 }
  0x39   : > { %v734_v27 = vor.u32 %v733_v18, %v730_v17  ;;  %v826_v28 = vrot.slane %v824_v19, 4  ;;  %v829_v29 = vrot.slane %v827_v8, 5  ;;  %v843_v30 = vshll.u32 %v3360_v16, 16 }
  0x3a   : > { %v745_v31 = vrot.slane %v744_v21, 4  ;;  %v835_v32 = vrot.slane %v833_v23, 5  ;;  %v839_v34 = vrot.slane %v837_v24, 4  ;;  %v392_v46 = vadd.f32 %v3184_v9, %v334_v50  ;;  %v242_v50 = vld [vmem:[%s3179_s27 + $0x28] sm:$0x3] }
  0x3b   : > { %v735_v36 = vrot.slane %v734_v27, 4  ;;  %v830_v38 = vor.u32 %v829_v29, %v826_v28  ;;  %v845_v40 = vrot.slane %v843_v30, 5  ;;  %v393_v49 = vadd.f32 %v3184_v9, %v335_v35 }
  0x3c   : > { %v750_v42 = vsel %vm3248_vm6, %v745_v31, %v749_v22  ;;  %v840_v44 = vor.u32 %v839_v34, %v835_v32  ;;  %v394_v63 = vadd.f32 %v3184_v9, %v336_v41  ;;  %v446_v7 = vmax.f32 %v392_v46, 0.0  ;;  %v255_v41 = vld [vmem:[%s3179_s27 + $0x90] sm:$0xff] }
  0x3d   : > { %v740_v57 = vsel %vm3248_vm6, %v735_v36, %v739_v13  ;;  %v1004_v60 = vunpack.c.l.b16 %v750_v42  ;;  %v831_v61 = vrot.slane %v830_v38, 4  ;;  %v447_v10 = vmax.f32 %v393_v49, 0.0  ;;  %v256_v42 = vld [vmem:[%s3179_s27 + $0x98] sm:$0xff] }
  0x3e   : > { %v1003_v0 = vunpack.c.l.b16 %v740_v57  ;;  %v841_v6 = vrot.slane %v840_v44, 4  ;;  %v448_v15 = vmax.f32 %v394_v63, 0.0  ;;  %v298_v17 = vmul.f32 %v3169_v4, %v240_v52 }
  0x3f   : > { %v836_v14 = vsel %vm3248_vm6, %v831_v61, %v835_v32  ;;  %v299_v18 = vmul.f32 %v3169_v4, %v241_v56  ;;  %v534_v20 = vsel %vm465_vm1, %v446_v7, 0.0  ;;  %v3395_v24 = vpack.c.bf16 %v447_v10, %v447_v10  ;;  %v257_v56 = vld [vmem:[%s3179_s27 + $0xa0] sm:$0x3] }
  0x40   : > { %v3385_v19 = vpack.c.b16 %v1004_v60, %v1003_v0  ;;  %v846_v13 = vsel %vm3248_vm6, %v841_v6, %v845_v40  ;;  %v1011_v8 = vunpack.c.l.b16 %v836_v14  ;;  %v536_v22 = vsel %vm476_vm2, %v448_v15, 0.0 }
  0x41   : > { %v1012_v21 = vunpack.c.l.b16 %v846_v13  ;;  %v3393_v23 = vpack.c.bf16 %v534_v20, %v534_v20  ;;  %4640 = vst [vmem:[#allocation11_spill] sm:$0xff] %v3395_v24  ;;  %v3399_v25 = vpack.c.bf16 %v536_v22, %v536_v22  ;;  %v300_v27 = vmul.f32 %v3169_v4, %v242_v50 }
  0x42   : > { %2924 = vmatmul.msk.bf16.gmra.mxu1 %vm1041_vm5, %v3385_v19  ;;  %v356_v28 = vadd.f32 %v3184_v9, %v298_v17  ;;  %v357_v29 = vadd.f32 %v3184_v9, %v299_v18  ;;  %v929_v34 = vshll.u32 %v3395_v24, 16  ;;  %v933_v35 = vshrl.u32 %v3395_v24, 16 }
  0x43   : > { %4639 = vst [vmem:[#allocation10_spill] sm:$0xff] %v3393_v23  ;;  %v3404_v30 = vpack.c.b16 %v1012_v21, %v1011_v8  ;;  %v920_v31 = vshrl.u32 %v3393_v23, 16  ;;  %v923_v32 = vshll.u32 %v3393_v23, 16  ;;  %v939_v36 = vshll.u32 %v3399_v25, 16 }
  0x44   : > { %4641 = vst [vmem:[#allocation12_spill] sm:$0xff] %v3399_v25  ;;  %v358_v38 = vadd.f32 %v3184_v9, %v300_v27  ;;  %v410_v40 = vmax.f32 %v356_v28, 0.0  ;;  %v931_v49 = vrot.slane %v929_v34, 5  ;;  %v411_v52 = vmax.f32 %v357_v29, 0.0  ;;  %v245_v25 = vld [vmem:[%s3179_s27 + $0x40] sm:$0x3] }
  0x45   : > { %4642 = vst [vmem:[#allocation13_spill] sm:$0xff] %v3404_v30  ;;  %2928 = vmatmul.msk.bf16.gmra.mxu2 %vm1041_vm5, %v3404_v30  ;;  %v922_v44 = vrot.slane %v920_v31, 4  ;;  %v925_v46 = vrot.slane %v923_v32, 5  ;;  %v935_v57 = vrot.slane %v933_v35, 4  ;;  %v941_v60 = vrot.slane %v939_v36, 5  ;;  %v267_v35 = vld [vmem:[%s3179_s27 + $0xf0] sm:$0xff] }
  0x46   : > { %v412_v61 = vmax.f32 %v358_v38, 0.0  ;;  %v498_v63 = vsel %vm465_vm1, %v410_v40, 0.0  ;;  %v3421_v7 = vpack.c.bf16 %v411_v52, %v411_v52  ;;  %v313_v10 = vmul.f32 %v3169_v4, %v255_v41 }
  0x47   : > { %v926_v0 = vor.u32 %v925_v46, %v922_v44  ;;  %v3419_v6 = vpack.c.bf16 %v498_v63, %v498_v63  ;;  %v936_v14 = vor.u32 %v935_v57, %v931_v49  ;;  %v314_v50 = vmul.f32 %v3169_v4, %v256_v42  ;;  %v268_v42 = vld [vmem:[%s3179_s27 + $0xf8] sm:$0xff]  ;;  %v269_v57 = vld [vmem:[%s3179_s27 + $0x100] sm:$0x3] }
  0x48   : > { %v500_v15 = vsel %vm476_vm2, %v412_v61, 0.0  ;;  %v315_v17 = vmul.f32 %v3169_v4, %v257_v56  ;;  %v641_v22 = vshll.u32 %v3421_v7, 16  ;;  %v645_v27 = vshrl.u32 %v3421_v7, 16 }
  0x49   : > { %v927_v18 = vrot.slane %v926_v0, 4  ;;  %v3428_v13 = vpack.c.bf16 %v500_v15, %v500_v15  ;;  %v632_v8 = vshrl.u32 %v3419_v6, 16  ;;  %v635_v20 = vshll.u32 %v3419_v6, 16 }
  0x4a   : > { %v937_v21 = vrot.slane %v936_v14, 4  ;;  %v371_v28 = vadd.f32 %v3184_v9, %v313_v10  ;;  %v643_v40 = vrot.slane %v641_v22, 5  ;;  %v647_v41 = vrot.slane %v645_v27, 4 }
  0x4b   : > { %v932_v29 = vsel %vm3248_vm6, %v927_v18, %v931_v49  ;;  %v634_v31 = vrot.slane %v632_v8, 4  ;;  %v637_v32 = vrot.slane %v635_v20, 5  ;;  %v651_v34 = vshll.u32 %v3428_v13, 16 }
  0x4c   : > { %v942_v36 = vsel %vm3248_vm6, %v937_v21, %v941_v60  ;;  %v1019_v38 = vunpack.c.l.b16 %v932_v29  ;;  %v372_v56 = vadd.f32 %v3184_v9, %v314_v50  ;;  %v648_v61 = vor.u32 %v647_v41, %v643_v40 }
  0x4d   : > { %v1020_v44 = vunpack.c.l.b16 %v942_v36  ;;  %v638_v46 = vor.u32 %v637_v32, %v634_v31  ;;  %v653_v52 = vrot.slane %v651_v34, 5  ;;  %v373_v49 = vadd.f32 %v3184_v9, %v315_v17 }
  0x4e   : > { %v425_v63 = vmax.f32 %v371_v28, 0.0  ;;  %v325_v0 = vmul.f32 %v3169_v4, %v267_v35  ;;  %v426_v60 = vmax.f32 %v372_v56, 0.0  ;;  %v326_v15 = vmul.f32 %v3169_v4, %v268_v42 }
  0x4f   : > { %v3446_v10 = vpack.c.b16 %v1020_v44, %v1019_v38  ;;  %v639_v14 = vrot.slane %v638_v46, 4  ;;  %v649_v18 = vrot.slane %v648_v61, 4  ;;  %v427_v8 = vmax.f32 %v373_v49, 0.0  ;;  %v279_v46 = vld [vmem:[%s3179_s27 + $0x150] sm:$0xff]  ;;  %v280_v49 = vld [vmem:[%s3179_s27 + $0x158] sm:$0xff] }
  0x50   : > { %v513_v20 = vsel %vm465_vm1, %v425_v63, 0.0  ;;  %v327_v50 = vmul.f32 %v3169_v4, %v269_v57  ;;  %v3458_v22 = vpack.c.bf16 %v426_v60, %v426_v60  ;;  %v383_v27 = vadd.f32 %v3184_v9, %v325_v0 }
  0x51   : > { %4643 = vst [vmem:[#allocation14_spill] sm:$0xff] %v3446_v10  ;;  %2932 = vmatmul.msk.bf16.gmra.mxu3 %vm1041_vm5, %v3446_v10  ;;  %v644_v17 = vsel %vm3248_vm6, %v639_v14, %v643_v40  ;;  %v3456_v21 = vpack.c.bf16 %v513_v20, %v513_v20  ;;  %v654_v28 = vsel %vm3248_vm6, %v649_v18, %v653_v52  ;;  %v515_v31 = vsel %vm476_vm2, %v427_v8, 0.0 }
  0x52   : > { %v995_v29 = vunpack.c.l.b16 %v644_v17  ;;  %v384_v32 = vadd.f32 %v3184_v9, %v326_v15  ;;  %v996_v34 = vunpack.c.l.b16 %v654_v28  ;;  %v3466_v35 = vpack.c.bf16 %v515_v31, %v515_v31  ;;  %v281_v15 = vld [vmem:[%s3179_s27 + $0x160] sm:$0x3] }
  0x53   : > { %v752_v36 = vshrl.u32 %v3456_v21, 16  ;;  %v755_v38 = vshll.u32 %v3456_v21, 16  ;;  %v761_v40 = vshll.u32 %v3458_v22, 16  ;;  %v765_v41 = vshrl.u32 %v3458_v22, 16 }
  0x54   : > { %v385_v42 = vadd.f32 %v3184_v9, %v327_v50  ;;  %v437_v44 = vmax.f32 %v383_v27, 0.0  ;;  %v3474_v52 = vpack.c.b16 %v996_v34, %v995_v29  ;;  %v771_v61 = vshll.u32 %v3466_v35, 16 }
  0x55   : > { %v754_v56 = vrot.slane %v752_v36, 4  ;;  %v757_v57 = vrot.slane %v755_v38, 5  ;;  %v763_v63 = vrot.slane %v761_v40, 5  ;;  %v767_v0 = vrot.slane %v765_v41, 4 }
  0x56   : > { %v438_v14 = vmax.f32 %v384_v32, 0.0  ;;  %v439_v60 = vmax.f32 %v385_v42, 0.0  ;;  %2920 = vmatmul.msk.bf16.gmra.mxu0 %vm1041_vm5, %v3474_v52  ;;  %v773_v8 = vrot.slane %v771_v61, 5  ;;  %v525_v20 = vsel %vm465_vm1, %v437_v44, 0.0 }
  0x57   : > { %v758_v18 = vor.u32 %v757_v57, %v754_v56  ;;  %v337_v50 = vmul.f32 %v3169_v4, %v279_v46  ;;  %v768_v17 = vor.u32 %v767_v0, %v763_v63  ;;  %v3486_v28 = vpack.c.bf16 %v525_v20, %v525_v20 }
  0x58   : > { %v527_v27 = vsel %vm476_vm2, %v439_v60, 0.0  ;;  %v3488_v29 = vpack.c.bf16 %v438_v14, %v438_v14  ;;  %v338_v34 = vmul.f32 %v3169_v4, %v280_v49  ;;  %v339_v36 = vmul.f32 %v3169_v4, %v281_v15  ;;  %v243_v60 = vld [vmem:[%s3179_s27 + $0x30] sm:$0xff]  ;;  %v244_v15 = vld [vmem:[%s3179_s27 + $0x38] sm:$0xff] }
  0x59   : > { %v759_v31 = vrot.slane %v758_v18, 4  ;;  %v3490_v32 = vpack.c.bf16 %v527_v27, %v527_v27  ;;  %v769_v38 = vrot.slane %v768_v17, 4  ;;  %v848_v40 = vshrl.u32 %v3486_v28, 16 }
  0x5a   : > { %v851_v41 = vshll.u32 %v3486_v28, 16  ;;  %v857_v42 = vshll.u32 %v3488_v29, 16  ;;  %v861_v46 = vshrl.u32 %v3488_v29, 16  ;;  %v395_v57 = vadd.f32 %v3184_v9, %v337_v50 }
  0x5b   : > { %4644 = vst [vmem:[#allocation15_spill] sm:$0xff] %v3490_v32  ;;  %v764_v44 = vsel %vm3248_vm6, %v759_v31, %v763_v63  ;;  %v867_v56 = vshll.u32 %v3490_v32, 16  ;;  %v774_v61 = vsel %vm3248_vm6, %v769_v38, %v773_v8  ;;  %v850_v0 = vrot.slane %v848_v40, 4  ;;  %v247_v32 = vld [vmem:[%s3179_s27 + $0x50] sm:$0xff] }
  0x5c   : > { %v1005_v49 = vunpack.c.l.b16 %v764_v44  ;;  %v853_v14 = vrot.slane %v851_v41, 5  ;;  %v1006_v18 = vunpack.c.l.b16 %v774_v61  ;;  %v859_v20 = vrot.slane %v857_v42, 5 }
  0x5d   : > { %v863_v17 = vrot.slane %v861_v46, 4  ;;  %v869_v27 = vrot.slane %v867_v56, 5  ;;  %v396_v31 = vadd.f32 %v3184_v9, %v338_v34  ;;  %v397_v26 = vadd.f32 %v3184_v9, %v339_v36 }
  0x5e   : > { %v854_v63 = vor.u32 %v853_v14, %v850_v0  ;;  %v449_v10 = vmax.f32 %v395_v57, 0.0  ;;  %v3509_v50 = vpack.c.b16 %v1006_v18, %v1005_v49  ;;  %v301_v8 = vmul.f32 %v3169_v4, %v243_v60 }
  0x5f   : > { %v864_v23 = vor.u32 %v863_v17, %v859_v20  ;;  %v302_v38 = vmul.f32 %v3169_v4, %v244_v15  ;;  %v450_v41 = vmax.f32 %v396_v31, 0.0  ;;  %v451_v44 = vmax.f32 %v397_v26, 0.0  ;;  %v258_v31 = vld [vmem:[%s3179_s27 + $0xa8] sm:$0xff] }
  0x60   : > { %4645 = vst [vmem:[#allocation16_spill] sm:$0xff] %v3509_v50  ;;  %v855_v40 = vrot.slane %v854_v63, 4  ;;  %v537_v42 = vsel %vm465_vm1, %v449_v10, 0.0  ;;  %2925 = vmatmul.msk.bf16.gmra.mxu1 %vm1041_vm5, %v3509_v50  ;;  %v303_v46 = vmul.f32 %v3169_v4, %v245_v25  ;;  %v359_v56 = vadd.f32 %v3184_v9, %v301_v8 }
  0x61   : > { %v865_v34 = vrot.slane %v864_v23, 4  ;;  %v3517_v36 = vpack.c.bf16 %v537_v42, %v537_v42  ;;  %v539_v26 = vsel %vm476_vm2, %v451_v44, 0.0  ;;  %v3525_v61 = vpack.c.bf16 %v450_v41, %v450_v41  ;;  %v259_v44 = vld [vmem:[%s3179_s27 + $0xb0] sm:$0xff]  ;;  %v260_v42 = vld [vmem:[%s3179_s27 + $0xb8] sm:$0x3] }
  0x62   : > { %v860_v57 = vsel %vm3248_vm6, %v855_v40, %v859_v20  ;;  %v360_v10 = vadd.f32 %v3184_v9, %v302_v38  ;;  %v3530_v0 = vpack.c.bf16 %v539_v26, %v539_v26  ;;  %v361_v63 = vadd.f32 %v3184_v9, %v303_v46 }
  0x63   : > { %4646 = vst [vmem:[#allocation17_spill] sm:$0xff] %v3517_v36  ;;  %v870_v23 = vsel %vm3248_vm6, %v865_v34, %v869_v27  ;;  %v1013_v49 = vunpack.c.l.b16 %v860_v57  ;;  %v944_v25 = vshrl.u32 %v3517_v36, 16  ;;  %v947_v60 = vshll.u32 %v3517_v36, 16  ;;  %v271_v36 = vld [vmem:[%s3179_s27 + $0x110] sm:$0xff] }
  0x64   : > { %4647 = vst [vmem:[#allocation18_spill] sm:$0xff] %v3525_v61  ;;  %v1014_v14 = vunpack.c.l.b16 %v870_v23  ;;  %v953_v15 = vshll.u32 %v3525_v61, 16  ;;  %v957_v18 = vshrl.u32 %v3525_v61, 16  ;;  %v963_v17 = vshll.u32 %v3530_v0, 16 }
  0x65   : > { %4648 = vst [vmem:[#allocation19_spill] sm:$0xff] %v3530_v0  ;;  %v946_v20 = vrot.slane %v944_v25, 4  ;;  %v413_v27 = vmax.f32 %v359_v56, 0.0  ;;  %v949_v38 = vrot.slane %v947_v60, 5  ;;  %v414_v57 = vmax.f32 %v360_v10, 0.0 }
  0x66   : > { %v3539_v8 = vpack.c.b16 %v1014_v14, %v1013_v49  ;;  %v955_v40 = vrot.slane %v953_v15, 5  ;;  %v959_v41 = vrot.slane %v957_v18, 4  ;;  %v965_v34 = vrot.slane %v963_v17, 5 }
  0x67   : > { %v415_v26 = vmax.f32 %v361_v63, 0.0  ;;  %v501_v23 = vsel %vm465_vm1, %v413_v27, 0.0  ;;  %v950_v25 = vor.u32 %v949_v38, %v946_v20  ;;  %v316_v49 = vmul.f32 %v3169_v4, %v258_v31 }
  0x68   : > { %4649 = vst [vmem:[#allocation20_spill] sm:$0xff] %v3539_v8  ;;  %2929 = vmatmul.msk.bf16.gmra.mxu2 %vm1041_vm5, %v3539_v8  ;;  %v960_v46 = vor.u32 %v959_v41, %v955_v40  ;;  %v3547_v56 = vpack.c.bf16 %v501_v23, %v501_v23  ;;  %v3552_v60 = vpack.c.bf16 %v414_v57, %v414_v57  ;;  %v270_v23 = vld [vmem:[%s3179_s27 + $0x108] sm:$0xff] }
  0x69   : > { %v503_v14 = vsel %vm476_vm2, %v415_v26, 0.0  ;;  %v317_v10 = vmul.f32 %v3169_v4, %v259_v44  ;;  %v318_v15 = vmul.f32 %v3169_v4, %v260_v42  ;;  %v951_v18 = vrot.slane %v950_v25, 4 }
  0x6a   : > { %v961_v17 = vrot.slane %v960_v46, 4  ;;  %v3556_v63 = vpack.c.bf16 %v503_v14, %v503_v14  ;;  %v656_v20 = vshrl.u32 %v3547_v56, 16  ;;  %v659_v27 = vshll.u32 %v3547_v56, 16 }
  0x6b   : > { %v665_v31 = vshll.u32 %v3552_v60, 16  ;;  %v669_v38 = vshrl.u32 %v3552_v60, 16  ;;  %v374_v41 = vadd.f32 %v3184_v9, %v316_v49  ;;  %v956_v44 = vsel %vm3248_vm6, %v951_v18, %v955_v40 }
  0x6c   : > { %v966_v42 = vsel %vm3248_vm6, %v961_v17, %v965_v34  ;;  %v658_v57 = vrot.slane %v656_v20, 4  ;;  %v675_v26 = vshll.u32 %v3556_v63, 16  ;;  %v1021_v25 = vunpack.c.l.b16 %v956_v44 }
  0x6d   : > { %v1022_v46 = vunpack.c.l.b16 %v966_v42  ;;  %v661_v14 = vrot.slane %v659_v27, 5  ;;  %v667_v0 = vrot.slane %v665_v31, 5  ;;  %v671_v61 = vrot.slane %v669_v38, 4 }
  0x6e   : > { %v677_v51 = vrot.slane %v675_v26, 5  ;;  %v375_v24 = vadd.f32 %v3184_v9, %v317_v10  ;;  %v376_v49 = vadd.f32 %v3184_v9, %v318_v15  ;;  %v428_v34 = vmax.f32 %v374_v41, 0.0 }
  0x6f   : > { %v3573_v40 = vpack.c.b16 %v1022_v46, %v1021_v25  ;;  %v662_v18 = vor.u32 %v661_v14, %v658_v57  ;;  %v328_v17 = vmul.f32 %v3169_v4, %v270_v23  ;;  %v672_v20 = vor.u32 %v671_v61, %v667_v0 }
  0x70   : > { %v429_v33 = vmax.f32 %v375_v24, 0.0  ;;  %v430_v44 = vmax.f32 %v376_v49, 0.0  ;;  %v329_v27 = vmul.f32 %v3169_v4, %v271_v36  ;;  %v516_v10 = vsel %vm465_vm1, %v428_v34, 0.0 }
  0x71   : > { %4650 = vst [vmem:[#allocation21_spill] sm:$0xff] %v3573_v40  ;;  %2933 = vmatmul.msk.bf16.gmra.mxu3 %vm1041_vm5, %v3573_v40  ;;  %v663_v31 = vrot.slane %v662_v18, 4  ;;  %v330_v15 = vmul.f32 %v3169_v4, %v272_v39  ;;  %v386_v38 = vadd.f32 %v3184_v9, %v328_v17  ;;  %v673_v42 = vrot.slane %v672_v20, 4 }
  0x72   : > { %v518_v41 = vsel %vm476_vm2, %v430_v44, 0.0  ;;  %v3585_v61 = vpack.c.bf16 %v516_v10, %v516_v10  ;;  %v3587_v24 = vpack.c.bf16 %v429_v33, %v429_v33  ;;  %v387_v26 = vadd.f32 %v3184_v9, %v329_v27  ;;  %v282_v27 = vld [vmem:[%s3179_s27 + $0x168] sm:$0xff] }
  0x73   : > { %v668_v36 = vsel %vm3248_vm6, %v663_v31, %v667_v0  ;;  %v3591_v57 = vpack.c.bf16 %v518_v41, %v518_v41  ;;  %v388_v39 = vadd.f32 %v3184_v9, %v330_v15  ;;  %v678_v23 = vsel %vm3248_vm6, %v673_v42, %v677_v51  ;;  %v283_v31 = vld [vmem:[%s3179_s27 + $0x170] sm:$0xff] }
  0x74   : > { %v997_v25 = vunpack.c.l.b16 %v668_v36  ;;  %v776_v46 = vshrl.u32 %v3585_v61, 16  ;;  %v779_v33 = vshll.u32 %v3585_v61, 16  ;;  %v998_v14 = vunpack.c.l.b16 %v678_v23 }
  0x75   : > { %v785_v49 = vshll.u32 %v3587_v24, 16  ;;  %v789_v0 = vshrl.u32 %v3587_v24, 16  ;;  %v795_v18 = vshll.u32 %v3591_v57, 16  ;;  %v440_v20 = vmax.f32 %v386_v38, 0.0 }
  0x76   : > { %v778_v34 = vrot.slane %v776_v46, 4  ;;  %v781_v17 = vrot.slane %v779_v33, 5  ;;  %v441_v44 = vmax.f32 %v387_v26, 0.0  ;;  %v3604_v51 = vpack.c.b16 %v998_v14, %v997_v25  ;;  %v284_v26 = vld [vmem:[%s3179_s27 + $0x178] sm:$0x3] }
  0x77   : > { %v787_v10 = vrot.slane %v785_v49, 5  ;;  %v791_v15 = vrot.slane %v789_v0, 4  ;;  %v797_v42 = vrot.slane %v795_v18, 5  ;;  %v442_v36 = vmax.f32 %v388_v39, 0.0 }
  0x78   : > { %v782_v41 = vor.u32 %v781_v17, %v778_v34  ;;  %v528_v23 = vsel %vm465_vm1, %v440_v20, 0.0  ;;  %v3608_v40 = vpack.c.bf16 %v441_v44, %v441_v44  ;;  %2921 = vmatmul.msk.bf16.gmra.mxu0 %vm1041_vm5, %v3604_v51  ;;  %v340_v25 = vmul.f32 %v3169_v4, %v282_v27 }
  0x79   : > { %v792_v46 = vor.u32 %v791_v15, %v787_v10  ;;  %v3612_v38 = vpack.c.bf16 %v528_v23, %v528_v23  ;;  %v341_v33 = vmul.f32 %v3169_v4, %v283_v31  ;;  %v530_v39 = vsel %vm476_vm2, %v442_v36, 0.0 }
  0x7a   : > { %4651 = vst [vmem:[#allocation22_spill] sm:$0xff] %v3608_v40  ;;  %v783_v14 = vrot.slane %v782_v41, 4  ;;  %v881_v49 = vshll.u32 %v3608_v40, 16  ;;  %v885_v0 = vshrl.u32 %v3608_v40, 16  ;;  %v3621_v34 = vpack.c.bf16 %v530_v39, %v530_v39  ;;  %v246_v41 = vld [vmem:[%s3179_s27 + $0x48] sm:$0xff] }
  0x7b   : > { %4652 = vst [vmem:[#allocation23_spill] sm:$0xff] %v3612_v38  ;;  %v793_v18 = vrot.slane %v792_v46, 4  ;;  %v872_v17 = vshrl.u32 %v3612_v38, 16  ;;  %v875_v20 = vshll.u32 %v3612_v38, 16  ;;  %v342_v15 = vmul.f32 %v3169_v4, %v284_v26  ;;  %v248_v4 = vld [vmem:[%s3179_s27 + $0x58] sm:$0x3] }
  0x7c   : > { %v788_v44 = vsel %vm3248_vm6, %v783_v14, %v787_v10  ;;  %v883_v27 = vrot.slane %v881_v49, 5  ;;  %v887_v31 = vrot.slane %v885_v0, 4  ;;  %v891_v40 = vshll.u32 %v3621_v34, 16 }
  0x7d   : > { %v798_v36 = vsel %vm3248_vm6, %v793_v18, %v797_v42  ;;  %v1007_v23 = vunpack.c.l.b16 %v788_v44  ;;  %v874_v46 = vrot.slane %v872_v17, 4  ;;  %v877_v39 = vrot.slane %v875_v20, 5  ;;  %v3640_v42 = vld [vmem:[%s4563_s2] ss:$0 sm:$0xff] }
  0x7e   : > { %v1008_v37 = vunpack.c.l.b16 %v798_v36  ;;  %v888_v8 = vor.u32 %v887_v31, %v883_v27  ;;  %v398_v38 = vadd.f32 %v3184_v9, %v340_v25  ;;  %v399_v14 = vadd.f32 %v3184_v9, %v341_v33 }
  0x7f   : > { %v878_v10 = vor.u32 %v877_v39, %v874_v46  ;;  %v400_v49 = vadd.f32 %v3184_v9, %v342_v15  ;;  %v304_v26 = vmul.f32 %v3640_v42, %v246_v41  ;;  %v893_v17 = vrot.slane %v891_v40, 5 }
  0x80   : > { %v3643_v0 = vpack.c.b16 %v1008_v37, %v1007_v23  ;;  %v889_v18 = vrot.slane %v888_v8, 4  ;;  %v452_v20 = vmax.f32 %v398_v38, 0.0  ;;  %v453_v44 = vmax.f32 %v399_v14, 0.0  ;;  %v3656_v8 = vld [vmem:[%s4564_s3] ss:$0 sm:$0xff] }
  0x81   : > { %v879_v25 = vrot.slane %v878_v10, 4  ;;  %v454_v31 = vmax.f32 %v400_v49, 0.0  ;;  %v305_v33 = vmul.f32 %v3640_v42, %v247_v32  ;;  %v306_v37 = vmul.f32 %v3640_v42, %v248_v4  ;;  %4654 = vst [vmem:[#allocation25_spill] sm:$0xff] %v3656_v8 }
  0x82   : > { %4653 = vst [vmem:[#allocation24_spill] sm:$0xff] %v3643_v0  ;;  %2926 = vmatmul.msk.bf16.gmra.mxu1 %vm1041_vm5, %v3643_v0  ;;  %v894_v9 = vsel %vm3248_vm6, %v889_v18, %v893_v17  ;;  %v540_v15 = vsel %vm465_vm1, %v452_v20, 0.0  ;;  %v362_v40 = vadd.f32 %v3656_v8, %v304_v26  ;;  %v3665_v46 = vpack.c.bf16 %v453_v44, %v453_v44 }
  0x83   : > { %v884_v32 = vsel %vm3248_vm6, %v879_v25, %v883_v27  ;;  %v1016_v38 = vunpack.c.l.b16 %v894_v9  ;;  %v542_v41 = vsel %vm476_vm2, %v454_v31, 0.0  ;;  %v3663_v36 = vpack.c.bf16 %v540_v15, %v540_v15 }
  0x84   : > { %v1015_v23 = vunpack.c.l.b16 %v884_v32  ;;  %4656 = vst [vmem:[#allocation27_spill] sm:$0xff] %v3665_v46  ;;  %v3667_v39 = vpack.c.bf16 %v542_v41, %v542_v41  ;;  %v363_v10 = vadd.f32 %v3656_v8, %v305_v33  ;;  %v364_v4 = vadd.f32 %v3656_v8, %v306_v37 }
  0x85   : > { %4655 = vst [vmem:[#allocation26_spill] sm:$0xff] %v3663_v36  ;;  %v968_v14 = vshrl.u32 %v3663_v36, 16  ;;  %v971_v49 = vshll.u32 %v3663_v36, 16  ;;  %v416_v27 = vmax.f32 %v362_v40, 0.0  ;;  %v977_v18 = vshll.u32 %v3665_v46, 16 }
  0x86   : > { %4657 = vst [vmem:[#allocation28_spill] sm:$0xff] %v3667_v39  ;;  %v3673_v26 = vpack.c.b16 %v1016_v38, %v1015_v23  ;;  %v981_v17 = vshrl.u32 %v3665_v46, 16  ;;  %v987_v20 = vshll.u32 %v3667_v39, 16  ;;  %v417_v31 = vmax.f32 %v363_v10, 0.0 }
  0x87   : > { %v970_v25 = vrot.slane %v968_v14, 4  ;;  %v973_v44 = vrot.slane %v971_v49, 5  ;;  %v418_v9 = vmax.f32 %v364_v4, 0.0  ;;  %v979_v33 = vrot.slane %v977_v18, 5 }
  0x88   : > { %2930 = vmatmul.msk.bf16.gmra.mxu2 %vm1041_vm5, %v3673_v26  ;;  %v983_v15 = vrot.slane %v981_v17, 4  ;;  %v504_v37 = vsel %vm465_vm1, %v416_v27, 0.0  ;;  %v3686_v41 = vpack.c.bf16 %v417_v31, %v417_v31  ;;  %v989_v14 = vrot.slane %v987_v20, 5 }
  0x89   : > { %v974_v40 = vor.u32 %v973_v44, %v970_v25  ;;  %v506_v32 = vsel %vm476_vm2, %v418_v9, 0.0  ;;  %v3684_v38 = vpack.c.bf16 %v504_v37, %v504_v37  ;;  %v3118_v9 = vmov 0.0|0.0  }
  0x8a   : > { %v984_v23 = vor.u32 %v983_v15, %v979_v33  ;;  %v3688_v10 = vpack.c.bf16 %v506_v32, %v506_v32  ;;  %v689_v17 = vshll.u32 %v3686_v41, 16  ;;  %v693_v25 = vshrl.u32 %v3686_v41, 16 }
  0x8b   : > { %v975_v49 = vrot.slane %v974_v40, 4  ;;  %v680_v4 = vshrl.u32 %v3684_v38, 16  ;;  %v683_v18 = vshll.u32 %v3684_v38, 16  ;;  %v1215_v37 = vunpack.c.l.b16 %v3118_v9 }
  0x8c   : > { %v985_v27 = vrot.slane %v984_v23, 4  ;;  %v699_v44 = vshll.u32 %v3688_v10, 16  ;;  %v691_v32 = vrot.slane %v689_v17, 5  ;;  %v695_v39 = vrot.slane %v693_v25, 4  ;;  %v3036_v23 = vld [vmem:[%s4562_s1 + $0x18] sm:$0xf] }
  0x8d   : > { %v980_v31 = vsel %vm3248_vm6, %v975_v49, %v979_v33  ;;  %v682_v20 = vrot.slane %v680_v4, 4  ;;  %v685_v15 = vrot.slane %v683_v18, 5  ;;  %v3702_v46 = vpack.c.b16 %v1215_v37, %v1215_v37  ;;  %v3053_v33 = vld [vmem:[%s4562_s1 + $0x1c] sm:$0xf] }
  0x8e   : > { %v990_v40 = vsel %vm3248_vm6, %v985_v27, %v989_v14  ;;  %v1023_v5 = vunpack.c.l.b16 %v980_v31  ;;  %v2951_v8 = vrot.slane %v3118_v9, 9  ;;  %v696_v49 = vor.u32 %v695_v39, %v691_v32  ;;  %v3019_v14 = vld [vmem:[%s4562_s1 + $0x14] sm:$0xf]  ;;  %v3071_v39 = vld [vmem:[%s4562_s1 + $0x20] sm:$0xf] }
  0x8f   : > { %v1024_v36 = vunpack.c.l.b16 %v990_v40  ;;  %v686_v3 = vor.u32 %v685_v15, %v682_v20  ;;  %4658 = vst [vmem:[#allocation29_spill] sm:$0xff] %v3702_v46  ;;  %v701_v4 = vrot.slane %v699_v44, 5  ;;  %v1424_v18 = vrot.slane %v3118_v9, 5 }
  0x90   : > { %v2197_v37 = vsel %vm1090_vm0, %v3036_v23, 0  ;;  %v697_v44 = vrot.slane %v696_v49, 4  ;;  %v2063_v20 = vsel %vm1090_vm0, %v3019_v14, 0  ;;  %v2493_v23 = vsel %vm1090_vm0, %v3071_v39, 0 }
  0x91   : > { %v3710_v17 = vpack.c.b16 %v1024_v36, %v1023_v5  ;;  %v687_v27 = vrot.slane %v686_v3, 4  ;;  %v1425_v9 = vsel %vm3712_vm9, %v2951_v8, %v1424_v18  ;;  %v1426_v5 = vrot.slane %v1424_v18, 4  ;;  %2206 = vmatpush.bf16.msra.mxu2 %v2197_v37  ;;  %2072 = vmatpush.bf16.msra.mxu1 %v2063_v20 }
  0x92   : > { %2935 = vmatmul.msk.bf16.vlgmr.msrb.gmra.mxu1 %vm1041_vm5, %v3702_v46  ;;  %v2353_v3 = vsel %vm1090_vm0, %v3053_v33, 0  ;;  %v1536_v31 = vunpack.c.l.b16 %v1425_v9  ;;  %v702_v15 = vsel %vm3248_vm6, %v697_v44, %v701_v4  ;;  %2502 = vmatpush.bf16.msra.mxu0 %v2493_v23  ;;  %v1431_v37 = vrot.slane %v3421_v7, 5 }
  0x93   : > { %2934 = vmatmul.msk.bf16.gmra.mxu3 %vm1041_vm5, %v3710_v17  ;;  %v692_v36 = vsel %vm3248_vm6, %v687_v27, %v691_v32  ;;  %v1428_v8 = vsel %vm3712_vm9, %v1426_v5, %v1424_v18  ;;  %v1000_v33 = vunpack.c.l.b16 %v702_v15  ;;  %v1219_v32 = vunpack.c.l.b16 %v3547_v56 }
  0x94   : > { %v999_v40 = vunpack.c.l.b16 %v692_v36  ;;  %2362 = vmatpush.bf16.msra.mxu3 %v2353_v3  ;;  %v1537_v49 = vunpack.c.l.b16 %v1428_v8  ;;  %v1220_v14 = vunpack.c.l.b16 %v3552_v60  ;;  %v2953_v18 = vrot.slane %v3547_v56, 9 }
  0x95   : > { %v1438_v39 = vrot.slane %v3552_v60, 5  ;;  %v1441_v9 = vrot.slane %v3556_v63, 5  ;;  %v2952_v5 = vrot.slane %v3419_v6, 9  ;;  %v1433_v3 = vrot.slane %v1431_v37, 4 }
  0x96   : > { %v3738_v27 = vpack.c.b16 %v1000_v33, %v999_v40  ;;  %v3740_v4 = vpack.c.b16 %v1537_v49, %v1536_v31  ;;  %v3742_v44 = vpack.c.b16 %v1220_v14, %v1219_v32  ;;  %v1434_v36 = vrot.slane %v3428_v13, 5 }
  0x97   : > { %v1217_v31 = vunpack.c.l.b16 %v3419_v6  ;;  %v1218_v20 = vunpack.c.l.b16 %v3421_v7  ;;  %v1439_v15 = vsel %vm3712_vm9, %v2953_v18, %v1438_v39  ;;  %v1440_v40 = vrot.slane %v1438_v39, 4 }
  0x98   : > { %4661 = vst [vmem:[#allocation30_spill] sm:$0xff] %v3740_v4  ;;  %2922 = vmatmul.msk.bf16.gmra.mxu0 %vm1041_vm5, %v3738_v27  ;;  %2968 = vmatmul.msk.bf16.vlgmr.msrb.gmra.mxu2 %vm1041_vm5, %v3740_v4  ;;  %v1540_v8 = vunpack.c.l.b16 %v1439_v15  ;;  %v1432_v60 = vsel %vm3712_vm9, %v2952_v5, %v1431_v37  ;;  %v1435_v63 = vsel %vm3712_vm9, %v1433_v3, %v1434_v36  ;;  %v1445_v37 = vrot.slane %v3686_v41, 5 }
  0x99   : > { %v1442_v56 = vsel %vm3712_vm9, %v1440_v40, %v1441_v9  ;;  %v1248_v13 = vpack.c.b16 %v1218_v20, %v1217_v31  ;;  %v1538_v6 = vunpack.c.l.b16 %v1432_v60  ;;  %v1539_v7 = vunpack.c.l.b16 %v1435_v63 }
  0x9a   : > { %v1541_v23 = vunpack.c.l.b16 %v1442_v56  ;;  %v2954_v32 = vrot.slane %v3684_v38, 9  ;;  %v1448_v14 = vrot.slane %v3688_v10, 5  ;;  %v1221_v18 = vunpack.c.l.b16 %v3684_v38 }
  0x9b   : > { %v3767_v49 = vpack.c.b16 %v1539_v7, %v1538_v6  ;;  %v1222_v39 = vunpack.c.l.b16 %v3686_v41  ;;  %v1452_v41 = vrot.slane %v3220_v45, 5  ;;  %v2955_v20 = vrot.slane %v3223_v47, 9 }
  0x9c   : > { %v3763_v33 = vpack.c.b16 %v1541_v23, %v1540_v8  ;;  %v1446_v9 = vsel %vm3712_vm9, %v2954_v32, %v1445_v37  ;;  %v1455_v40 = vrot.slane %v3225_v48, 5  ;;  %v1223_v8 = vunpack.c.l.b16 %v3223_v47 }
  0x9d   : > { %v3790_v3 = vpack.c.b16 %v1222_v39, %v1221_v18  ;;  %v1542_v36 = vunpack.c.l.b16 %v1446_v9  ;;  %v1454_v15 = vrot.slane %v1452_v41, 4  ;;  %v1224_v56 = vunpack.c.l.b16 %v3220_v45 }
  0x9e   : > { %v1453_v63 = vsel %vm3712_vm9, %v2955_v20, %v1452_v41  ;;  %v1459_v47 = vrot.slane %v3337_v55, 5  ;;  %v2956_v18 = vrot.slane %v3341_v59, 9  ;;  %v1462_v9 = vrot.slane %v3347_v62, 5 }
  0x9f   : > { %v1456_v23 = vsel %vm3712_vm9, %v1454_v15, %v1455_v40  ;;  %v1544_v7 = vunpack.c.l.b16 %v1453_v63  ;;  %v1466_v63 = vrot.slane %v3458_v22, 5  ;;  %v1473_v4 = vrot.slane %v3587_v24, 5 }
  0xa0   : > { %v1461_v39 = vrot.slane %v1459_v47, 4 }
  0xa2   : > { %2936 = vmatmul.msk.bf16.gmra.mxu1 %vm1041_vm5, %v1248_v13  ;;  %v1463_v41 = vsel %vm3712_vm9, %v1461_v39, %v1462_v9 }
  0xa3   : > { %2985 = vmatmul.msk.bf16.vlgmr.msrb.gmra.mxu3 %vm1041_vm5, %v1248_v13  ;;  %v3815_v13 = vpack.c.b16 %v1224_v56, %v1223_v8  ;;  %v1547_v40 = vunpack.c.l.b16 %v1463_v41 }
  0xa5   : > { %v3796_v10 = vpop.f32.mrf.mxu1 }
  0xa8   : > { %3002 = vmatmul.msk.bf16.vlgmr.msrb.gmra.mxu0 %vm1041_vm5, %v3474_v52  ;;  %2969 = vmatmul.msk.bf16.gmra.mxu2 %vm1041_vm5, %v3767_v49  ;;  %v1447_v52 = vrot.slane %v1445_v37, 4  ;;  %v1545_v37 = vunpack.c.l.b16 %v1456_v23  ;;  %v2957_v23 = vrot.slane %v3456_v21, 9 }
  0xaa   : > { %v1449_v5 = vsel %vm3712_vm9, %v1447_v52, %v1448_v14  ;;  %v3823_v45 = vpack.c.b16 %v1545_v37, %v1544_v7  ;;  %v3834_v52 = vpop.f32.mrf.mxu0  ;;  %v1468_v7 = vrot.slane %v1466_v63, 4  ;;  %v1469_v37 = vrot.slane %v3466_v35, 5 }
  0xab   : > { %v1543_v31 = vunpack.c.l.b16 %v1449_v5  ;;  %v1225_v5 = vunpack.c.l.b16 %v3341_v59 }
  0xac   : > { %v1470_v41 = vsel %vm3712_vm9, %v1468_v7, %v1469_v37  ;;  %v2958_v37 = vrot.slane %v3585_v61, 9 }
  0xad   : > { %v3798_v38 = vpack.c.b16 %v1543_v31, %v1542_v36  ;;  %v3809_v60 = vpop.f32.mrf.mxu1  ;;  %v1226_v36 = vunpack.c.l.b16 %v3337_v55  ;;  %v1460_v31 = vsel %vm3712_vm9, %v2956_v18, %v1459_v47  ;;  %v1227_v47 = vunpack.c.l.b16 %v3456_v21 }
  0xae   : > { %v3817_v6 = vpop.f32.mrf.mxu2  ;;  %v1546_v15 = vunpack.c.l.b16 %v1460_v31  ;;  %v1228_v18 = vunpack.c.l.b16 %v3458_v22  ;;  %v1467_v31 = vsel %vm3712_vm9, %v2957_v23, %v1466_v63  ;;  %v1549_v21 = vunpack.c.l.b16 %v1470_v41 }
  0xaf   : > { %v3846_v20 = vpack.c.b16 %v1226_v36, %v1225_v5  ;;  %v1548_v35 = vunpack.c.l.b16 %v1467_v31  ;;  %v1229_v31 = vunpack.c.l.b16 %v3585_v61  ;;  %v1230_v41 = vunpack.c.l.b16 %v3587_v24 }
  0xb0   : > { %v3860_v56 = vpack.c.b16 %v1547_v40, %v1546_v15  ;;  %v3883_v15 = vpack.c.b16 %v1228_v18, %v1227_v47  ;;  %v1475_v47 = vrot.slane %v1473_v4, 4  ;;  %v1476_v18 = vrot.slane %v3591_v57, 5 }
  0xb1   : > { %v3889_v22 = vpack.c.b16 %v1549_v21, %v1548_v35  ;;  %v1474_v35 = vsel %vm3712_vm9, %v2958_v37, %v1473_v4  ;;  %v3912_v46 = vpack.c.b16 %v1230_v41, %v1229_v31  ;;  %v1480_v24 = vrot.slane %v3235_v54, 5 }
  0xb2   : > { %2937 = vmatmul.msk.bf16.gmra.mxu1 %vm1041_vm5, %v3742_v44  ;;  %v3856_v55 = vpop.f32.mrf.mxu0  ;;  %4665 = vst [vmem:[#allocation34_spill] sm:$0xff] %v3883_v15  ;;  %v1477_v21 = vsel %vm3712_vm9, %v1475_v47, %v1476_v18  ;;  %v2959_v37 = vrot.slane %v3233_v53, 9  ;;  %v1483_v18 = vrot.slane %v3240_v58, 5  ;;  %v1231_v31 = vunpack.c.l.b16 %v3233_v53 }
  0xb3   : > { %2986 = vmatmul.msk.bf16.gmra.mxu3 %vm1041_vm5, %v3742_v44  ;;  %4666 = vst [vmem:[#allocation35_spill] sm:$0xff] %v3889_v22  ;;  %v1482_v47 = vrot.slane %v1480_v24, 4 }
  0xb4   : > { %4668 = vst [vmem:[#allocation37_spill] sm:$0xff] %v3912_v46 }
  0xb6   : > { %v3832_v32 = vpop.f32.mrf.mxu2  ;;  %v3836_v14 = vpop.f32.mrf.mxu3 }
  0xb7   : > { %4662 = vst [vmem:[#allocation31_spill] sm:$0xff] %v3836_v14 }
  0xb8   : > { %3003 = vmatmul.msk.bf16.gmra.mxu0 %vm1041_vm5, %v3604_v51  ;;  %2970 = vmatmul.msk.bf16.gmra.mxu2 %vm1041_vm5, %v3763_v33 }
  0xbe   : > { %v3858_v62 = vpop.f32.mrf.mxu3 }
  0xbf   : > { %v3826_v48 = vpop.f32.mrf.mxu1  ;;  %4663 = vst [vmem:[#allocation32_spill] sm:$0xff] %v3858_v62  ;;  %v1550_v62 = vunpack.c.l.b16 %v1474_v35 }
  0xc2   : > { %2938 = vmatmul.msk.bf16.gmra.mxu1 %vm1041_vm5, %v3790_v3 }
  0xc3   : > { %2987 = vmatmul.msk.bf16.gmra.mxu3 %vm1041_vm5, %v3790_v3 }
  0xc7   : > { %v3848_v8 = vpop.f32.mrf.mxu1 }
  0xc8   : > { %3004 = vmatmul.msk.bf16.gmra.mxu0 %vm1041_vm5, %v3738_v27  ;;  %2971 = vmatmul.msk.bf16.gmra.mxu2 %vm1041_vm5, %v3798_v38  ;;  %v3854_v59 = vpop.f32.mrf.mxu2 }
  0xd0   : > { %v3873_v9 = vpop.f32.mrf.mxu2 }
  0xd2   : > { %2939 = vmatmul.msk.bf16.gmra.mxu1 %vm1041_vm5, %v3815_v13 }
  0xd3   : > { %2988 = vmatmul.msk.bf16.gmra.mxu3 %vm1041_vm5, %v3815_v13  ;;  %v3875_v5 = vpop.f32.mrf.mxu0 }
  0xd4   : > { %v3877_v36 = vpop.f32.mrf.mxu3 }
  0xd5   : > { %4664 = vst [vmem:[#allocation33_spill] sm:$0xff] %v3877_v36 }
  0xd8   : > { %3005 = vmatmul.msk.bf16.gmra.mxu0 %vm1041_vm5, %v3275_v43  ;;  %2972 = vmatmul.msk.bf16.gmra.mxu2 %vm1041_vm5, %v3823_v45 }
  0xdb   : > { %v3896_v23 = vpop.f32.mrf.mxu0 }
  0xdc   : > { %v3898_v7 = vpop.f32.mrf.mxu3 }
  0xdd   : > { %v3871_v39 = vpop.f32.mrf.mxu1  ;;  %4667 = vst [vmem:[#allocation36_spill] sm:$0xff] %v3898_v7 }
  0xe2   : > { %2940 = vmatmul.msk.bf16.gmra.mxu1 %vm1041_vm5, %v3846_v20 }
  0xe3   : > { %2989 = vmatmul.msk.bf16.gmra.mxu3 %vm1041_vm5, %v3846_v20 }
  0xe5   : > { %v3891_v40 = vpop.f32.mrf.mxu1 }
  0xe8   : > { %3006 = vmatmul.msk.bf16.gmra.mxu0 %vm1041_vm5, %v3385_v19  ;;  %2973 = vmatmul.msk.bf16.gmra.mxu2 %vm1041_vm5, %v3860_v56 }
  0xeb   : > { %v3894_v63 = vpop.f32.mrf.mxu2 }
  0xf2   : > { %2941 = vmatmul.msk.bf16.gmra.mxu1 %vm1041_vm5, %v3883_v15 }
  0xf3   : > { %2990 = vmatmul.msk.bf16.gmra.mxu3 %vm1041_vm5, %v3883_v15  ;;  %v3916_v36 = vpop.f32.mrf.mxu2 }
  0xf4   : > { %v3920_v57 = vpop.f32.mrf.mxu3 }
  0xf5   : > { %4669 = vst [vmem:[#allocation38_spill] sm:$0xff] %v3920_v57  ;;  %v1484_v57 = vsel %vm3712_vm9, %v1482_v47, %v1483_v18 }
  0xf8   : > { %3007 = vmatmul.msk.bf16.gmra.mxu0 %vm1041_vm5, %v3509_v50  ;;  %2974 = vmatmul.msk.bf16.gmra.mxu2 %vm1041_vm5, %v3889_v22  ;;  %v1551_v50 = vunpack.c.l.b16 %v1477_v21  ;;  %v3918_v22 = vpop.f32.mrf.mxu0  ;;  %v1481_v21 = vsel %vm3712_vm9, %v2959_v37, %v1480_v24  ;;  %v1487_v37 = vrot.slane %v3357_v11, 5 }
  0xf9   : > { %v1552_v58 = vunpack.c.l.b16 %v1481_v21  ;;  %v1234_v21 = vunpack.c.l.b16 %v3357_v11 }
  0xfa   : > { %v3926_v61 = vpack.c.b16 %v1551_v50, %v1550_v62  ;;  %v1232_v50 = vunpack.c.l.b16 %v3235_v54  ;;  %v1489_v18 = vrot.slane %v1487_v37, 4 }
  0xfc   : > { %4670 = vst [vmem:[#allocation39_spill] sm:$0xff] %v3926_v61  ;;  %v3943_v35 = vpop.f32.mrf.mxu3 }
  0xfd   : > { %4671 = vst [vmem:[#allocation40_spill] sm:$0xff] %v3943_v35 }
  0xff   : > { %v3914_v7 = vpop.f32.mrf.mxu1 }
 0x100   : > { %v3941_v41 = vpop.f32.mrf.mxu0 }
 0x102   : > { %2942 = vmatmul.msk.bf16.gmra.mxu1 %vm1041_vm5, %v3912_v46 }
 0x103   : > { %2991 = vmatmul.msk.bf16.gmra.mxu3 %vm1041_vm5, %v3912_v46  ;;  %v1553_v46 = vunpack.c.l.b16 %v1484_v57  ;;  %v2960_v57 = vrot.slane %v3351_v1, 9 }
 0x105   : > { %v3957_v54 = vpack.c.b16 %v1553_v46, %v1552_v58 }
 0x107   : > { %v3929_v4 = vpop.f32.mrf.mxu1  ;;  %4673 = vst [vmem:[#allocation42_spill] sm:$0xff] %v3957_v54 }
 0x108   : > { %3008 = vmatmul.msk.bf16.gmra.mxu0 %vm1041_vm5, %v3643_v0  ;;  %2975 = vmatmul.msk.bf16.gmra.mxu2 %vm1041_vm5, %v3926_v61  ;;  %v3949_v0 = vpack.c.b16 %v1232_v50, %v1231_v31  ;;  %v1490_v31 = vrot.slane %v3360_v16, 5  ;;  %v1233_v50 = vunpack.c.l.b16 %v3351_v1 }
 0x10a   : > { %4672 = vst [vmem:[#allocation41_spill] sm:$0xff] %v3949_v0  ;;  %v3981_v15 = vpack.c.b16 %v1234_v21, %v1233_v50 }
 0x10b   : > { %v3939_v62 = vpop.f32.mrf.mxu2 }
 0x10f   : > { %v1323_v61 = vpop.f32.mrf.mxu1 }
 0x110   : > { %v1324_v46 = vadd.f32 %v1323_v61, %v3834_v52 }
 0x112   : > { %2943 = vmatmul.msk.bf16.gmra.mxu1 %vm1041_vm5, %v3949_v0 }
 0x113   : > { %2992 = vmatmul.msk.bf16.gmra.mxu3 %vm1041_vm5, %v3949_v0  ;;  %v3955_v53 = vpop.f32.mrf.mxu2 }
 0x115   : > { %v3959_v35 = vpop.f32.mrf.mxu0 }
 0x116   : > { %v3961_v24 = vpop.f32.mrf.mxu3 }
 0x117   : > { %4674 = vst [vmem:[#allocation43_spill] sm:$0xff] %v3961_v24  ;;  %v1325_v47 = vpop.f32.mrf.mxu1 }
 0x118   : > { %3009 = vmatmul.msk.bf16.gmra.mxu0 %vm1041_vm5, %v3300_v2  ;;  %2976 = vmatmul.msk.bf16.gmra.mxu2 %vm1041_vm5, %v3957_v54  ;;  %v1488_v2 = vsel %vm3712_vm9, %v2960_v57, %v1487_v37  ;;  %v1491_v54 = vsel %vm3712_vm9, %v1489_v18, %v1490_v31  ;;  %v1326_v1 = vadd.f32 %v1325_v47, %v3856_v55  ;;  %v1494_v18 = vrot.slane %v3488_v29, 5  ;;  %v4678_v47 = vld [vmem:[#allocation15_spill] sm:$0xff] }
 0x119   : > { %v1554_v52 = vunpack.c.l.b16 %v1488_v2  ;;  %v1555_v61 = vunpack.c.l.b16 %v1491_v54  ;;  %v2961_v55 = vrot.slane %v3486_v28, 9  ;;  %v1497_v21 = vrot.slane %v4678_v47, 5 }
 0x11a   : > { %v1496_v54 = vrot.slane %v1494_v18, 4 }
 0x11b   : > { %v1644_v58 = vpop.f32.mrf.mxu2 }
 0x11c   : > { %v1724_v24 = vadd.f32 %v1644_v58, %v1324_v46  ;;  %v3988_v58 = vpack.c.b16 %v1555_v61, %v1554_v52  ;;  %v1235_v61 = vunpack.c.l.b16 %v3486_v28 }
 0x11d   : > { %v3973_v0 = vpop.f32.mrf.mxu0 }
 0x11e   : > { %v3975_v14 = vpop.f32.mrf.mxu3  ;;  %4676 = vst [vmem:[#allocation45_spill] sm:$0xff] %v3988_v58 }
 0x11f   : > { %4675 = vst [vmem:[#allocation44_spill] sm:$0xff] %v3975_v14  ;;  %v1328_v16 = vpop.f32.mrf.mxu1 }
 0x120   : > { %v1329_v52 = vadd.f32 %v1328_v16, %v3875_v5 }
 0x122   : > { %2944 = vmatmul.msk.bf16.gmra.mxu1 %vm1041_vm5, %v3981_v15 }
 0x123   : > { %2993 = vmatmul.msk.bf16.gmra.mxu3 %vm1041_vm5, %v3981_v15  ;;  %v1646_v11 = vpop.f32.mrf.mxu2 }
 0x124   : > { %v1725_v46 = vadd.f32 %v1646_v11, %v1326_v1 }
 0x125   : > { %v1934_v37 = vpop.f32.mrf.mxu0 }
 0x126   : > { %v1778_v57 = vpop.f32.mrf.mxu3 }
 0x127   : > { %v1858_v31 = vadd.f32 %v1778_v57, %v1724_v24  ;;  %v1330_v50 = vpop.f32.mrf.mxu1  ;;  %v1236_v24 = vunpack.c.l.b16 %v3488_v29 }
 0x128   : > { %3010 = vmatmul.msk.bf16.gmra.mxu0 %vm1041_vm5, %v3404_v30  ;;  %2977 = vmatmul.msk.bf16.gmra.mxu2 %vm1041_vm5, %v3988_v58  ;;  %v1495_v30 = vsel %vm3712_vm9, %v2961_v55, %v1494_v18  ;;  %v1331_v29 = vadd.f32 %v1330_v50, %v3896_v23  ;;  %v4682_v23 = vld [vmem:[#allocation23_spill] sm:$0xff] }
 0x129   : > { %v3995_v2 = vadd.f32 %v1934_v37, %v1858_v31  ;;  %v1498_v37 = vsel %vm3712_vm9, %v1496_v54, %v1497_v21  ;;  %v1556_v16 = vunpack.c.l.b16 %v1495_v30  ;;  %v4679_v21 = vld [vmem:[#allocation22_spill] sm:$0xff]  ;;  %v2962_v50 = vrot.slane %v4682_v23, 9 }
 0x12a   : > { %v1557_v28 = vunpack.c.l.b16 %v1498_v37  ;;  %v1504_v37 = vrot.slane %v3621_v34, 5 }
 0x12b   : > { %4677 = vst [vmem:[#allocation46_spill] sm:$0xff] %v3995_v2  ;;  %v1649_v1 = vpop.f32.mrf.mxu2  ;;  %v4006_v2 = vpack.c.b16 %v1236_v24, %v1235_v61  ;;  %v4680_v24 = vld [vmem:[#allocation20_spill] sm:$0xff] }
 0x12c   : > { %v1726_v11 = vadd.f32 %v1649_v1, %v1329_v52 }
 0x12d   : > { %v1936_v57 = vpop.f32.mrf.mxu0 }
 0x12e   : > { %v1780_v14 = vpop.f32.mrf.mxu3 }
 0x12f   : > { %v1859_v31 = vadd.f32 %v1780_v14, %v1725_v46  ;;  %v1333_v47 = vpop.f32.mrf.mxu1  ;;  %v4016_v14 = vpack.c.b16 %v1557_v28, %v1556_v16 }
 0x130   : > { %v1334_v5 = vadd.f32 %v1333_v47, %v3918_v22  ;;  %v1501_v22 = vrot.slane %v4679_v21, 5 }
 0x131   : > { %v4009_v58 = vadd.f32 %v1936_v57, %v1859_v31  ;;  %v1237_v31 = vunpack.c.l.b16 %v4682_v23 }
 0x132   : > { %2945 = vmatmul.msk.bf16.gmra.mxu1 %vm1041_vm5, %v4006_v2  ;;  %v1503_v57 = vrot.slane %v1501_v22, 4 }
 0x133   : > { %2994 = vmatmul.msk.bf16.gmra.mxu3 %vm1041_vm5, %v4006_v2  ;;  %v1651_v18 = vpop.f32.mrf.mxu2 }
 0x134   : > { %v1727_v55 = vadd.f32 %v1651_v18, %v1331_v29  ;;  %v1502_v29 = vsel %vm3712_vm9, %v2962_v50, %v1501_v22  ;;  %v1505_v18 = vsel %vm3712_vm9, %v1503_v57, %v1504_v37  ;;  %v4684_v57 = vld [vmem:[#allocation5_spill] sm:$0xff] }
 0x135   : > { %v1939_v46 = vpop.f32.mrf.mxu0  ;;  %v1559_v23 = vunpack.c.l.b16 %v1505_v18  ;;  %v1508_v37 = vrot.slane %v4684_v57, 5 }
 0x136   : > { %v1783_v54 = vpop.f32.mrf.mxu3 }
 0x137   : > { %v1860_v30 = vadd.f32 %v1783_v54, %v1726_v11  ;;  %v1335_v52 = vpop.f32.mrf.mxu1  ;;  %v1238_v11 = vunpack.c.l.b16 %v4679_v21 }
 0x138   : > { %v1336_v61 = vadd.f32 %v1335_v52, %v3941_v41  ;;  %3011 = vmatmul.msk.bf16.gmra.mxu0 %vm1041_vm5, %v4680_v24  ;;  %2978 = vmatmul.msk.bf16.gmra.mxu2 %vm1041_vm5, %v4016_v14  ;;  %v1558_v52 = vunpack.c.l.b16 %v1502_v29  ;;  %v4687_v29 = vld [vmem:[#allocation6_spill] sm:$0xff] }
 0x139   : > { %v4024_v1 = vadd.f32 %v1939_v46, %v1860_v30  ;;  %v4034_v54 = vpack.c.b16 %v1238_v11, %v1237_v31  ;;  %v1511_v18 = vrot.slane %v4687_v29, 5 }
 0x13a   : > { %v4043_v22 = vpack.c.b16 %v1559_v23, %v1558_v52 }
 0x13b   : > { %4681 = vst [vmem:[#allocation15_spill] sm:$0xff] %v4024_v1  ;;  %v1654_v47 = vpop.f32.mrf.mxu2 }
 0x13c   : > { %v1728_v16 = vadd.f32 %v1654_v47, %v1334_v5 }
 0x13d   : > { %v1941_v41 = vpop.f32.mrf.mxu0 }
 0x13e   : > { %v1785_v28 = vpop.f32.mrf.mxu3 }
 0x13f   : > { %v1861_v46 = vadd.f32 %v1785_v28, %v1727_v55  ;;  %v1338_v30 = vpop.f32.mrf.mxu1  ;;  %v1510_v28 = vrot.slane %v1508_v37, 4 }
 0x140   : > { %v1339_v34 = vadd.f32 %v1338_v30, %v3959_v35 }
 0x141   : > { %v4037_v1 = vadd.f32 %v1941_v41, %v1861_v46  ;;  %v4686_v41 = vld [vmem:[#allocation4_spill] sm:$0xff] }
 0x142   : > { %2946 = vmatmul.msk.bf16.gmra.mxu1 %vm1041_vm5, %v4034_v54  ;;  %v1239_v46 = vunpack.c.l.b16 %v4686_v41 }
 0x143   : > { %4683 = vst [vmem:[#allocation22_spill] sm:$0xff] %v4037_v1  ;;  %2995 = vmatmul.msk.bf16.gmra.mxu3 %vm1041_vm5, %v4034_v54  ;;  %v1656_v5 = vpop.f32.mrf.mxu2 }
 0x144   : > { %v1729_v21 = vadd.f32 %v1656_v5, %v1336_v61  ;;  %v2963_v61 = vrot.slane %v4686_v41, 9 }
 0x145   : > { %v1944_v55 = vpop.f32.mrf.mxu0 }
 0x146   : > { %v1788_v50 = vpop.f32.mrf.mxu3  ;;  %v1509_v5 = vsel %vm3712_vm9, %v2963_v61, %v1508_v37 }
 0x147   : > { %v1862_v31 = vadd.f32 %v1788_v50, %v1728_v16  ;;  %v1340_v35 = vpop.f32.mrf.mxu1  ;;  %v1240_v16 = vunpack.c.l.b16 %v4684_v57 }
 0x148   : > { %v1341_v11 = vadd.f32 %v1340_v35, %v3973_v0  ;;  %3012 = vmatmul.msk.bf16.gmra.mxu0 %vm1041_vm5, %v3673_v26  ;;  %2979 = vmatmul.msk.bf16.gmra.mxu2 %vm1041_vm5, %v4043_v22 }
 0x149   : > { %v4051_v47 = vadd.f32 %v1944_v55, %v1862_v31  ;;  %v1512_v55 = vsel %vm3712_vm9, %v1510_v28, %v1511_v18  ;;  %v4061_v31 = vpack.c.b16 %v1240_v16, %v1239_v46  ;;  %v4692_v16 = vld [vmem:[#allocation9_spill] sm:$0xff] }
 0x14a   : > { %v1561_v29 = vunpack.c.l.b16 %v1512_v55 }
 0x14b   : > { %4685 = vst [vmem:[#allocation20_spill] sm:$0xff] %v4051_v47  ;;  %v1659_v30 = vpop.f32.mrf.mxu2  ;;  %v1560_v47 = vunpack.c.l.b16 %v1509_v5 }
 0x14c   : > { %v1730_v52 = vadd.f32 %v1659_v30, %v1339_v34  ;;  %4688 = vst [vmem:[#allocation23_spill] sm:$0xff] %v4061_v31 }
 0x14d   : > { %v1946_v0 = vpop.f32.mrf.mxu0  ;;  %v4069_v37 = vpack.c.b16 %v1561_v29, %v1560_v47 }
 0x14e   : > { %v1790_v23 = vpop.f32.mrf.mxu3 }
 0x14f   : > { %v1863_v50 = vadd.f32 %v1790_v23, %v1729_v21  ;;  %v1343_v35 = vpop.f32.mrf.mxu1  ;;  %4690 = vst [vmem:[#allocation4_spill] sm:$0xff] %v4069_v37  ;;  %v4691_v21 = vld [vmem:[#allocation11_spill] sm:$0xff] }
 0x150   : > { %v1515_v28 = vrot.slane %v4691_v21, 5  ;;  %v1344_v55 = vadd.f32 %v1343_v35, %v3796_v10 }
 0x151   : > { %v4063_v1 = vadd.f32 %v1946_v0, %v1863_v50  ;;  %v4694_v0 = vld [vmem:[#allocation10_spill] sm:$0xff] }
 0x152   : > { %2947 = vmatmul.msk.bf16.gmra.mxu1 %vm1041_vm5, %v4061_v31  ;;  %v2964_v23 = vrot.slane %v4694_v0, 9  ;;  %v1517_v5 = vrot.slane %v1515_v28, 4  ;;  %v1241_v50 = vunpack.c.l.b16 %v4694_v0 }
 0x153   : > { %4689 = vst [vmem:[#allocation5_spill] sm:$0xff] %v4063_v1  ;;  %2996 = vmatmul.msk.bf16.gmra.mxu3 %vm1041_vm5, %v4061_v31  ;;  %v1661_v34 = vpop.f32.mrf.mxu2 }
 0x154   : > { %v1731_v57 = vadd.f32 %v1661_v34, %v1341_v11  ;;  %v4695_v11 = vld [vmem:[#allocation12_spill] sm:$0xff] }
 0x155   : > { %v1949_v41 = vpop.f32.mrf.mxu0  ;;  %v1518_v47 = vrot.slane %v4695_v11, 5 }
 0x156   : > { %v1793_v61 = vpop.f32.mrf.mxu3 }
 0x157   : > { %v1864_v18 = vadd.f32 %v1793_v61, %v1730_v52  ;;  %v1345_v46 = vpop.f32.mrf.mxu1  ;;  %v1242_v52 = vunpack.c.l.b16 %v4691_v21 }
 0x158   : > { %3013 = vmatmul.msk.bf16.gmra.mxu0 %vm1041_vm5, %v4692_v16  ;;  %2980 = vmatmul.msk.bf16.gmra.mxu2 %vm1041_vm5, %v4069_v37  ;;  %v1516_v16 = vsel %vm3712_vm9, %v2964_v23, %v1515_v28  ;;  %v1346_v21 = vadd.f32 %v1345_v46, %v3809_v60 }
 0x159   : > { %v4076_v30 = vadd.f32 %v1949_v41, %v1864_v18  ;;  %v1519_v41 = vsel %vm3712_vm9, %v1517_v5, %v1518_v47  ;;  %v1562_v10 = vunpack.c.l.b16 %v1516_v16  ;;  %v4699_v47 = vld [vmem:[#allocation18_spill] sm:$0xff] }
 0x15a   : > { %v1563_v35 = vunpack.c.l.b16 %v1519_v41  ;;  %v1522_v16 = vrot.slane %v4699_v47, 5 }
 0x15b   : > { %4693 = vst [vmem:[#allocation6_spill] sm:$0xff] %v4076_v30  ;;  %v1664_v29 = vpop.f32.mrf.mxu2  ;;  %v4087_v30 = vpack.c.b16 %v1242_v52, %v1241_v50  ;;  %v285_v52 = vld [vmem:[%s3179_s27 + $0x180] sm:$0xff] }
 0x15c   : > { %v1732_v34 = vadd.f32 %v1664_v29, %v1344_v55  ;;  %v4700_v29 = vld [vmem:[#allocation14_spill] sm:$0xff]  ;;  %v1524_v41 = vrot.slane %v1522_v16, 4 }
 0x15d   : > { %v1951_v61 = vpop.f32.mrf.mxu0  ;;  %4696 = vst [vmem:[#allocation11_spill] sm:$0xff] %v4087_v30 }
 0x15e   : > { %v1795_v1 = vpop.f32.mrf.mxu3 }
 0x15f   : > { %v1865_v18 = vadd.f32 %v1795_v1, %v1731_v57  ;;  %v1348_v11 = vpop.f32.mrf.mxu1  ;;  %v4096_v1 = vpack.c.b16 %v1563_v35, %v1562_v10  ;;  %v286_v35 = vld [vmem:[%s3179_s27 + $0x188] sm:$0xff] }
 0x161   : > { %v4089_v0 = vadd.f32 %v1951_v61, %v1865_v18  ;;  %4698 = vst [vmem:[#allocation12_spill] sm:$0xff] %v4096_v1  ;;  %v4701_v61 = vld [vmem:[#allocation17_spill] sm:$0xff]  ;;  %v4703_v18 = vld [vmem:[#allocation19_spill] sm:$0xff] }
 0x162   : > { %2948 = vmatmul.msk.bf16.gmra.mxu1 %vm1041_vm5, %v4087_v30  ;;  %v2965_v60 = vrot.slane %v4701_v61, 9  ;;  %v1525_v10 = vrot.slane %v4703_v18, 5 }
 0x163   : > { %4697 = vst [vmem:[#allocation10_spill] sm:$0xff] %v4089_v0  ;;  %2997 = vmatmul.msk.bf16.gmra.mxu3 %vm1041_vm5, %v4087_v30  ;;  %v1666_v28 = vpop.f32.mrf.mxu2  ;;  %v287_v30 = vld [vmem:[%s3179_s27 + $0x190] sm:$0x3]  ;;  %s3090_s27 = sshll.u32 %s4756_s19, 8 }
 0x164   : > { %v1733_v23 = vadd.f32 %v1666_v28, %v1346_v21  ;;  %v1349_v21 = vadd.f32 %v1348_v11, %v3826_v48  ;;  %v1244_v28 = vunpack.c.l.b16 %v4699_v47  ;;  %v1526_v18 = vsel %vm3712_vm9, %v1524_v41, %v1525_v10  ;;  %v4704_v47 = vld [vmem:[#allocation25_spill] sm:$0xff]  ;;  %s4329_s30 = scalar_lea.vmem %s4565_s4, %s3090_s27 }
 0x165   : > { %v1954_v57 = vpop.f32.mrf.mxu0  ;;  %v1565_v31 = vunpack.c.l.b16 %v1526_v18 }
 0x166   : > { %v1798_v5 = vpop.f32.mrf.mxu3 }
 0x167   : > { %v1866_v55 = vadd.f32 %v1798_v5, %v1732_v34  ;;  %v1350_v50 = vpop.f32.mrf.mxu1  ;;  %v1243_v34 = vunpack.c.l.b16 %v4701_v61  ;;  %v343_v5 = vmul.f32 %v3640_v42, %v285_v52 }
 0x168   : > { %3014 = vmatmul.msk.bf16.gmra.mxu0 %vm1041_vm5, %v4700_v29  ;;  %2981 = vmatmul.msk.bf16.gmra.mxu2 %vm1041_vm5, %v4096_v1  ;;  %v1523_v1 = vsel %vm3712_vm9, %v2965_v60, %v1522_v16  ;;  %v345_v16 = vmul.f32 %v3640_v42, %v287_v30  ;;  %v4706_v30 = vld [vmem:[#allocation27_spill] sm:$0xff] }
 0x169   : > { %v4105_v46 = vadd.f32 %v1954_v57, %v1866_v55  ;;  %v344_v57 = vmul.f32 %v3640_v42, %v286_v35  ;;  %v4119_v11 = vpack.c.b16 %v1244_v28, %v1243_v34  ;;  %v401_v37 = vadd.f32 %v4704_v47, %v343_v5 }
 0x16a   : > { %v1564_v52 = vunpack.c.l.b16 %v1523_v1  ;;  %v1529_v28 = vrot.slane %v4706_v30, 5 }
 0x16b   : > { %4702 = vst [vmem:[#allocation18_spill] sm:$0xff] %v4105_v46  ;;  %v1669_v0 = vpop.f32.mrf.mxu2 }
 0x16c   : > { %v1734_v29 = vadd.f32 %v1669_v0, %v1349_v21  ;;  %v402_v0 = vadd.f32 %v4704_v47, %v344_v57  ;;  %v4131_v35 = vpack.c.b16 %v1565_v31, %v1564_v52  ;;  %v403_v21 = vadd.f32 %v4704_v47, %v345_v16 }
 0x16d   : > { %v1956_v55 = vpop.f32.mrf.mxu0  ;;  %v1531_v52 = vrot.slane %v1529_v28, 4 }
 0x16e   : > { %v1800_v46 = vpop.f32.mrf.mxu3  ;;  %v456_v1 = vmax.f32 %v402_v0, 0.0  ;;  %v457_v31 = vmax.f32 %v403_v21, 0.0  ;;  %v4711_v0 = vld [vmem:[#allocation28_spill] sm:$0xff] }
 0x16f   : > { %v1867_v48 = vadd.f32 %v1800_v46, %v1733_v23  ;;  %v1353_v61 = vpop.f32.mrf.mxu1  ;;  %v1351_v23 = vadd.f32 %v1350_v50, %v3848_v8  ;;  %v455_v46 = vmax.f32 %v401_v37, 0.0  ;;  %v4710_v50 = vld [vmem:[#allocation26_spill] sm:$0xff] }
 0x170   : > { %v4141_v8 = vpack.c.bf16 %v456_v1, %v456_v1  ;;  %v2966_v47 = vrot.slane %v4710_v50, 9  ;;  %v545_v21 = vsel %vm476_vm2, %v457_v31, 0.0 }
 0x171   : > { %v4124_v60 = vadd.f32 %v1956_v55, %v1867_v48  ;;  %v543_v18 = vsel %vm465_vm1, %v455_v46, 0.0  ;;  %v4708_v48 = vld [vmem:[#allocation21_spill] sm:$0xff]  ;;  %v1245_v46 = vunpack.c.l.b16 %v4710_v50  ;;  %v4164_v1 = vpack.c.bf16 %v545_v21, %v545_v21 }
 0x172   : > { %2949 = vmatmul.msk.bf16.gmra.mxu1 %vm1041_vm5, %v4119_v11  ;;  %v4147_v16 = vpack.c.bf16 %v543_v18, %v543_v18  ;;  %v1530_v18 = vsel %vm3712_vm9, %v2966_v47, %v1529_v28 }
 0x173   : > { %4705 = vst [vmem:[#allocation17_spill] sm:$0xff] %v4124_v60  ;;  %2998 = vmatmul.msk.bf16.gmra.mxu3 %vm1041_vm5, %v4119_v11  ;;  %v1671_v41 = vpop.f32.mrf.mxu2 }
 0x174   : > { %v1735_v10 = vadd.f32 %v1671_v41, %v1351_v23  ;;  %v1354_v23 = vadd.f32 %v1353_v61, %v3871_v39  ;;  %v1246_v41 = vunpack.c.l.b16 %v4706_v30  ;;  %v1891_v61 = vshrl.u32 %v4147_v16, 16 }
 0x175   : > { %v1959_v34 = vpop.f32.mrf.mxu0  ;;  %v1894_v30 = vshll.u32 %v4147_v16, 16 }
 0x176   : > { %v1803_v42 = vpop.f32.mrf.mxu3  ;;  %v1893_v28 = vrot.slane %v1891_v61, 4 }
 0x177   : > { %v1868_v5 = vadd.f32 %v1803_v42, %v1734_v29  ;;  %v1355_v57 = vpop.f32.mrf.mxu1  ;;  %v1532_v29 = vrot.slane %v4711_v0, 5  ;;  %v4162_v0 = vpack.c.b16 %v1246_v41, %v1245_v46  ;;  %v1896_v47 = vrot.slane %v1894_v30, 5 }
 0x178   : > { %3015 = vmatmul.msk.bf16.gmra.mxu0 %vm1041_vm5, %v4708_v48  ;;  %2982 = vmatmul.msk.bf16.gmra.mxu2 %vm1041_vm5, %v4131_v35 }
 0x179   : > { %v4143_v37 = vadd.f32 %v1959_v34, %v1868_v5  ;;  %v1900_v34 = vshll.u32 %v4141_v8, 16  ;;  %v1904_v5 = vshrl.u32 %v4141_v8, 16  ;;  %v1533_v39 = vsel %vm3712_vm9, %v1531_v52, %v1532_v29 }
 0x17b   : > { %4709 = vst [vmem:[#allocation19_spill] sm:$0xff] %v4143_v37  ;;  %v1674_v42 = vpop.f32.mrf.mxu2  ;;  %v1902_v52 = vrot.slane %v1900_v34, 5  ;;  %v1906_v29 = vrot.slane %v1904_v5, 4 }
 0x17c   : > { %v1736_v55 = vadd.f32 %v1674_v42, %v1354_v23  ;;  %v1566_v23 = vunpack.c.l.b16 %v1530_v18  ;;  %v1567_v42 = vunpack.c.l.b16 %v1533_v39 }
 0x17d   : > { %v1961_v37 = vpop.f32.mrf.mxu0  ;;  %v1907_v39 = vor.u32 %v1906_v29, %v1902_v52 }
 0x17e   : > { %v1805_v60 = vpop.f32.mrf.mxu3  ;;  %v4173_v41 = vpack.c.b16 %v1567_v42, %v1566_v23  ;;  %v1760_v23 = vunpack.c.l.b16 %v4147_v16  ;;  %v1761_v42 = vunpack.c.l.b16 %v4141_v8 }
 0x17f   : > { %v1869_v50 = vadd.f32 %v1805_v60, %v1735_v10  ;;  %v1358_v31 = vpop.f32.mrf.mxu1  ;;  %v1356_v60 = vadd.f32 %v1355_v57, %v3891_v40  ;;  %v1908_v57 = vrot.slane %v1907_v39, 4 }
 0x180   : > { %v1359_v30 = vadd.f32 %v1358_v31, %v3914_v7 }
 0x181   : > { %v4166_v48 = vadd.f32 %v1961_v37, %v1869_v50  ;;  %v1897_v37 = vor.u32 %v1896_v47, %v1893_v28  ;;  %v1910_v50 = vshll.u32 %v4164_v1, 16 }
 0x182   : > { %2950 = vmatmul.msk.bf16.gmra.mxu1 %vm1041_vm5, %v4162_v0 }
 0x183   : > { %4713 = vst [vmem:[#allocation25_spill] sm:$0xff] %v4166_v48  ;;  %2999 = vmatmul.msk.bf16.gmra.mxu3 %vm1041_vm5, %v4162_v0  ;;  %v1676_v10 = vpop.f32.mrf.mxu2  ;;  %v1898_v40 = vrot.slane %v1897_v37, 4  ;;  %v1912_v5 = vrot.slane %v1910_v50, 5 }
 0x184   : > { %v1737_v46 = vadd.f32 %v1676_v10, %v1356_v60 }
 0x185   : > { %v1964_v21 = vpop.f32.mrf.mxu0  ;;  %v1903_v60 = vsel %vm3248_vm6, %v1898_v40, %v1902_v52 }
 0x186   : > { %v1808_v18 = vpop.f32.mrf.mxu3  ;;  %v1916_v37 = vunpack.c.l.b16 %v1903_v60 }
 0x187   : > { %v1870_v48 = vadd.f32 %v1808_v18, %v1736_v55  ;;  %v1360_v61 = vpop.f32.mrf.mxu1 }
 0x188   : > { %3016 = vmatmul.msk.bf16.gmra.mxu0 %vm1041_vm5, %v3710_v17  ;;  %2983 = vmatmul.msk.bf16.gmra.mxu2 %vm1041_vm5, %v4173_v41  ;;  %v1361_v39 = vadd.f32 %v1360_v61, %v3929_v4 }
 0x189   : > { %v4180_v34 = vadd.f32 %v1964_v21, %v1870_v48  ;;  %v1913_v48 = vsel %vm3248_vm6, %v1908_v57, %v1912_v5  ;;  %v4189_v21 = vpack.c.b16 %v1761_v42, %v1760_v23 }
 0x18a   : > { %v1917_v7 = vunpack.c.l.b16 %v1913_v48 }
 0x18b   : > { %v1679_v28 = vpop.f32.mrf.mxu2 }
 0x18c   : > { %v1738_v55 = vadd.f32 %v1679_v28, %v1359_v30  ;;  %v4198_v50 = vpack.c.b16 %v1917_v7, %v1916_v37 }
 0x18d   : > { %v1966_v47 = vpop.f32.mrf.mxu0 }
 0x18e   : > { %v1810_v29 = vpop.f32.mrf.mxu3 }
 0x18f   : > { %v1871_v10 = vadd.f32 %v1810_v29, %v1737_v46  ;;  %v1363_v18 = vpop.f32.mrf.mxu1 }
 0x190   : > { %v1364_v30 = vadd.f32 %v1363_v18, %v3817_v6 }
 0x191   : > { %v4191_v31 = vadd.f32 %v1966_v47, %v1871_v10 }
 0x192   : > { %3020 = vmatmul.msk.bf16.vlgmr.msra.gmra.mxu1 %vm1041_vm5, %v3767_v49 }
 0x193   : > { %3000 = vmatmul.msk.bf16.gmra.mxu3 %vm1041_vm5, %v4189_v21  ;;  %v1681_v52 = vpop.f32.mrf.mxu2 }
 0x194   : > { %v1739_v12 = vadd.f32 %v1681_v52, %v1361_v39 }
 0x195   : > { %v1969_v46 = vpop.f32.mrf.mxu0 }
 0x196   : > { %v1813_v40 = vpop.f32.mrf.mxu3 }
 0x197   : > { %v1872_v57 = vadd.f32 %v1813_v40, %v1738_v55  ;;  %v1365_v5 = vpop.f32.mrf.mxu1 }
 0x198   : > { %3017 = vmatmul.msk.bf16.gmra.mxu0 %vm1041_vm5, %v4198_v50  ;;  %3037 = vmatmul.msk.bf16.vlgmr.msra.gmra.mxu2 %vm1041_vm5, %v3742_v44  ;;  %v1366_v44 = vadd.f32 %v1365_v5, %v3832_v32 }
 0x199   : > { %v4204_v49 = vadd.f32 %v1969_v46, %v1872_v57 }
 0x19b   : > { %v1684_v23 = vpop.f32.mrf.mxu2 }
 0x19c   : > { %v1740_v4 = vadd.f32 %v1684_v23, %v1364_v30 }
 0x19d   : > { %v1971_v61 = vpop.f32.mrf.mxu0 }
 0x19e   : > { %v1815_v42 = vpop.f32.mrf.mxu3 }
 0x19f   : > { %v1873_v28 = vadd.f32 %v1815_v42, %v1739_v12  ;;  %v1368_v47 = vpop.f32.mrf.mxu1 }
 0x1a0   : > { %v1369_v7 = vadd.f32 %v1368_v47, %v3854_v59 }
 0x1a1   : > { %v4207_v29 = vadd.f32 %v1971_v61, %v1873_v28 }
 0x1a2   : > { %3021 = vmatmul.msk.bf16.gmra.mxu1 %vm1041_vm5, %v3763_v33 }
 0x1a3   : > { %3054 = vmatmul.msk.bf16.vlgmr.msra.gmra.mxu3 %vm1041_vm5, %v3604_v51  ;;  %v1686_v55 = vpop.f32.mrf.mxu2 }
 0x1a4   : > { %v1741_v60 = vadd.f32 %v1686_v55, %v1366_v44 }
 0x1a5   : > { %v1974_v48 = vpop.f32.mrf.mxu0 }
 0x1a6   : > { %v1818_v6 = vpop.f32.mrf.mxu3 }
 0x1a7   : > { %v1874_v10 = vadd.f32 %v1818_v6, %v1740_v4  ;;  %v1370_v18 = vpop.f32.mrf.mxu1 }
 0x1a8   : > { %3072 = vmatmul.msk.bf16.vlgmr.msra.gmra.mxu0 %vm1041_vm5, %v3763_v33  ;;  %3038 = vmatmul.msk.bf16.gmra.mxu2 %vm1041_vm5, %v3790_v3  ;;  %v1371_v33 = vadd.f32 %v1370_v18, %v3873_v9 }
 0x1a9   : > { %v4218_v37 = vadd.f32 %v1974_v48, %v1874_v10 }
 0x1ab   : > { %v1689_v39 = vpop.f32.mrf.mxu2 }
 0x1ac   : > { %v1742_v51 = vadd.f32 %v1689_v39, %v1369_v7 }
 0x1ad   : > { %v1976_v52 = vpop.f32.mrf.mxu0 }
 0x1ae   : > { %v1820_v32 = vpop.f32.mrf.mxu3 }
 0x1af   : > { %v1875_v12 = vadd.f32 %v1820_v32, %v1741_v60  ;;  %v1373_v46 = vpop.f32.mrf.mxu1 }
 0x1b0   : > { %v1374_v61 = vadd.f32 %v1373_v46, %v3894_v63 }
 0x1b1   : > { %v4221_v40 = vadd.f32 %v1976_v52, %v1875_v12 }
 0x1b2   : > { %3022 = vmatmul.msk.bf16.gmra.mxu1 %vm1041_vm5, %v3798_v38 }
 0x1b3   : > { %3055 = vmatmul.msk.bf16.gmra.mxu3 %vm1041_vm5, %v3738_v27  ;;  %v1691_v3 = vpop.f32.mrf.mxu2 }
 0x1b4   : > { %v1743_v57 = vadd.f32 %v1691_v3, %v1371_v33 }
 0x1b5   : > { %v1979_v5 = vpop.f32.mrf.mxu0 }
 0x1b6   : > { %v1823_v59 = vpop.f32.mrf.mxu3 }
 0x1b7   : > { %v1876_v30 = vadd.f32 %v1823_v59, %v1742_v51  ;;  %v1375_v23 = vpop.f32.mrf.mxu1 }
 0x1b8   : > { %3073 = vmatmul.msk.bf16.gmra.mxu0 %vm1041_vm5, %v3798_v38  ;;  %3039 = vmatmul.msk.bf16.gmra.mxu2 %vm1041_vm5, %v3815_v13  ;;  %v1376_v38 = vadd.f32 %v1375_v23, %v3916_v36 }
 0x1b9   : > { %v4232_v4 = vadd.f32 %v1979_v5, %v1876_v30  ;;  %v4714_v5 = vld [vmem:[#allocation34_spill] sm:$0xff]  ;;  %v4715_v30 = vld [vmem:[#allocation31_spill] sm:$0xff] }
 0x1bb   : > { %v1694_v42 = vpop.f32.mrf.mxu2 }
 0x1bc   : > { %v1744_v27 = vadd.f32 %v1694_v42, %v1374_v61 }
 0x1bd   : > { %v1981_v28 = vpop.f32.mrf.mxu0 }
 0x1be   : > { %v1825_v9 = vpop.f32.mrf.mxu3 }
 0x1bf   : > { %v1877_v47 = vadd.f32 %v1825_v9, %v1743_v57  ;;  %v1378_v44 = vpop.f32.mrf.mxu1 }
 0x1c0   : > { %v1379_v7 = vadd.f32 %v1378_v44, %v3939_v62  ;;  %v4717_v44 = vld [vmem:[#allocation16_spill] sm:$0xff] }
 0x1c1   : > { %v4235_v55 = vadd.f32 %v1981_v28, %v1877_v47  ;;  %v4716_v47 = vld [vmem:[#allocation35_spill] sm:$0xff] }
 0x1c2   : > { %3023 = vmatmul.msk.bf16.gmra.mxu1 %vm1041_vm5, %v3823_v45 }
 0x1c3   : > { %3056 = vmatmul.msk.bf16.gmra.mxu3 %vm1041_vm5, %v3275_v43  ;;  %v1696_v13 = vpop.f32.mrf.mxu2 }
 0x1c4   : > { %v1745_v60 = vadd.f32 %v1696_v13, %v1376_v38 }
 0x1c5   : > { %v1984_v48 = vpop.f32.mrf.mxu0 }
 0x1c6   : > { %v1828_v63 = vpop.f32.mrf.mxu3 }
 0x1c7   : > { %v1878_v6 = vadd.f32 %v1828_v63, %v1744_v27  ;;  %v1380_v10 = vpop.f32.mrf.mxu1 }
 0x1c8   : > { %3074 = vmatmul.msk.bf16.gmra.mxu0 %vm1041_vm5, %v3823_v45  ;;  %3040 = vmatmul.msk.bf16.gmra.mxu2 %vm1041_vm5, %v3846_v20  ;;  %v1381_v45 = vadd.f32 %v1380_v10, %v3955_v53 }
 0x1c9   : > { %v4246_v18 = vadd.f32 %v1984_v48, %v1878_v6 }
 0x1cb   : > { %v1699_v39 = vpop.f32.mrf.mxu2 }
 0x1cc   : > { %v1746_v43 = vadd.f32 %v1699_v39, %v1379_v7  ;;  %v4719_v7 = vld [vmem:[#allocation37_spill] sm:$0xff] }
 0x1cd   : > { %v1986_v51 = vpop.f32.mrf.mxu0 }
 0x1ce   : > { %v1830_v36 = vpop.f32.mrf.mxu3 }
 0x1cf   : > { %v1879_v52 = vadd.f32 %v1830_v36, %v1745_v60  ;;  %v1383_v32 = vpop.f32.mrf.mxu1 }
 0x1d0   : > { %v1384_v23 = vadd.f32 %v1383_v32, %v4715_v30 }
 0x1d1   : > { %v4249_v12 = vadd.f32 %v1986_v51, %v1879_v52 }
 0x1d2   : > { %3024 = vmatmul.msk.bf16.gmra.mxu1 %vm1041_vm5, %v3860_v56 }
 0x1d3   : > { %3057 = vmatmul.msk.bf16.gmra.mxu3 %vm1041_vm5, %v3385_v19  ;;  %v1701_v20 = vpop.f32.mrf.mxu2 }
 0x1d4   : > { %v1747_v46 = vadd.f32 %v1701_v20, %v1381_v45 }
 0x1d5   : > { %v1989_v33 = vpop.f32.mrf.mxu0 }
 0x1d6   : > { %v1833_v62 = vpop.f32.mrf.mxu3 }
 0x1d7   : > { %v1880_v3 = vadd.f32 %v1833_v62, %v1746_v43  ;;  %v1385_v57 = vpop.f32.mrf.mxu1  ;;  %v4720_v43 = vld [vmem:[#allocation33_spill] sm:$0xff]  ;;  %v4721_v62 = vld [vmem:[#allocation39_spill] sm:$0xff] }
 0x1d8   : > { %3075 = vmatmul.msk.bf16.gmra.mxu0 %vm1041_vm5, %v3860_v56  ;;  %3041 = vmatmul.msk.bf16.gmra.mxu2 %vm1041_vm5, %v4714_v5  ;;  %v4718_v56 = vld [vmem:[#allocation32_spill] sm:$0xff] }
 0x1d9   : > { %v4260_v59 = vadd.f32 %v1989_v33, %v1880_v3  ;;  %v1386_v38 = vadd.f32 %v1385_v57, %v4718_v56  ;;  %v4722_v3 = vld [vmem:[#allocation24_spill] sm:$0xff] }
 0x1da   : > { %v4723_v57 = vld [vmem:[#allocation36_spill] sm:$0xff] }
 0x1db   : > { %v1704_v61 = vpop.f32.mrf.mxu2 }
 0x1dc   : > { %v1748_v19 = vadd.f32 %v1704_v61, %v1384_v23 }
 0x1dd   : > { %v1991_v42 = vpop.f32.mrf.mxu0 }
 0x1de   : > { %v1835_v53 = vpop.f32.mrf.mxu3 }
 0x1df   : > { %v1881_v27 = vadd.f32 %v1835_v53, %v1747_v46  ;;  %v1388_v28 = vpop.f32.mrf.mxu1 }
 0x1e0   : > { %v1389_v51 = vadd.f32 %v1388_v28, %v4720_v43  ;;  %v4728_v43 = vld [vmem:[#allocation40_spill] sm:$0xff] }
 0x1e1   : > { %v4263_v9 = vadd.f32 %v1991_v42, %v1881_v27  ;;  %v4724_v27 = vld [vmem:[#allocation41_spill] sm:$0xff] }
 0x1e2   : > { %3025 = vmatmul.msk.bf16.gmra.mxu1 %vm1041_vm5, %v4716_v47 }
 0x1e3   : > { %3058 = vmatmul.msk.bf16.gmra.mxu3 %vm1041_vm5, %v4717_v44  ;;  %v1706_v13 = vpop.f32.mrf.mxu2 }
 0x1e4   : > { %v1749_v60 = vadd.f32 %v1706_v13, %v1386_v38 }
 0x1e5   : > { %v1994_v48 = vpop.f32.mrf.mxu0 }
 0x1e6   : > { %v1838_v63 = vpop.f32.mrf.mxu3 }
 0x1e7   : > { %v1882_v6 = vadd.f32 %v1838_v63, %v1748_v19  ;;  %v1390_v10 = vpop.f32.mrf.mxu1 }
 0x1e8   : > { %3076 = vmatmul.msk.bf16.gmra.mxu0 %vm1041_vm5, %v4716_v47  ;;  %3042 = vmatmul.msk.bf16.gmra.mxu2 %vm1041_vm5, %v4719_v7  ;;  %v1391_v5 = vadd.f32 %v1390_v10, %v4723_v57  ;;  %v4725_v47 = vld [vmem:[#allocation38_spill] sm:$0xff]  ;;  %v4727_v7 = vld [vmem:[#allocation7_spill] sm:$0xff] }
 0x1e9   : > { %v4274_v39 = vadd.f32 %v1994_v48, %v1882_v6  ;;  %v4726_v10 = vld [vmem:[#allocation42_spill] sm:$0xff] }
 0x1eb   : > { %v1709_v36 = vpop.f32.mrf.mxu2 }
 0x1ec   : > { %v1750_v52 = vadd.f32 %v1709_v36, %v1389_v51 }
 0x1ed   : > { %v1996_v32 = vpop.f32.mrf.mxu0 }
 0x1ee   : > { %v1840_v45 = vpop.f32.mrf.mxu3 }
 0x1ef   : > { %v1883_v20 = vadd.f32 %v1840_v45, %v1749_v60  ;;  %v1393_v46 = vpop.f32.mrf.mxu1 }
 0x1f0   : > { %v1394_v44 = vadd.f32 %v1393_v46, %v4725_v47  ;;  %v4731_v47 = vld [vmem:[#allocation13_spill] sm:$0xff] }
 0x1f1   : > { %v4277_v33 = vadd.f32 %v1996_v32, %v1883_v20 }
 0x1f2   : > { %3026 = vmatmul.msk.bf16.gmra.mxu1 %vm1041_vm5, %v4721_v62 }
 0x1f3   : > { %3059 = vmatmul.msk.bf16.gmra.mxu3 %vm1041_vm5, %v4722_v3  ;;  %v1711_v30 = vpop.f32.mrf.mxu2  ;;  %v4729_v3 = vld [vmem:[#allocation43_spill] sm:$0xff] }
 0x1f4   : > { %v1751_v23 = vadd.f32 %v1711_v30, %v1391_v5 }
 0x1f5   : > { %v1999_v61 = vpop.f32.mrf.mxu0 }
 0x1f6   : > { %v1843_v19 = vpop.f32.mrf.mxu3 }
 0x1f7   : > { %v1884_v42 = vadd.f32 %v1843_v19, %v1750_v52  ;;  %v1395_v53 = vpop.f32.mrf.mxu1 }
 0x1f8   : > { %3077 = vmatmul.msk.bf16.gmra.mxu0 %vm1041_vm5, %v4721_v62  ;;  %3043 = vmatmul.msk.bf16.gmra.mxu2 %vm1041_vm5, %v4724_v27  ;;  %v1396_v51 = vadd.f32 %v1395_v53, %v4728_v43  ;;  %v4730_v27 = vld [vmem:[#allocation45_spill] sm:$0xff] }
 0x1f9   : > { %v4288_v28 = vadd.f32 %v1999_v61, %v1884_v42 }
 0x1fb   : > { %v1714_v56 = vpop.f32.mrf.mxu2 }
 0x1fc   : > { %v1752_v38 = vadd.f32 %v1714_v56, %v1394_v44  ;;  %v4732_v44 = vld [vmem:[#allocation44_spill] sm:$0xff] }
 0x1fd   : > { %v2001_v13 = vpop.f32.mrf.mxu0 }
 0x1fe   : > { %v1845_v60 = vpop.f32.mrf.mxu3 }
 0x1ff   : > { %v1885_v48 = vadd.f32 %v1845_v60, %v1751_v23  ;;  %v1398_v63 = vpop.f32.mrf.mxu1 }
 0x200   : > { %v1399_v57 = vadd.f32 %v1398_v63, %v4729_v3 }
 0x201   : > { %v4291_v6 = vadd.f32 %v2001_v13, %v1885_v48 }
 0x202   : > { %3027 = vmatmul.msk.bf16.gmra.mxu1 %vm1041_vm5, %v4726_v10 }
 0x203   : > { %3060 = vmatmul.msk.bf16.gmra.mxu3 %vm1041_vm5, %v4727_v7  ;;  %v1716_v36 = vpop.f32.mrf.mxu2 }
 0x204   : > { %v1753_v52 = vadd.f32 %v1716_v36, %v1396_v51 }
 0x205   : > { %v2004_v32 = vpop.f32.mrf.mxu0 }
 0x206   : > { %v1848_v45 = vpop.f32.mrf.mxu3 }
 0x207   : > { %v1886_v20 = vadd.f32 %v1848_v45, %v1752_v38  ;;  %v1400_v46 = vpop.f32.mrf.mxu1 }
 0x208   : > { %3078 = vmatmul.msk.bf16.gmra.mxu0 %vm1041_vm5, %v4726_v10  ;;  %3044 = vmatmul.msk.bf16.gmra.mxu2 %vm1041_vm5, %v3981_v15  ;;  %v1401_v15 = vadd.f32 %v1400_v46, %v4732_v44 }
 0x209   : > { %v4302_v62 = vadd.f32 %v2004_v32, %v1886_v20  ;;  %v4733_v32 = vld [vmem:[#allocation46_spill] sm:$0xff] }
 0x20b   : > { %v1719_v5 = vpop.f32.mrf.mxu2 }
 0x20c   : > { %v1754_v30 = vadd.f32 %v1719_v5, %v1399_v57 }
 0x20d   : > { %v2006_v23 = vpop.f32.mrf.mxu0 }
 0x20e   : > { %v1850_v61 = vpop.f32.mrf.mxu3 }
 0x20f   : > { %v1887_v19 = vadd.f32 %v1850_v61, %v1753_v52  ;;  %v2074_v42 = vpop.f32.mrf.mxu1 }
 0x210   : > { %v2154_v45 = vadd.f32 %v2074_v42, %v4733_v32 }
 0x211   : > { %v4305_v53 = vadd.f32 %v2006_v23, %v1887_v19 }
 0x212   : > { %3028 = vmatmul.msk.bf16.gmra.mxu1 %vm1041_vm5, %v4730_v27 }
 0x213   : > { %3061 = vmatmul.msk.bf16.gmra.mxu3 %vm1041_vm5, %v4731_v47  ;;  %v1721_v56 = vpop.f32.mrf.mxu2 }
 0x214   : > { %v1755_v38 = vadd.f32 %v1721_v56, %v1401_v15 }
 0x215   : > { %v2009_v13 = vpop.f32.mrf.mxu0 }
 0x216   : > { %v1853_v60 = vpop.f32.mrf.mxu3 }
 0x217   : > { %v1888_v48 = vadd.f32 %v1853_v60, %v1754_v30  ;;  %v2076_v63 = vpop.f32.mrf.mxu1 }
 0x218   : > { %3079 = vmatmul.msk.bf16.gmra.mxu0 %vm1041_vm5, %v4730_v27  ;;  %3045 = vmatmul.msk.bf16.gmra.mxu2 %vm1041_vm5, %v4006_v2 }
 0x219   : > { %v4316_v10 = vadd.f32 %v2009_v13, %v1888_v48 }
 0x21b   : > { %v2208_v7 = vpop.f32.mrf.mxu2 }
 0x21c   : > { %v2288_v46 = vadd.f32 %v2208_v7, %v2154_v45 }
 0x21d   : > { %v2011_v43 = vpop.f32.mrf.mxu0 }
 0x21e   : > { %v1855_v51 = vpop.f32.mrf.mxu3 }
 0x21f   : > { %v1889_v36 = vadd.f32 %v1855_v51, %v1755_v38  ;;  %v2079_v52 = vpop.f32.mrf.mxu1  ;;  %v4734_v38 = vld [vmem:[#allocation15_spill] sm:$0xff] }
 0x220   : > { %v2156_v13 = vadd.f32 %v2079_v52, %v4734_v38 }
 0x221   : > { %v4319_v20 = vadd.f32 %v2011_v43, %v1889_v36 }
 0x222   : > { %3029 = vmatmul.msk.bf16.gmra.mxu1 %vm1041_vm5, %v4016_v14 }
 0x223   : > { %3062 = vmatmul.msk.bf16.gmra.mxu3 %vm1041_vm5, %v4680_v24  ;;  %v2210_v3 = vpop.f32.mrf.mxu2  ;;  %v2155_v24 = vadd.f32 %v2076_v63, %v4009_v58 }
 0x225   : > { %v2504_v2 = vpop.f32.mrf.mxu0  ;;  %v2289_v61 = vadd.f32 %v2210_v3, %v2155_v24  ;;  %v4735_v3 = vld [vmem:[#allocation22_spill] sm:$0xff] }
 0x226   : > { %v2364_v57 = vpop.f32.mrf.mxu3 }
 0x227   : > { %v2444_v5 = vadd.f32 %v2364_v57, %v2288_v46  ;;  %v2081_v30 = vpop.f32.mrf.mxu1  ;;  %v4736_v57 = vld [vmem:[#allocation23_spill] sm:$0xff] }
 0x228   : > { %3080 = vmatmul.msk.bf16.gmra.mxu0 %vm1041_vm5, %v4016_v14  ;;  %3046 = vmatmul.msk.bf16.gmra.mxu2 %vm1041_vm5, %v4034_v54 }
 0x229   : > { %v2584_v23 = vadd.f32 %v2504_v2, %v2444_v5  ;;  %v2157_v2 = vadd.f32 %v2081_v30, %v4735_v3 }
 0x22b   : > { %2616 = vst.msk [vmem:[%s4329_s30] sm:$0xff] %vm1041_vm5, %v2584_v23  ;;  %v2213_v19 = vpop.f32.mrf.mxu2  ;;  %v2717_v15 = vmul.f32 %v2584_v23, %v2584_v23  ;;  %v2648_v58 = vsel %vm1041_vm5, %v2584_v23, 0.0 }
 0x22c   : > { %v2290_v60 = vadd.f32 %v2213_v19, %v2156_v13  ;;  %v4738_v13 = vld [vmem:[#allocation4_spill] sm:$0xff] }
 0x22d   : > { %v2506_v42 = vpop.f32.mrf.mxu0  ;;  %v2749_v7 = vsel %vm1041_vm5, %v2717_v15, 0.0 }
 0x22e   : > { %v2366_v27 = vpop.f32.mrf.mxu3 }
 0x22f   : > { %v2445_v47 = vadd.f32 %v2366_v27, %v2289_v61  ;;  %v2084_v44 = vpop.f32.mrf.mxu1 }
 0x231   : > { %v2585_v56 = vadd.f32 %v2506_v42, %v2445_v47 }
 0x232   : > { %3030 = vmatmul.msk.bf16.gmra.mxu1 %vm1041_vm5, %v4043_v22 }
 0x233   : > { %2617 = vst.msk [vmem:[%s4329_s30 + $0x8] sm:$0xff] %vm1041_vm5, %v2585_v56  ;;  %v2649_v14 = vsel %vm1041_vm5, %v2585_v56, 0.0  ;;  %v2718_v54 = vmul.f32 %v2585_v56, %v2585_v56  ;;  %3063 = vmatmul.msk.bf16.gmra.mxu3 %vm1041_vm5, %v3673_v26  ;;  %v2215_v63 = vpop.f32.mrf.mxu2  ;;  %v4737_v56 = vld [vmem:[#allocation20_spill] sm:$0xff] }
 0x234   : > { %v2650_v48 = vadd.f32 %v2649_v14, %v2648_v58  ;;  %v2291_v23 = vadd.f32 %v2215_v63, %v2157_v2  ;;  %v2158_v38 = vadd.f32 %v2084_v44, %v4737_v56  ;;  %v4741_v2 = vld [vmem:[#allocation11_spill] sm:$0xff] }
 0x235   : > { %v2750_v43 = vsel %vm1041_vm5, %v2718_v54, 0.0  ;;  %v2509_v36 = vpop.f32.mrf.mxu0  ;;  %v4739_v54 = vld [vmem:[#allocation9_spill] sm:$0xff] }
 0x236   : > { %v2751_v51 = vadd.f32 %v2750_v43, %v2749_v7  ;;  %v2369_v52 = vpop.f32.mrf.mxu3 }
 0x237   : > { %v2446_v32 = vadd.f32 %v2369_v52, %v2290_v60  ;;  %v2086_v45 = vpop.f32.mrf.mxu1 }
 0x238   : > { %3081 = vmatmul.msk.bf16.gmra.mxu0 %vm1041_vm5, %v4043_v22  ;;  %3047 = vmatmul.msk.bf16.gmra.mxu2 %vm1041_vm5, %v4736_v57 }
 0x239   : > { %v2586_v46 = vadd.f32 %v2509_v36, %v2446_v32 }
 0x23b   : > { %2618 = vst.msk [vmem:[%s4329_s30 + $0x10] sm:$0xff] %vm1041_vm5, %v2586_v46  ;;  %v2651_v26 = vsel %vm1041_vm5, %v2586_v46, 0.0  ;;  %v2719_v5 = vmul.f32 %v2586_v46, %v2586_v46  ;;  %v2218_v61 = vpop.f32.mrf.mxu2  ;;  %v4740_v46 = vld [vmem:[#allocation5_spill] sm:$0xff] }
 0x23c   : > { %v2652_v24 = vadd.f32 %v2651_v26, %v2650_v48  ;;  %v2292_v60 = vadd.f32 %v2218_v61, %v2158_v38  ;;  %v2159_v3 = vadd.f32 %v2086_v45, %v4740_v46  ;;  %v4743_v38 = vld [vmem:[#allocation12_spill] sm:$0xff] }
 0x23d   : > { %v2752_v19 = vsel %vm1041_vm5, %v2719_v5, 0.0  ;;  %v2511_v27 = vpop.f32.mrf.mxu0 }
 0x23e   : > { %v2753_v42 = vadd.f32 %v2752_v19, %v2751_v51  ;;  %v2371_v22 = vpop.f32.mrf.mxu3 }
 0x23f   : > { %v2447_v47 = vadd.f32 %v2371_v22, %v2291_v23  ;;  %v2089_v15 = vpop.f32.mrf.mxu1 }
 0x241   : > { %v2587_v30 = vadd.f32 %v2511_v27, %v2447_v47 }
 0x242   : > { %3031 = vmatmul.msk.bf16.gmra.mxu1 %vm1041_vm5, %v4738_v13 }
 0x243   : > { %2619 = vst.msk [vmem:[%s4329_s30 + $0x18] sm:$0xff] %vm1041_vm5, %v2587_v30  ;;  %v2653_v58 = vsel %vm1041_vm5, %v2587_v30, 0.0  ;;  %v2720_v14 = vmul.f32 %v2587_v30, %v2587_v30  ;;  %3064 = vmatmul.msk.bf16.gmra.mxu3 %vm1041_vm5, %v4739_v54  ;;  %v2220_v63 = vpop.f32.mrf.mxu2  ;;  %v4742_v30 = vld [vmem:[#allocation6_spill] sm:$0xff] }
 0x244   : > { %v2654_v48 = vadd.f32 %v2653_v58, %v2652_v24  ;;  %v2293_v5 = vadd.f32 %v2220_v63, %v2159_v3  ;;  %v2160_v56 = vadd.f32 %v2089_v15, %v4742_v30 }
 0x245   : > { %v2754_v7 = vsel %vm1041_vm5, %v2720_v14, 0.0  ;;  %v2514_v51 = vpop.f32.mrf.mxu0  ;;  %v4744_v14 = vld [vmem:[#allocation14_spill] sm:$0xff] }
 0x246   : > { %v2755_v43 = vadd.f32 %v2754_v7, %v2753_v42  ;;  %v2374_v44 = vpop.f32.mrf.mxu3 }
 0x247   : > { %v2448_v36 = vadd.f32 %v2374_v44, %v2292_v60  ;;  %v2091_v52 = vpop.f32.mrf.mxu1 }
 0x248   : > { %3082 = vmatmul.msk.bf16.gmra.mxu0 %vm1041_vm5, %v4738_v13  ;;  %3048 = vmatmul.msk.bf16.gmra.mxu2 %vm1041_vm5, %v4741_v2 }
 0x249   : > { %v2588_v32 = vadd.f32 %v2514_v51, %v2448_v36 }
 0x24b   : > { %2620 = vst.msk [vmem:[%s4329_s30 + $0x20] sm:$0xff] %vm1041_vm5, %v2588_v32  ;;  %v2655_v57 = vsel %vm1041_vm5, %v2588_v32, 0.0  ;;  %v2721_v26 = vmul.f32 %v2588_v32, %v2588_v32  ;;  %v2223_v24 = vpop.f32.mrf.mxu2  ;;  %v4745_v32 = vld [vmem:[#allocation10_spill] sm:$0xff] }
 0x24c   : > { %v2656_v23 = vadd.f32 %v2655_v57, %v2654_v48  ;;  %v2294_v54 = vadd.f32 %v2223_v24, %v2160_v56  ;;  %v2161_v46 = vadd.f32 %v2091_v52, %v4745_v32  ;;  %v4747_v56 = vld [vmem:[#allocation21_spill] sm:$0xff] }
 0x24d   : > { %v2756_v61 = vsel %vm1041_vm5, %v2721_v26, 0.0  ;;  %v2516_v42 = vpop.f32.mrf.mxu0 }
 0x24e   : > { %v2757_v19 = vadd.f32 %v2756_v61, %v2755_v43  ;;  %v2376_v27 = vpop.f32.mrf.mxu3 }
 0x24f   : > { %v2449_v22 = vadd.f32 %v2376_v27, %v2293_v5  ;;  %v2094_v47 = vpop.f32.mrf.mxu1 }
 0x251   : > { %v2589_v45 = vadd.f32 %v2516_v42, %v2449_v22  ;;  %v4746_v22 = vld [vmem:[#allocation18_spill] sm:$0xff] }
 0x252   : > { %3032 = vmatmul.msk.bf16.gmra.mxu1 %vm1041_vm5, %v4743_v38 }
 0x253   : > { %2621 = vst.msk [vmem:[%s4329_s30 + $0x28] sm:$0xff] %vm1041_vm5, %v2589_v45  ;;  %v2657_v13 = vsel %vm1041_vm5, %v2589_v45, 0.0  ;;  %v2722_v58 = vmul.f32 %v2589_v45, %v2589_v45  ;;  %3065 = vmatmul.msk.bf16.gmra.mxu3 %vm1041_vm5, %v4744_v14  ;;  %v2225_v48 = vpop.f32.mrf.mxu2  ;;  %v2162_v45 = vadd.f32 %v2094_v47, %v4746_v22 }
 0x254   : > { %v2658_v60 = vadd.f32 %v2657_v13, %v2656_v23  ;;  %v2295_v57 = vadd.f32 %v2225_v48, %v2161_v46 }
 0x255   : > { %v2758_v63 = vsel %vm1041_vm5, %v2722_v58, 0.0  ;;  %v2519_v43 = vpop.f32.mrf.mxu0 }
 0x256   : > { %v2759_v7 = vadd.f32 %v2758_v63, %v2757_v19  ;;  %v2379_v15 = vpop.f32.mrf.mxu3 }
 0x257   : > { %v2450_v51 = vadd.f32 %v2379_v15, %v2294_v54  ;;  %v2096_v44 = vpop.f32.mrf.mxu1 }
 0x258   : > { %3083 = vmatmul.msk.bf16.gmra.mxu0 %vm1041_vm5, %v4743_v38  ;;  %3049 = vmatmul.msk.bf16.gmra.mxu2 %vm1041_vm5, %v4119_v11 }
 0x259   : > { %v2590_v36 = vadd.f32 %v2519_v43, %v2450_v51  ;;  %v4748_v43 = vld [vmem:[#allocation17_spill] sm:$0xff] }
 0x25a   : > { %v2163_v15 = vadd.f32 %v2096_v44, %v4748_v43 }
 0x25b   : > { %2622 = vst.msk [vmem:[%s4329_s30 + $0x30] sm:$0xff] %vm1041_vm5, %v2590_v36  ;;  %v2659_v3 = vsel %vm1041_vm5, %v2590_v36, 0.0  ;;  %v2723_v2 = vmul.f32 %v2590_v36, %v2590_v36  ;;  %v2228_v5 = vpop.f32.mrf.mxu2 }
 0x25c   : > { %v2660_v26 = vadd.f32 %v2659_v3, %v2658_v60  ;;  %v2296_v38 = vadd.f32 %v2228_v5, %v2162_v45 }
 0x25d   : > { %v2760_v23 = vsel %vm1041_vm5, %v2723_v2, 0.0  ;;  %v2521_v61 = vpop.f32.mrf.mxu0 }
 0x25e   : > { %v2761_v24 = vadd.f32 %v2760_v23, %v2759_v7  ;;  %v2381_v19 = vpop.f32.mrf.mxu3 }
 0x25f   : > { %v2451_v42 = vadd.f32 %v2381_v19, %v2295_v57  ;;  %v2099_v27 = vpop.f32.mrf.mxu1 }
 0x261   : > { %v2591_v52 = vadd.f32 %v2521_v61, %v2451_v42 }
 0x262   : > { %3033 = vmatmul.msk.bf16.gmra.mxu1 %vm1041_vm5, %v4131_v35 }
 0x263   : > { %2623 = vst.msk [vmem:[%s4329_s30 + $0x38] sm:$0xff] %vm1041_vm5, %v2591_v52  ;;  %v2661_v11 = vsel %vm1041_vm5, %v2591_v52, 0.0  ;;  %v2724_v30 = vmul.f32 %v2591_v52, %v2591_v52  ;;  %3066 = vmatmul.msk.bf16.gmra.mxu3 %vm1041_vm5, %v4747_v56  ;;  %v2230_v58 = vpop.f32.mrf.mxu2 }
 0x264   : > { %v2662_v13 = vadd.f32 %v2661_v11, %v2660_v26  ;;  %v2297_v32 = vadd.f32 %v2230_v58, %v2163_v15  ;;  %v3018_v11 = vrot.slane %v4147_v16, 9 }
 0x265   : > { %v2762_v14 = vsel %vm1041_vm5, %v2724_v30, 0.0  ;;  %v2524_v60 = vpop.f32.mrf.mxu0  ;;  %v2052_v30 = vrot.slane %v4164_v1, 5 }
 0x266   : > { %v2763_v54 = vadd.f32 %v2762_v14, %v2761_v24  ;;  %v2384_v47 = vpop.f32.mrf.mxu3  ;;  %v4749_v24 = vld [vmem:[#allocation19_spill] sm:$0xff] }
 0x267   : > { %v2452_v48 = vadd.f32 %v2384_v47, %v2296_v38  ;;  %v2101_v63 = vpop.f32.mrf.mxu1  ;;  %v2164_v61 = vadd.f32 %v2099_v27, %v4749_v24 }
 0x268   : > { %3084 = vmatmul.msk.bf16.gmra.mxu0 %vm1041_vm5, %v4131_v35  ;;  %3050 = vmatmul.msk.bf16.gmra.mxu2 %vm1041_vm5, %v4162_v0  ;;  %v2049_v0 = vrot.slane %v4141_v8, 5 }
 0x269   : > { %v2592_v7 = vadd.f32 %v2524_v60, %v2452_v48  ;;  %v4750_v60 = vld [vmem:[#allocation25_spill] sm:$0xff] }
 0x26a   : > { %v2051_v8 = vrot.slane %v2049_v0, 4  ;;  %v2165_v47 = vadd.f32 %v2101_v63, %v4750_v60 }
 0x26b   : > { %2624 = vst.msk [vmem:[%s4329_s30 + $0x40] sm:$0xff] %vm1041_vm5, %v2592_v7  ;;  %v2663_v51 = vsel %vm1041_vm5, %v2592_v7, 0.0  ;;  %v2725_v36 = vmul.f32 %v2592_v7, %v2592_v7  ;;  %v2233_v3 = vpop.f32.mrf.mxu2 }
 0x26c   : > { %v2664_v46 = vadd.f32 %v2663_v51, %v2662_v13  ;;  %v2298_v52 = vadd.f32 %v2233_v3, %v2164_v61  ;;  %v2053_v16 = vsel %vm3712_vm9, %v2051_v8, %v2052_v30 }
 0x26d   : > { %v2764_v2 = vsel %vm1041_vm5, %v2725_v36, 0.0  ;;  %v2526_v26 = vpop.f32.mrf.mxu0  ;;  %v2057_v51 = vunpack.c.l.b16 %v2053_v16  ;;  %v4752_v16 = vld [vmem:[#allocation8_spill] sm:$0xff] }
 0x26e   : > { %v2765_v57 = vadd.f32 %v2764_v2, %v2763_v54  ;;  %v2386_v35 = vpop.f32.mrf.mxu3  ;;  %v2050_v54 = vsel %vm3712_vm9, %v3018_v11, %v2049_v0 }
 0x26f   : > { %v2453_v5 = vadd.f32 %v2386_v35, %v2297_v32  ;;  %v2104_v23 = vpop.f32.mrf.mxu1  ;;  %v2056_v15 = vunpack.c.l.b16 %v2050_v54 }
 0x271   : > { %v2593_v44 = vadd.f32 %v2526_v26, %v2453_v5  ;;  %v2058_v25 = vpack.c.b16 %v2057_v51, %v2056_v15 }
 0x272   : > { %3034 = vmatmul.msk.bf16.gmra.mxu1 %vm1041_vm5, %v4173_v41 }
 0x273   : > { %2625 = vst.msk [vmem:[%s4329_s30 + $0x48] sm:$0xff] %vm1041_vm5, %v2593_v44  ;;  %v2665_v19 = vsel %vm1041_vm5, %v2593_v44, 0.0  ;;  %v2726_v42 = vmul.f32 %v2593_v44, %v2593_v44  ;;  %3067 = vmatmul.msk.bf16.gmra.mxu3 %vm1041_vm5, %v3710_v17  ;;  %v2235_v45 = vpop.f32.mrf.mxu2 }
 0x274   : > { %v2666_v22 = vadd.f32 %v2665_v19, %v2664_v46  ;;  %v2299_v7 = vadd.f32 %v2235_v45, %v2165_v47  ;;  %v4751_v45 = vld [vmem:[#allocation29_spill] sm:$0xff] }
 0x275   : > { %v2766_v27 = vsel %vm1041_vm5, %v2726_v42, 0.0  ;;  %v2529_v38 = vpop.f32.mrf.mxu0 }
 0x276   : > { %v2767_v56 = vadd.f32 %v2766_v27, %v2765_v57  ;;  %v2389_v13 = vpop.f32.mrf.mxu3  ;;  %v2166_v57 = vadd.f32 %v2104_v23, %v4180_v34 }
 0x277   : > { %v2454_v58 = vadd.f32 %v2389_v13, %v2298_v52  ;;  %v2106_v14 = vpop.f32.mrf.mxu1 }
 0x278   : > { %3085 = vmatmul.msk.bf16.gmra.mxu0 %vm1041_vm5, %v4173_v41  ;;  %3051 = vmatmul.msk.bf16.gmra.mxu2 %vm1041_vm5, %v4189_v21 }
 0x279   : > { %v2594_v17 = vadd.f32 %v2529_v38, %v2454_v58 }
 0x27b   : > { %2626 = vst.msk [vmem:[%s4329_s30 + $0x50] sm:$0xff] %vm1041_vm5, %v2594_v17  ;;  %v2667_v1 = vsel %vm1041_vm5, %v2594_v17, 0.0  ;;  %v2727_v48 = vmul.f32 %v2594_v17, %v2594_v17  ;;  %v2238_v41 = vpop.f32.mrf.mxu2 }
 0x27c   : > { %v2668_v43 = vadd.f32 %v2667_v1, %v2666_v22  ;;  %v2300_v5 = vadd.f32 %v2238_v41, %v2166_v57  ;;  %v2167_v22 = vadd.f32 %v2106_v14, %v4191_v31 }
 0x27d   : > { %v2768_v36 = vsel %vm1041_vm5, %v2727_v48, 0.0  ;;  %v2531_v32 = vpop.f32.mrf.mxu0 }
 0x27e   : > { %v2769_v63 = vadd.f32 %v2768_v36, %v2767_v56  ;;  %v2391_v46 = vpop.f32.mrf.mxu3 }
 0x27f   : > { %v2455_v21 = vadd.f32 %v2391_v46, %v2299_v7  ;;  %v2109_v3 = vpop.f32.mrf.mxu1 }
 0x280   : > { %v2168_v14 = vadd.f32 %v2109_v3, %v4204_v49  ;;  %v4753_v49 = vld [vmem:[#allocation30_spill] sm:$0xff] }
 0x281   : > { %v2595_v2 = vadd.f32 %v2531_v32, %v2455_v21 }
 0x282   : > { %3035 = vmatmul.msk.bf16.gmra.mxu1 %vm1041_vm5, %v2058_v25 }
 0x283   : > { %2627 = vst.msk [vmem:[%s4329_s30 + $0x58] sm:$0xff] %vm1041_vm5, %v2595_v2  ;;  %v2669_v26 = vsel %vm1041_vm5, %v2595_v2, 0.0  ;;  %v2728_v35 = vmul.f32 %v2595_v2, %v2595_v2  ;;  %3068 = vmatmul.msk.bf16.gmra.mxu3 %vm1041_vm5, %v4198_v50  ;;  %v2240_v24 = vpop.f32.mrf.mxu2 }
 0x284   : > { %v2670_v44 = vadd.f32 %v2669_v26, %v2668_v43  ;;  %v2301_v27 = vadd.f32 %v2240_v24, %v2167_v22 }
 0x285   : > { %v2770_v61 = vsel %vm1041_vm5, %v2728_v35, 0.0  ;;  %v2534_v19 = vpop.f32.mrf.mxu0 }
 0x286   : > { %v2771_v0 = vadd.f32 %v2770_v61, %v2769_v63  ;;  %v2394_v42 = vpop.f32.mrf.mxu3 }
 0x287   : > { %v2456_v34 = vadd.f32 %v2394_v42, %v2300_v5  ;;  %v2111_v23 = vpop.f32.mrf.mxu1 }
 0x288   : > { %3086 = vmatmul.msk.bf16.gmra.mxu0 %vm1041_vm5, %v2058_v25  ;;  %3052 = vmatmul.msk.bf16.gmra.mxu2 %vm1041_vm5, %v4751_v45  ;;  %v2169_v46 = vadd.f32 %v2111_v23, %v4207_v29 }
 0x289   : > { %v2596_v52 = vadd.f32 %v2534_v19, %v2456_v34 }
 0x28b   : > { %2628 = vst.msk [vmem:[%s4329_s30 + $0x60] sm:$0xff] %vm1041_vm5, %v2596_v52  ;;  %v2671_v50 = vsel %vm1041_vm5, %v2596_v52, 0.0  ;;  %v2729_v11 = vmul.f32 %v2596_v52, %v2596_v52  ;;  %v2243_v30 = vpop.f32.mrf.mxu2 }
 0x28c   : > { %v2672_v8 = vadd.f32 %v2671_v50, %v2670_v44  ;;  %v2302_v1 = vadd.f32 %v2243_v30, %v2168_v14 }
 0x28d   : > { %v2772_v56 = vsel %vm1041_vm5, %v2729_v11, 0.0  ;;  %v2536_v13 = vpop.f32.mrf.mxu0 }
 0x28e   : > { %v2773_v38 = vadd.f32 %v2772_v56, %v2771_v0  ;;  %v2396_v58 = vpop.f32.mrf.mxu3 }
 0x28f   : > { %v2457_v54 = vadd.f32 %v2396_v58, %v2301_v27  ;;  %v2114_v17 = vpop.f32.mrf.mxu1 }
 0x290   : > { %v2170_v19 = vadd.f32 %v2114_v17, %v4218_v37 }
 0x291   : > { %v2597_v31 = vadd.f32 %v2536_v13, %v2457_v54 }
 0x293   : > { %2629 = vst.msk [vmem:[%s4329_s30 + $0x68] sm:$0xff] %vm1041_vm5, %v2597_v31  ;;  %v2673_v60 = vsel %vm1041_vm5, %v2597_v31, 0.0  ;;  %v2730_v47 = vmul.f32 %v2597_v31, %v2597_v31  ;;  %3069 = vmatmul.msk.bf16.gmra.mxu3 %vm1041_vm5, %v4752_v16  ;;  %v2245_v7 = vpop.f32.mrf.mxu2 }
 0x294   : > { %v2674_v48 = vadd.f32 %v2673_v60, %v2672_v8  ;;  %v2303_v25 = vadd.f32 %v2245_v7, %v2169_v46 }
 0x295   : > { %v2774_v43 = vsel %vm1041_vm5, %v2730_v47, 0.0  ;;  %v2539_v51 = vpop.f32.mrf.mxu0 }
 0x296   : > { %v2775_v15 = vadd.f32 %v2774_v43, %v2773_v38  ;;  %v2399_v41 = vpop.f32.mrf.mxu3 }
 0x297   : > { %v2458_v36 = vadd.f32 %v2399_v41, %v2302_v1  ;;  %v2116_v63 = vpop.f32.mrf.mxu1 }
 0x298   : > { %3087 = vmatmul.msk.bf16.gmra.mxu0 %vm1041_vm5, %v4753_v49  ;;  %v2171_v56 = vadd.f32 %v2116_v63, %v4221_v40 }
 0x299   : > { %v2598_v32 = vadd.f32 %v2539_v51, %v2458_v36 }
 0x29b   : > { %2630 = vst.msk [vmem:[%s4329_s30 + $0x70] sm:$0xff] %vm1041_vm5, %v2598_v32  ;;  %v2675_v21 = vsel %vm1041_vm5, %v2598_v32, 0.0  ;;  %v2731_v3 = vmul.f32 %v2598_v32, %v2598_v32  ;;  %v2248_v57 = vpop.f32.mrf.mxu2 }
 0x29c   : > { %v2676_v2 = vadd.f32 %v2675_v21, %v2674_v48  ;;  %v2304_v34 = vadd.f32 %v2248_v57, %v2170_v19 }
 0x29d   : > { %v2776_v26 = vsel %vm1041_vm5, %v2731_v3, 0.0  ;;  %v2541_v5 = vpop.f32.mrf.mxu0 }
 0x29e   : > { %v2777_v35 = vadd.f32 %v2776_v26, %v2775_v15  ;;  %v2401_v44 = vpop.f32.mrf.mxu3 }
 0x29f   : > { %v2459_v24 = vadd.f32 %v2401_v44, %v2303_v25  ;;  %v2119_v61 = vpop.f32.mrf.mxu1 }
 0x2a0   : > { %v2172_v48 = vadd.f32 %v2119_v61, %v4232_v4 }
 0x2a1   : > { %v2599_v0 = vadd.f32 %v2541_v5, %v2459_v24 }
 0x2a3   : > { %2631 = vst.msk [vmem:[%s4329_s30 + $0x78] sm:$0xff] %vm1041_vm5, %v2599_v0  ;;  %v2677_v29 = vsel %vm1041_vm5, %v2599_v0, 0.0  ;;  %v2732_v42 = vmul.f32 %v2599_v0, %v2599_v0  ;;  %v2250_v52 = vpop.f32.mrf.mxu2 }
 0x2a4   : > { %v2678_v23 = vadd.f32 %v2677_v29, %v2676_v2  ;;  %v2305_v13 = vadd.f32 %v2250_v52, %v2171_v56 }
 0x2a5   : > { %v2778_v22 = vsel %vm1041_vm5, %v2732_v42, 0.0  ;;  %v2544_v50 = vpop.f32.mrf.mxu0 }
 0x2a6   : > { %v2779_v45 = vadd.f32 %v2778_v22, %v2777_v35  ;;  %v2404_v11 = vpop.f32.mrf.mxu3 }
 0x2a7   : > { %v2460_v27 = vadd.f32 %v2404_v11, %v2304_v34  ;;  %v2121_v8 = vpop.f32.mrf.mxu1 }
 0x2a8   : > { %v2173_v3 = vadd.f32 %v2121_v8, %v4235_v55 }
 0x2a9   : > { %v2600_v30 = vadd.f32 %v2544_v50, %v2460_v27 }
 0x2ab   : > { %2632 = vst.msk [vmem:[%s4329_s30 + $0x80] sm:$0xff] %vm1041_vm5, %v2600_v30  ;;  %v2679_v37 = vsel %vm1041_vm5, %v2600_v30, 0.0  ;;  %v2733_v38 = vmul.f32 %v2600_v30, %v2600_v30  ;;  %v2253_v54 = vpop.f32.mrf.mxu2 }
 0x2ac   : > { %v2680_v58 = vadd.f32 %v2679_v37, %v2678_v23  ;;  %v2306_v43 = vadd.f32 %v2253_v54, %v2172_v48 }
 0x2ad   : > { %v2780_v17 = vsel %vm1041_vm5, %v2733_v38, 0.0  ;;  %v2546_v14 = vpop.f32.mrf.mxu0 }
 0x2ae   : > { %v2781_v31 = vadd.f32 %v2780_v17, %v2779_v45  ;;  %v2406_v60 = vpop.f32.mrf.mxu3 }
 0x2af   : > { %v2461_v47 = vadd.f32 %v2406_v60, %v2305_v13  ;;  %v2124_v16 = vpop.f32.mrf.mxu1 }
 0x2b0   : > { %v2174_v29 = vadd.f32 %v2124_v16, %v4246_v18 }
 0x2b1   : > { %v2601_v1 = vadd.f32 %v2546_v14, %v2461_v47 }
 0x2b3   : > { %2633 = vst.msk [vmem:[%s4329_s30 + $0x88] sm:$0xff] %vm1041_vm5, %v2601_v1  ;;  %v2681_v40 = vsel %vm1041_vm5, %v2601_v1, 0.0  ;;  %v2734_v7 = vmul.f32 %v2601_v1, %v2601_v1  ;;  %v2255_v51 = vpop.f32.mrf.mxu2 }
 0x2b4   : > { %v2682_v15 = vadd.f32 %v2681_v40, %v2680_v58  ;;  %v2307_v2 = vadd.f32 %v2255_v51, %v2173_v3 }
 0x2b5   : > { %v2782_v41 = vsel %vm1041_vm5, %v2734_v7, 0.0  ;;  %v2549_v63 = vpop.f32.mrf.mxu0 }
 0x2b6   : > { %v2783_v36 = vadd.f32 %v2782_v41, %v2781_v31  ;;  %v2409_v49 = vpop.f32.mrf.mxu3 }
 0x2b7   : > { %v2462_v32 = vadd.f32 %v2409_v49, %v2306_v43  ;;  %v2126_v46 = vpop.f32.mrf.mxu1 }
 0x2b8   : > { %v2175_v56 = vadd.f32 %v2126_v46, %v4249_v12 }
 0x2b9   : > { %v2602_v21 = vadd.f32 %v2549_v63, %v2462_v32 }
 0x2bb   : > { %2634 = vst.msk [vmem:[%s4329_s30 + $0x90] sm:$0xff] %vm1041_vm5, %v2602_v21  ;;  %v2683_v4 = vsel %vm1041_vm5, %v2602_v21, 0.0  ;;  %v2735_v25 = vmul.f32 %v2602_v21, %v2602_v21  ;;  %v2258_v26 = vpop.f32.mrf.mxu2 }
 0x2bc   : > { %v2684_v57 = vadd.f32 %v2683_v4, %v2682_v15  ;;  %v2308_v34 = vadd.f32 %v2258_v26, %v2174_v29 }
 0x2bd   : > { %v2784_v35 = vsel %vm1041_vm5, %v2735_v25, 0.0  ;;  %v2551_v44 = vpop.f32.mrf.mxu0 }
 0x2be   : > { %v2785_v5 = vadd.f32 %v2784_v35, %v2783_v36  ;;  %v2411_v24 = vpop.f32.mrf.mxu3 }
 0x2bf   : > { %v2463_v61 = vadd.f32 %v2411_v24, %v2307_v2  ;;  %v2129_v0 = vpop.f32.mrf.mxu1 }
 0x2c0   : > { %v2176_v1 = vadd.f32 %v2129_v0, %v4260_v59 }
 0x2c1   : > { %v2603_v19 = vadd.f32 %v2551_v44, %v2463_v61 }
 0x2c3   : > { %2635 = vst.msk [vmem:[%s4329_s30 + $0x98] sm:$0xff] %vm1041_vm5, %v2603_v19  ;;  %v2685_v55 = vsel %vm1041_vm5, %v2603_v19, 0.0  ;;  %v2736_v42 = vmul.f32 %v2603_v19, %v2603_v19  ;;  %v2260_v52 = vpop.f32.mrf.mxu2 }
 0x2c4   : > { %v2686_v23 = vadd.f32 %v2685_v55, %v2684_v57  ;;  %v2309_v38 = vadd.f32 %v2260_v52, %v2175_v56 }
 0x2c5   : > { %v2786_v22 = vsel %vm1041_vm5, %v2736_v42, 0.0  ;;  %v2554_v50 = vpop.f32.mrf.mxu0 }
 0x2c6   : > { %v2787_v45 = vadd.f32 %v2786_v22, %v2785_v5  ;;  %v2414_v11 = vpop.f32.mrf.mxu3 }
 0x2c7   : > { %v2464_v27 = vadd.f32 %v2414_v11, %v2308_v34  ;;  %v2131_v8 = vpop.f32.mrf.mxu1 }
 0x2c8   : > { %v2177_v32 = vadd.f32 %v2131_v8, %v4263_v9 }
 0x2c9   : > { %v2604_v30 = vadd.f32 %v2554_v50, %v2464_v27 }
 0x2cb   : > { %2636 = vst.msk [vmem:[%s4329_s30 + $0xa0] sm:$0xff] %vm1041_vm5, %v2604_v30  ;;  %v2687_v18 = vsel %vm1041_vm5, %v2604_v30, 0.0  ;;  %v2737_v37 = vmul.f32 %v2604_v30, %v2604_v30  ;;  %v2263_v58 = vpop.f32.mrf.mxu2 }
 0x2cc   : > { %v2688_v13 = vadd.f32 %v2687_v18, %v2686_v23  ;;  %v2310_v40 = vadd.f32 %v2263_v58, %v2176_v1 }
 0x2cd   : > { %v2788_v54 = vsel %vm1041_vm5, %v2737_v37, 0.0  ;;  %v2556_v31 = vpop.f32.mrf.mxu0 }
 0x2ce   : > { %v2789_v17 = vadd.f32 %v2788_v54, %v2787_v45  ;;  %v2416_v14 = vpop.f32.mrf.mxu3 }
 0x2cf   : > { %v2465_v60 = vadd.f32 %v2416_v14, %v2309_v38  ;;  %v2134_v47 = vpop.f32.mrf.mxu1 }
 0x2d0   : > { %v2178_v24 = vadd.f32 %v2134_v47, %v4274_v39 }
 0x2d1   : > { %v2605_v16 = vadd.f32 %v2556_v31, %v2465_v60 }
 0x2d3   : > { %2637 = vst.msk [vmem:[%s4329_s30 + $0xa8] sm:$0xff] %vm1041_vm5, %v2605_v16  ;;  %v2689_v12 = vsel %vm1041_vm5, %v2605_v16, 0.0  ;;  %v2738_v48 = vmul.f32 %v2605_v16, %v2605_v16  ;;  %v2265_v43 = vpop.f32.mrf.mxu2 }
 0x2d4   : > { %v2690_v7 = vadd.f32 %v2689_v12, %v2688_v13  ;;  %v2311_v3 = vadd.f32 %v2265_v43, %v2177_v32 }
 0x2d5   : > { %v2790_v15 = vsel %vm1041_vm5, %v2738_v48, 0.0  ;;  %v2559_v41 = vpop.f32.mrf.mxu0 }
 0x2d6   : > { %v2791_v51 = vadd.f32 %v2790_v15, %v2789_v17  ;;  %v2419_v36 = vpop.f32.mrf.mxu3 }
 0x2d7   : > { %v2466_v63 = vadd.f32 %v2419_v36, %v2310_v40  ;;  %v2136_v46 = vpop.f32.mrf.mxu1 }
 0x2d8   : > { %v2179_v50 = vadd.f32 %v2136_v46, %v4277_v33 }
 0x2d9   : > { %v2606_v49 = vadd.f32 %v2559_v41, %v2466_v63 }
 0x2db   : > { %2638 = vst.msk [vmem:[%s4329_s30 + $0xb0] sm:$0xff] %vm1041_vm5, %v2606_v49  ;;  %v2691_v59 = vsel %vm1041_vm5, %v2606_v49, 0.0  ;;  %v2739_v21 = vmul.f32 %v2606_v49, %v2606_v49  ;;  %v2268_v25 = vpop.f32.mrf.mxu2 }
 0x2dc   : > { %v2692_v4 = vadd.f32 %v2691_v59, %v2690_v7  ;;  %v2312_v0 = vadd.f32 %v2268_v25, %v2178_v24 }
 0x2dd   : > { %v2792_v2 = vsel %vm1041_vm5, %v2739_v21, 0.0  ;;  %v2561_v26 = vpop.f32.mrf.mxu0 }
 0x2de   : > { %v2793_v57 = vadd.f32 %v2792_v2, %v2791_v51  ;;  %v2421_v35 = vpop.f32.mrf.mxu3 }
 0x2df   : > { %v2467_v5 = vadd.f32 %v2421_v35, %v2311_v3  ;;  %v2139_v19 = vpop.f32.mrf.mxu1 }
 0x2e0   : > { %v2180_v17 = vadd.f32 %v2139_v19, %v4288_v28 }
 0x2e1   : > { %v2607_v44 = vadd.f32 %v2561_v26, %v2467_v5 }
 0x2e3   : > { %2639 = vst.msk [vmem:[%s4329_s30 + $0xb8] sm:$0xff] %vm1041_vm5, %v2607_v44  ;;  %v2693_v9 = vsel %vm1041_vm5, %v2607_v44, 0.0  ;;  %v2740_v61 = vmul.f32 %v2607_v44, %v2607_v44  ;;  %v2270_v55 = vpop.f32.mrf.mxu2 }
 0x2e4   : > { %v2694_v29 = vadd.f32 %v2693_v9, %v2692_v4  ;;  %v2313_v27 = vadd.f32 %v2270_v55, %v2179_v50 }
 0x2e5   : > { %v2794_v42 = vsel %vm1041_vm5, %v2740_v61, 0.0  ;;  %v2564_v23 = vpop.f32.mrf.mxu0 }
 0x2e6   : > { %v2795_v34 = vadd.f32 %v2794_v42, %v2793_v57  ;;  %v2424_v52 = vpop.f32.mrf.mxu3 }
 0x2e7   : > { %v2468_v22 = vadd.f32 %v2424_v52, %v2312_v0  ;;  %v2141_v18 = vpop.f32.mrf.mxu1 }
 0x2e8   : > { %v2181_v15 = vadd.f32 %v2141_v18, %v4291_v6 }
 0x2e9   : > { %v2608_v45 = vadd.f32 %v2564_v23, %v2468_v22 }
 0x2eb   : > { %2640 = vst.msk [vmem:[%s4329_s30 + $0xc0] sm:$0xff] %vm1041_vm5, %v2608_v45  ;;  %v2695_v39 = vsel %vm1041_vm5, %v2608_v45, 0.0  ;;  %v2741_v11 = vmul.f32 %v2608_v45, %v2608_v45  ;;  %v2273_v30 = vpop.f32.mrf.mxu2 }
 0x2ec   : > { %v2696_v8 = vadd.f32 %v2695_v39, %v2694_v29  ;;  %v2314_v14 = vadd.f32 %v2273_v30, %v2180_v17 }
 0x2ed   : > { %v2796_v56 = vsel %vm1041_vm5, %v2741_v11, 0.0  ;;  %v2566_v38 = vpop.f32.mrf.mxu0 }
 0x2ee   : > { %v2797_v37 = vadd.f32 %v2796_v56, %v2795_v34  ;;  %v2426_v13 = vpop.f32.mrf.mxu3 }
 0x2ef   : > { %v2469_v58 = vadd.f32 %v2426_v13, %v2313_v27  ;;  %v2144_v7 = vpop.f32.mrf.mxu1 }
 0x2f0   : > { %v2182_v4 = vadd.f32 %v2144_v7, %v4302_v62 }
 0x2f1   : > { %v2609_v54 = vadd.f32 %v2566_v38, %v2469_v58 }
 0x2f3   : > { %2641 = vst.msk [vmem:[%s4329_s30 + $0xc8] sm:$0xff] %vm1041_vm5, %v2609_v54  ;;  %v2697_v33 = vsel %vm1041_vm5, %v2609_v54, 0.0  ;;  %v2742_v31 = vmul.f32 %v2609_v54, %v2609_v54  ;;  %v2275_v47 = vpop.f32.mrf.mxu2 }
 0x2f4   : > { %v2698_v60 = vadd.f32 %v2697_v33, %v2696_v8  ;;  %v2315_v41 = vadd.f32 %v2275_v47, %v2181_v15 }
 0x2f5   : > { %v2798_v16 = vsel %vm1041_vm5, %v2742_v31, 0.0  ;;  %v2569_v12 = vpop.f32.mrf.mxu0 }
 0x2f6   : > { %v2799_v1 = vadd.f32 %v2798_v16, %v2797_v37  ;;  %v2429_v48 = vpop.f32.mrf.mxu3 }
 0x2f7   : > { %v2470_v40 = vadd.f32 %v2429_v48, %v2314_v14  ;;  %v2146_v25 = vpop.f32.mrf.mxu1 }
 0x2f8   : > { %v2183_v19 = vadd.f32 %v2146_v25, %v4305_v53  ;;  %v4754_v25 = vld [vmem:[#allocation2_spill] sm:$0xff] }
 0x2f9   : > { %v2610_v43 = vadd.f32 %v2569_v12, %v2470_v40  ;;  %vm2819_vm10 = vcmp.eq.s32.totalorder %v4754_v25, 1  ;;  %vm2818_vm11 = vcmp.eq.s32.totalorder %v4754_v25, 0 }
 0x2fb   : > { %2642 = vst.msk [vmem:[%s4329_s30 + $0xd0] sm:$0xff] %vm1041_vm5, %v2610_v43  ;;  %v2699_v28 = vsel %vm1041_vm5, %v2610_v43, 0.0  ;;  %v2743_v51 = vmul.f32 %v2610_v43, %v2610_v43  ;;  %v2278_v63 = vpop.f32.mrf.mxu2 }
 0x2fc   : > { %v2700_v36 = vadd.f32 %v2699_v28, %v2698_v60  ;;  %v2316_v57 = vadd.f32 %v2278_v63, %v2182_v4 }
 0x2fd   : > { %v2800_v49 = vsel %vm1041_vm5, %v2743_v51, 0.0  ;;  %v2571_v46 = vpop.f32.mrf.mxu0 }
 0x2fe   : > { %v2801_v32 = vadd.f32 %v2800_v49, %v2799_v1  ;;  %v2431_v59 = vpop.f32.mrf.mxu3 }
 0x2ff   : > { %v2471_v21 = vadd.f32 %v2431_v59, %v2315_v41  ;;  %v2149_v42 = vpop.f32.mrf.mxu1 }
 0x300   : > { %v2184_v27 = vadd.f32 %v2149_v42, %v4316_v10 }
 0x301   : > { %v2611_v3 = vadd.f32 %v2571_v46, %v2471_v21 }
 0x303   : > { %2643 = vst.msk [vmem:[%s4329_s30 + $0xd8] sm:$0xff] %vm1041_vm5, %v2611_v3  ;;  %v2701_v6 = vsel %vm1041_vm5, %v2611_v3, 0.0  ;;  %v2744_v2 = vmul.f32 %v2611_v3, %v2611_v3  ;;  %v2280_v35 = vpop.f32.mrf.mxu2 }
 0x304   : > { %v2702_v26 = vadd.f32 %v2701_v6, %v2700_v36  ;;  %v2317_v55 = vadd.f32 %v2280_v35, %v2183_v19 }
 0x305   : > { %v2802_v5 = vsel %vm1041_vm5, %v2744_v2, 0.0  ;;  %v2574_v24 = vpop.f32.mrf.mxu0 }
 0x306   : > { %v2803_v44 = vadd.f32 %v2802_v5, %v2801_v32  ;;  %v2434_v9 = vpop.f32.mrf.mxu3 }
 0x307   : > { %v2472_v61 = vadd.f32 %v2434_v9, %v2316_v57  ;;  %v2151_v37 = vpop.f32.mrf.mxu1 }
 0x308   : > { %v2185_v31 = vadd.f32 %v2151_v37, %v4319_v20 }
 0x309   : > { %v2612_v0 = vadd.f32 %v2574_v24, %v2472_v61 }
 0x30b   : > { %2644 = vst.msk [vmem:[%s4329_s30 + $0xe0] sm:$0xff] %vm1041_vm5, %v2612_v0  ;;  %v2703_v62 = vsel %vm1041_vm5, %v2612_v0, 0.0  ;;  %v2745_v29 = vmul.f32 %v2612_v0, %v2612_v0  ;;  %v2283_v52 = vpop.f32.mrf.mxu2 }
 0x30c   : > { %v2704_v34 = vadd.f32 %v2703_v62, %v2702_v26  ;;  %v2318_v30 = vadd.f32 %v2283_v52, %v2184_v27 }
 0x30d   : > { %v2804_v23 = vsel %vm1041_vm5, %v2745_v29, 0.0  ;;  %v2576_v45 = vpop.f32.mrf.mxu0 }
 0x30e   : > { %v2805_v22 = vadd.f32 %v2804_v23, %v2803_v44  ;;  %v2436_v50 = vpop.f32.mrf.mxu3 }
 0x30f   : > { %v2473_v39 = vadd.f32 %v2436_v50, %v2317_v55 }
 0x311   : > { %v2613_v11 = vadd.f32 %v2576_v45, %v2473_v39 }
 0x313   : > { %2645 = vst.msk [vmem:[%s4329_s30 + $0xe8] sm:$0xff] %vm1041_vm5, %v2613_v11  ;;  %v2705_v53 = vsel %vm1041_vm5, %v2613_v11, 0.0  ;;  %v2746_v8 = vmul.f32 %v2613_v11, %v2613_v11  ;;  %v2285_v17 = vpop.f32.mrf.mxu2 }
 0x314   : > { %v2706_v56 = vadd.f32 %v2705_v53, %v2704_v34  ;;  %v2319_v60 = vadd.f32 %v2285_v17, %v2185_v31 }
 0x315   : > { %v2806_v18 = vsel %vm1041_vm5, %v2746_v8, 0.0  ;;  %v2579_v13 = vpop.f32.mrf.mxu0 }
 0x316   : > { %v2807_v38 = vadd.f32 %v2806_v18, %v2805_v22  ;;  %v2439_v58 = vpop.f32.mrf.mxu3 }
 0x317   : > { %v2474_v54 = vadd.f32 %v2439_v58, %v2318_v30 }
 0x319   : > { %v2614_v33 = vadd.f32 %v2579_v13, %v2474_v54 }
 0x31b   : > { %2646 = vst.msk [vmem:[%s4329_s30 + $0xf0] sm:$0xff] %vm1041_vm5, %v2614_v33  ;;  %v2707_v10 = vsel %vm1041_vm5, %v2614_v33, 0.0  ;;  %v2747_v14 = vmul.f32 %v2614_v33, %v2614_v33 }
 0x31c   : > { %v2708_v47 = vadd.f32 %v2707_v10, %v2706_v56 }
 0x31d   : > { %v2808_v16 = vsel %vm1041_vm5, %v2747_v14, 0.0  ;;  %v2581_v40 = vpop.f32.mrf.mxu0 }
 0x31e   : > { %v2809_v1 = vadd.f32 %v2808_v16, %v2807_v38  ;;  %v2441_v12 = vpop.f32.mrf.mxu3 }
 0x31f   : > { %v2475_v48 = vadd.f32 %v2441_v12, %v2319_v60 }
 0x321   : > { %v2615_v7 = vadd.f32 %v2581_v40, %v2475_v48 }
 0x323   : > { %2647 = vst.msk [vmem:[%s4329_s30 + $0xf8] sm:$0xff] %vm1041_vm5, %v2615_v7  ;;  %v2709_v43 = vsel %vm1041_vm5, %v2615_v7, 0.0  ;;  %v2748_v20 = vmul.f32 %v2615_v7, %v2615_v7 }
 0x324   : > { %v2710_v15 = vadd.f32 %v2709_v43, %v2708_v47 }
 0x325   : > { %v2810_v28 = vsel %vm1041_vm5, %v2748_v20, 0.0 }
 0x326   : > { %v2711_v51 = vrot.slane %v2710_v15, 4  ;;  %v2811_v41 = vadd.f32 %v2810_v28, %v2809_v1 }
 0x328   : > { %v2712_v36 = vadd.f32 %v2711_v51, %v2710_v15  ;;  %v2812_v63 = vrot.slane %v2811_v41, 4 }
 0x32a   : > { %v2713_v49 = vrot.slane %v2712_v36, 2  ;;  %v2813_v32 = vadd.f32 %v2812_v63, %v2811_v41 }
 0x32c   : > { %v2714_v46 = vadd.f32 %v2713_v49, %v2712_v36  ;;  %v2814_v59 = vrot.slane %v2813_v32, 2 }
 0x32e   : > { %v2815_v21 = vadd.f32 %v2814_v59, %v2813_v32  ;;  %v2715_v3 = vrot.slane %v2714_v46, 1 }
 0x330   : > { %v2816_v4 = vrot.slane %v2815_v21, 1  ;;  %v2716_v2 = vadd.f32 %v2715_v3, %v2714_v46 }
 0x332   : > { %v2817_v6 = vadd.f32 %v2816_v4, %v2815_v21 }
 0x334   : > { %v2820_v57 = vsel %vm2819_vm10, %v2817_v6, 0.0 }
 0x335   : > { %v2821_v26 = vsel %vm2818_vm11, %v2716_v2, %v2820_v57 }
 0x336   : > { %2822 = vst.msk [vmem:[%s235_s9] sm:$0xff] %vm1041_vm5, %v2821_v26 }
 0x337 PF: > { %s16_s18 = sadd.s32 1, %s3115_s18  }
 0x338   : > { %p13_p4 = scmp.ge.s32.totalorder %s16_s18, 4  }
 0x33a   :  { %15 = sbr.rel (!%p13_p4) target bundleno = 1 (0x1), region = 86 }

// kernel: basic_block_forward.3
= control target key start
LH: loop header
LB: loop body
LE: loop exit
PB: predicated region body
PF: predicated region fallthrough
CT: control target
= control target key end

     0   :  { %s2865_s12 = smov 0   ;;  %s4066_s0 = inlined_call_operand.vmem [shape: bf16[2,18,18,8], index: 0, kind: input, shape index: {}]   ;;  %s4067_s1 = inlined_call_operand.vmem [shape: bf16[9,8,8], index: 1, kind: input, shape index: {}]   ;;  %s4068_s2 = inlined_call_operand.vmem [shape: f32[2,16,16,8], index: 2, kind: output, shape index: {0}]   ;;  %s4069_s3 = inlined_call_operand.vmem [shape: f32[2,8,8], index: 3, kind: output, shape index: {1}]  }
   0x1 LB: > { %s2545_s13 = sadd.s32 4294967295, %s2843_s12   ;;  %p2549_p0 = scmp.ge.s32.totalorder %s2843_s12, 1  ;;  %s2843_s12 = sphi %s2865_s12, %s14_s12  }
   0x2   : > { %p140_p1 = scmp.lt.s32.totalorder %s2843_s12, 3 }
   0x4   : > { %p141_p2 = pnand %p2549_p0, %p140_p1 }
   0x6   : > { %144 = sbr.rel (%p141_p2) target bundleno = 773 (0x305), region = 28 }
   0xb   : > { %v2554_v0 = vld [vmem:[%s4067_s1 + $0x4] sm:$0xf]  ;;  %vm724_vm0 = vcmask 1043456   ;;  %p168_p3 = scmp.lt.s32.totalorder %s2545_s13, 1  ;;  %v2667_v2 = vld [vmem:[%s4067_s1 + $0x8] sm:$0xf] }
   0xc   : > { %v726_v1 = vsel %vm724_vm0, %v2554_v0, 0  ;;  %v1267_v3 = vsel %vm724_vm0, %v2667_v2, 0  ;;  %v2684_v4 = vld [vmem:[%s4067_s1 + $0xc] sm:$0xf]  ;;  %v237_v5 = vld [vmem:[%s4067_s1] sm:$0xf] }
   0xd   : > { %2817 = vmatpush.bf16.msra.mxu1 %v726_v1  ;;  %2818 = vmatpush.bf16.msra.mxu2 %v726_v1  ;;  %s4209_s13 = smov (!%p168_p3, %s2545_s13), 1  ;;  %v2705_v6 = vld [vmem:[%s4067_s1 + $0x10] sm:$0xf]  ;;  %v1401_v7 = vsel %vm724_vm0, %v2684_v4, 0  ;;  %v946_v8 = vsel %vm724_vm0, %v237_v5, 0  ;;  %vm675_vm4 = vcmask 64512  }
   0xe   : > { %2819 = vmatpush.bf16.msra.mxu3 %v726_v1  ;;  %735 = vmatpush.bf16.msra.mxu0 %v726_v1  ;;  %s2820_s24 = smul.u32 216, %s4209_s13  ;;  %v1557_v9 = vsel %vm724_vm0, %v2705_v6, 0  ;;  %vm238_vm1 = vsmask.f32 3328  ;;  %vm239_vm2 = vsmask.f32 7440 }
   0xf   : > { %vm2926_vm3 = vmor %vm238_vm1, %vm239_vm2  ;;  %vm1053_vm5 = vcmask 1042432   ;;  %vm1054_vm6 = vcmask 1046532   ;;  %s2798_s9 = sshll.u32 %s4209_s13, 8  ;;  %s2553_s15 = sshll.u32 %s4209_s13, 3 }
  0x10   : > { %s2899_s27 = scalar_lea.vmem %s4066_s0, %s2820_s24  ;;  %vm3229_vm7 = vmor %vm1053_vm5, %vm1054_vm6  ;;  %s3817_s14 = scalar_lea.vmem %s4068_s2, %s2798_s9 }
  0x11   : > { %1276 = vmatpush.bf16.msrb.mxu2 %v1267_v3  ;;  %955 = vmatpush.bf16.msrb.mxu1 %v946_v8  ;;  %v2902_v10 = vld [vmem:[%s2899_s27 + $0x30] sm:$0xf]  ;;  %v2905_v11 = vld [vmem:[%s2899_s27 + $0x34] sm:$0xf]  ;;  %v2908_v12 = vld [vmem:[%s2899_s27 + $0x38] sm:$0x1]  ;;  %s181_s18 = scalar_lea.vmem %s4069_s3, %s2553_s15 }
  0x12   : > { %1410 = vmatpush.bf16.msrb.mxu3 %v1401_v7  ;;  %1566 = vmatpush.bf16.msrb.mxu0 %v1557_v9  ;;  %v338_v13 = vshrl.u32 %v2902_v10, 16  ;;  %v341_v14 = vshll.u32 %v2902_v10, 16  ;;  %v347_v15 = vshll.u32 %v2905_v11, 16  ;;  %v351_v16 = vshrl.u32 %v2905_v11, 16  ;;  %v207_v17 = vld [vmem:[%s2899_s27 + $0x60] sm:$0xf] }
  0x13   : > { %v357_v18 = vshll.u32 %v2908_v12, 16  ;;  %v2917_v19 = vld [vmem:[%s2899_s27 + $0x64] sm:$0xf]  ;;  %v209_v20 = vld [vmem:[%s2899_s27 + $0x68] sm:$0x1]  ;;  %v434_v21 = vshrl.u32 %v207_v17, 16 }
  0x14   : > { %v340_v22 = vrot.slane %v338_v13, 4  ;;  %v343_v23 = vrot.slane %v341_v14, 5  ;;  %v349_v24 = vrot.slane %v347_v15, 5  ;;  %v353_v25 = vrot.slane %v351_v16, 4  ;;  %v219_v26 = vld [vmem:[%s2899_s27 + $0x90] sm:$0xf] }
  0x15   : > { %v359_v27 = vrot.slane %v357_v18, 5  ;;  %v436_v28 = vrot.slane %v434_v21, 4  ;;  %v437_v29 = vshll.u32 %v207_v17, 16  ;;  %v443_v30 = vshll.u32 %v2917_v19, 16  ;;  %v220_v35 = vld [vmem:[%s2899_s27 + $0x94] sm:$0xf] }
  0x16   : > { %v344_v31 = vor.u32 %v343_v23, %v340_v22  ;;  %v354_v32 = vor.u32 %v353_v25, %v349_v24  ;;  %v447_v33 = vshrl.u32 %v2917_v19, 16  ;;  %v453_v34 = vshll.u32 %v209_v20, 16  ;;  %v221_v45 = vld [vmem:[%s2899_s27 + $0x98] sm:$0x1]  ;;  %v2936_v61 = vld [vmem:[%s2899_s27] sm:$0xf] }
  0x17   : > { %v439_v37 = vrot.slane %v437_v29, 5  ;;  %v445_v38 = vrot.slane %v443_v30, 5  ;;  %v530_v39 = vshrl.u32 %v219_v26, 16  ;;  %v533_v47 = vshll.u32 %v219_v26, 16  ;;  %v2943_v1 = vld [vmem:[%s2899_s27 + $0x4] sm:$0xf] }
  0x18   : > { %v345_v40 = vrot.slane %v344_v31, 4  ;;  %v355_v41 = vrot.slane %v354_v32, 4  ;;  %v449_v42 = vrot.slane %v447_v33, 4  ;;  %v455_v43 = vrot.slane %v453_v34, 5  ;;  %v2946_v2 = vld [vmem:[%s2899_s27 + $0x8] sm:$0x1] }
  0x19   : > { %v440_v44 = vor.u32 %v439_v37, %v436_v28  ;;  %v532_v46 = vrot.slane %v530_v39, 4  ;;  %v539_v48 = vshll.u32 %v220_v35, 16  ;;  %v543_v52 = vshrl.u32 %v220_v35, 16  ;;  %v2962_v23 = vld [vmem:[%s2899_s27 + $0x3c] sm:$0xf] }
  0x1a   : > { %v350_v49 = vsel %vm2926_vm3, %v345_v40, %v349_v24  ;;  %v360_v50 = vsel %vm2926_vm3, %v355_v41, %v359_v27  ;;  %v450_v51 = vor.u32 %v449_v42, %v445_v38  ;;  %v535_v56 = vrot.slane %v533_v47, 5  ;;  %v2965_v24 = vld [vmem:[%s2899_s27 + $0x40] sm:$0xf]  ;;  %v2970_v29 = vld [vmem:[%s2899_s27 + $0x44] sm:$0x1] }
  0x1b   : > { %v635_v53 = vunpack.c.l.b16 %v350_v49  ;;  %v636_v54 = vunpack.c.l.b16 %v360_v50  ;;  %v441_v55 = vrot.slane %v440_v44, 4  ;;  %v541_v58 = vrot.slane %v539_v48, 5  ;;  %v2985_v47 = vld [vmem:[%s2899_s27 + $0x70] sm:$0xf] }
  0x1c   : > { %v451_v57 = vrot.slane %v450_v51, 4  ;;  %v545_v59 = vrot.slane %v543_v52, 4  ;;  %v549_v60 = vshll.u32 %v221_v45, 16  ;;  %v536_v0 = vor.u32 %v535_v56, %v532_v46  ;;  %v2992_v51 = vld [vmem:[%s2899_s27 + $0x74] sm:$0x1] }
  0x1d   : > { %v2938_v62 = vpack.c.b16 %v636_v54, %v635_v53  ;;  %v446_v63 = vsel %vm2926_vm3, %v441_v55, %v445_v38  ;;  %v242_v9 = vshrl.u32 %v2936_v61, 16  ;;  %v245_v13 = vshll.u32 %v2936_v61, 16  ;;  %v2978_v38 = vld [vmem:[%s2899_s27 + $0x6c] sm:$0xf] }
  0x1e   : > { %v456_v3 = vsel %vm2926_vm3, %v451_v57, %v455_v43  ;;  %v643_v4 = vunpack.c.l.b16 %v446_v63  ;;  %v546_v5 = vor.u32 %v545_v59, %v541_v58  ;;  %v551_v6 = vrot.slane %v549_v60, 5 }
  0x1f   : > { %2559 = vmatmul.msk.bf16.vlgmr.msra.gmra.mxu1 %vm675_vm4, %v2938_v62  ;;  %v644_v7 = vunpack.c.l.b16 %v456_v3  ;;  %v537_v8 = vrot.slane %v536_v0, 4  ;;  %v251_v15 = vshll.u32 %v2943_v1, 16  ;;  %v255_v16 = vshrl.u32 %v2943_v1, 16 }
  0x20   : > { %v547_v14 = vrot.slane %v546_v5, 4  ;;  %v261_v17 = vshll.u32 %v2946_v2, 16  ;;  %v244_v21 = vrot.slane %v242_v9, 4  ;;  %v247_v22 = vrot.slane %v245_v13, 5  ;;  %v222_v5 = vld [vmem:[%s2899_s27 + $0x9c] sm:$0xf] }
  0x21   : > { %v2957_v18 = vpack.c.b16 %v644_v7, %v643_v4  ;;  %v542_v20 = vsel %vm2926_vm3, %v537_v8, %v541_v58  ;;  %v253_v27 = vrot.slane %v251_v15, 5  ;;  %v257_v28 = vrot.slane %v255_v16, 4  ;;  %v223_v9 = vld [vmem:[%s2899_s27 + $0xa0] sm:$0xf] }
  0x22   : > { %v552_v25 = vsel %vm2926_vm3, %v547_v14, %v551_v6  ;;  %v651_v26 = vunpack.c.l.b16 %v542_v20  ;;  %v248_v31 = vor.u32 %v247_v22, %v244_v21  ;;  %v263_v32 = vrot.slane %v261_v17, 5  ;;  %v224_v17 = vld [vmem:[%s2899_s27 + $0xa4] sm:$0x1] }
  0x23   : > { %4112 = vst [vmem:[#allocation2_spill] sm:$0xff] %v2957_v18  ;;  %2563 = vmatmul.msk.bf16.vlgmr.msra.gmra.mxu2 %vm675_vm4, %v2957_v18  ;;  %v652_v30 = vunpack.c.l.b16 %v552_v25  ;;  %v258_v33 = vor.u32 %v257_v28, %v253_v27  ;;  %v362_v34 = vshrl.u32 %v2962_v23, 16  ;;  %v365_v35 = vshll.u32 %v2962_v23, 16 }
  0x24   : > { %v371_v37 = vshll.u32 %v2965_v24, 16  ;;  %v249_v40 = vrot.slane %v248_v31, 4  ;;  %v375_v41 = vshrl.u32 %v2965_v24, 16  ;;  %v381_v42 = vshll.u32 %v2970_v29, 16 }
  0x25   : > { %v2980_v39 = vpack.c.b16 %v652_v30, %v651_v26  ;;  %v259_v43 = vrot.slane %v258_v33, 4  ;;  %v364_v44 = vrot.slane %v362_v34, 4  ;;  %v367_v45 = vrot.slane %v365_v35, 5  ;;  %v3010_v35 = vld [vmem:[%s2899_s27 + $0xc] sm:$0xf] }
  0x26   : > { %v373_v46 = vrot.slane %v371_v37, 5  ;;  %v254_v48 = vsel %vm2926_vm3, %v249_v40, %v253_v27  ;;  %v377_v49 = vrot.slane %v375_v41, 4  ;;  %v383_v50 = vrot.slane %v381_v42, 5 }
  0x27   : > { %4113 = vst [vmem:[#allocation3_spill] sm:$0xff] %v2980_v39  ;;  %2567 = vmatmul.msk.bf16.vlgmr.msra.gmra.mxu3 %vm675_vm4, %v2980_v39  ;;  %v458_v52 = vshrl.u32 %v2978_v38, 16  ;;  %v264_v53 = vsel %vm2926_vm3, %v259_v43, %v263_v32  ;;  %v627_v54 = vunpack.c.l.b16 %v254_v48  ;;  %v368_v55 = vor.u32 %v367_v45, %v364_v44  ;;  %v3017_v43 = vld [vmem:[%s2899_s27 + $0x10] sm:$0xf]  ;;  %v3020_v48 = vld [vmem:[%s2899_s27 + $0x14] sm:$0x1] }
  0x28   : > { %v461_v56 = vshll.u32 %v2978_v38, 16  ;;  %v628_v57 = vunpack.c.l.b16 %v264_v53  ;;  %v378_v58 = vor.u32 %v377_v49, %v373_v46  ;;  %v467_v60 = vshll.u32 %v2985_v47, 16  ;;  %v3197_v39 = vld [vmem:[%s2899_s27 + $0x2c] sm:$0x1] }
  0x29   : > { %v460_v59 = vrot.slane %v458_v52, 4  ;;  %v369_v63 = vrot.slane %v368_v55, 4  ;;  %v471_v3 = vshrl.u32 %v2985_v47, 16  ;;  %v477_v4 = vshll.u32 %v2992_v51, 16 }
  0x2a   : > { %v463_v0 = vrot.slane %v461_v56, 5  ;;  %v659_v6 = vpack.c.b16 %v628_v57, %v627_v54  ;;  %v379_v7 = vrot.slane %v378_v58, 4  ;;  %v469_v8 = vrot.slane %v467_v60, 5  ;;  %v3030_v58 = vld [vmem:[%s2899_s27 + $0x48] sm:$0xf] }
  0x2b   : > { %v374_v13 = vsel %vm2926_vm3, %v369_v63, %v373_v46  ;;  %v473_v15 = vrot.slane %v471_v3, 4  ;;  %v479_v16 = vrot.slane %v477_v4, 5  ;;  %v554_v22 = vshrl.u32 %v222_v5, 16  ;;  %v3035_v3 = vld [vmem:[%s2899_s27 + $0x4c] sm:$0xf] }
  0x2c   : > { %v464_v14 = vor.u32 %v463_v0, %v460_v59  ;;  %2555 = vmatmul.msk.bf16.vlgmr.msra.gmra.mxu0 %vm675_vm4, %v659_v6  ;;  %v384_v20 = vsel %vm2926_vm3, %v379_v7, %v383_v50  ;;  %v637_v21 = vunpack.c.l.b16 %v374_v13  ;;  %v557_v25 = vshll.u32 %v222_v5, 16 }
  0x2d   : > { %v638_v26 = vunpack.c.l.b16 %v384_v20  ;;  %v474_v28 = vor.u32 %v473_v15, %v469_v8  ;;  %v563_v30 = vshll.u32 %v223_v9, 16  ;;  %v556_v31 = vrot.slane %v554_v22, 4  ;;  %v3042_v15 = vld [vmem:[%s2899_s27 + $0x50] sm:$0x1] }
  0x2e   : > { %v465_v27 = vrot.slane %v464_v14, 4  ;;  %v559_v32 = vrot.slane %v557_v25, 5  ;;  %v567_v33 = vshrl.u32 %v223_v9, 16  ;;  %v573_v34 = vshll.u32 %v224_v17, 16 }
  0x2f   : > { %v3012_v37 = vpack.c.b16 %v638_v26, %v637_v21  ;;  %v475_v41 = vrot.slane %v474_v28, 4  ;;  %v565_v42 = vrot.slane %v563_v30, 5  ;;  %v266_v52 = vshrl.u32 %v3010_v35, 16  ;;  %v3053_v28 = vld [vmem:[%s2899_s27 + $0x78] sm:$0xf] }
  0x30   : > { %v470_v40 = vsel %vm2926_vm3, %v465_v27, %v469_v8  ;;  %v560_v45 = vor.u32 %v559_v32, %v556_v31  ;;  %v569_v46 = vrot.slane %v567_v33, 4  ;;  %v575_v50 = vrot.slane %v573_v34, 5  ;;  %v3057_v34 = vld [vmem:[%s2899_s27 + $0x7c] sm:$0xf] }
  0x31   : > { %v645_v44 = vunpack.c.l.b16 %v470_v40  ;;  %2560 = vmatmul.msk.bf16.gmra.mxu1 %vm675_vm4, %v3012_v37  ;;  %v480_v49 = vsel %vm2926_vm3, %v475_v41, %v479_v16  ;;  %v269_v53 = vshll.u32 %v3010_v35, 16  ;;  %v275_v57 = vshll.u32 %v3017_v43, 16 }
  0x32   : > { %v646_v54 = vunpack.c.l.b16 %v480_v49  ;;  %v561_v55 = vrot.slane %v560_v45, 4  ;;  %v570_v56 = vor.u32 %v569_v46, %v565_v42  ;;  %v268_v59 = vrot.slane %v266_v52, 4 }
  0x33   : > { %v271_v60 = vrot.slane %v269_v53, 5  ;;  %v279_v63 = vshrl.u32 %v3017_v43, 16  ;;  %v285_v0 = vshll.u32 %v3020_v48, 16  ;;  %v277_v7 = vrot.slane %v275_v57, 5 }
  0x34   : > { %v3037_v4 = vpack.c.b16 %v646_v54, %v645_v44  ;;  %v566_v5 = vsel %vm2926_vm3, %v561_v55, %v565_v42  ;;  %v571_v6 = vrot.slane %v570_v56, 4  ;;  %v386_v17 = vshrl.u32 %v3030_v58, 16 }
  0x35   : > { %v653_v8 = vunpack.c.l.b16 %v566_v5  ;;  %v272_v9 = vor.u32 %v271_v60, %v268_v59  ;;  %v281_v13 = vrot.slane %v279_v63, 4  ;;  %v287_v14 = vrot.slane %v285_v0, 5 }
  0x36   : > { %2564 = vmatmul.msk.bf16.gmra.mxu2 %vm675_vm4, %v3037_v4  ;;  %v576_v16 = vsel %vm2926_vm3, %v571_v6, %v575_v50  ;;  %v389_v20 = vshll.u32 %v3030_v58, 16  ;;  %v395_v21 = vshll.u32 %v3035_v3, 16  ;;  %v399_v27 = vshrl.u32 %v3035_v3, 16  ;;  %v3064_v50 = vld [vmem:[%s2899_s27 + $0x80] sm:$0x1] }
  0x37   : > { %v654_v22 = vunpack.c.l.b16 %v576_v16  ;;  %v273_v25 = vrot.slane %v272_v9, 4  ;;  %v282_v26 = vor.u32 %v281_v13, %v277_v7  ;;  %v388_v30 = vrot.slane %v386_v17, 4  ;;  %v3083_v16 = vld [vmem:[%s2899_s27 + $0xac] sm:$0xf]  ;;  %v3086_v17 = vld [vmem:[%s2899_s27 + $0xb0] sm:$0x1] }
  0x38   : > { %v391_v31 = vrot.slane %v389_v20, 5  ;;  %v397_v32 = vrot.slane %v395_v21, 5  ;;  %v405_v33 = vshll.u32 %v3042_v15, 16  ;;  %v401_v44 = vrot.slane %v399_v27, 4  ;;  %4116 = vst [vmem:[#allocation6_spill] sm:$0xff] %v3083_v16 }
  0x39   : > { %v3059_v40 = vpack.c.b16 %v654_v22, %v653_v8  ;;  %v278_v41 = vsel %vm2926_vm3, %v273_v25, %v277_v7  ;;  %v283_v42 = vrot.slane %v282_v26, 4  ;;  %v482_v52 = vshrl.u32 %v3053_v28, 16  ;;  %v3076_v8 = vld [vmem:[%s2899_s27 + $0xa8] sm:$0xf]  ;;  %4117 = vst [vmem:[#allocation7_spill] sm:$0xff] %v3086_v17 }
  0x3a   : > { %v629_v45 = vunpack.c.l.b16 %v278_v41  ;;  %v392_v46 = vor.u32 %v391_v31, %v388_v30  ;;  %v407_v49 = vrot.slane %v405_v33, 5  ;;  %v402_v54 = vor.u32 %v401_v44, %v397_v32  ;;  %4115 = vst [vmem:[#allocation5_spill] sm:$0xff] %v3076_v8 }
  0x3b   : > { %4114 = vst [vmem:[#allocation4_spill] sm:$0xff] %v3059_v40  ;;  %2568 = vmatmul.msk.bf16.gmra.mxu3 %vm675_vm4, %v3059_v40  ;;  %v288_v53 = vsel %vm2926_vm3, %v283_v42, %v287_v14  ;;  %v485_v55 = vshll.u32 %v3053_v28, 16  ;;  %v491_v56 = vshll.u32 %v3057_v34, 16  ;;  %v484_v60 = vrot.slane %v482_v52, 4  ;;  %v3100_v52 = vld [vmem:[%s2899_s27 + $0x18] sm:$0xf] }
  0x3c   : > { %v630_v57 = vunpack.c.l.b16 %v288_v53  ;;  %v393_v59 = vrot.slane %v392_v46, 4  ;;  %v495_v63 = vshrl.u32 %v3057_v34, 16  ;;  %v403_v0 = vrot.slane %v402_v54, 4  ;;  %v3186_v40 = vld [vmem:[%s2899_s27 + $0x24] sm:$0xf] }
  0x3d   : > { %v487_v5 = vrot.slane %v485_v55, 5  ;;  %v493_v6 = vrot.slane %v491_v56, 5  ;;  %v501_v7 = vshll.u32 %v3064_v50, 16  ;;  %v578_v30 = vshrl.u32 %v3076_v8, 16  ;;  %v3105_v56 = vld [vmem:[%s2899_s27 + $0x1c] sm:$0xf] }
  0x3e   : > { %v3078_v9 = vpack.c.b16 %v630_v57, %v629_v45  ;;  %v398_v13 = vsel %vm2926_vm3, %v393_v59, %v397_v32  ;;  %v497_v14 = vrot.slane %v495_v63, 4  ;;  %v408_v20 = vsel %vm2926_vm3, %v403_v0, %v407_v49  ;;  %v3108_v57 = vld [vmem:[%s2899_s27 + $0x20] sm:$0x1] }
  0x3f   : > { %v639_v21 = vunpack.c.l.b16 %v398_v13  ;;  %v488_v22 = vor.u32 %v487_v5, %v484_v60  ;;  %v503_v25 = vrot.slane %v501_v7, 5  ;;  %v640_v26 = vunpack.c.l.b16 %v408_v20 }
  0x40   : > { %2556 = vmatmul.msk.bf16.gmra.mxu0 %vm675_vm4, %v3078_v9  ;;  %v498_v27 = vor.u32 %v497_v14, %v493_v6  ;;  %v581_v31 = vshll.u32 %v3076_v8, 16  ;;  %v587_v33 = vshll.u32 %v3083_v16, 16  ;;  %v591_v41 = vshrl.u32 %v3083_v16, 16 }
  0x41   : > { %v489_v32 = vrot.slane %v488_v22, 4  ;;  %v597_v42 = vshll.u32 %v3086_v17, 16  ;;  %v3097_v44 = vpack.c.b16 %v640_v26, %v639_v21  ;;  %v580_v46 = vrot.slane %v578_v30, 4  ;;  %v3120_v26 = vld [vmem:[%s2899_s27 + $0x54] sm:$0xf] }
  0x42   : > { %v499_v45 = vrot.slane %v498_v27, 4  ;;  %v583_v49 = vrot.slane %v581_v31, 5  ;;  %v589_v54 = vrot.slane %v587_v33, 5  ;;  %v593_v55 = vrot.slane %v591_v41, 4  ;;  %v3164_v17 = vld [vmem:[%s2899_s27 + $0xb4] sm:$0xf] }
  0x43   : > { %4118 = vst [vmem:[#allocation8_spill] sm:$0xff] %v3097_v44  ;;  %v494_v53 = vsel %vm2926_vm3, %v489_v32, %v493_v6  ;;  %2561 = vmatmul.msk.bf16.gmra.mxu1 %vm675_vm4, %v3097_v44  ;;  %v599_v0 = vrot.slane %v597_v42, 5  ;;  %v290_v6 = vshrl.u32 %v3100_v52, 16  ;;  %v293_v13 = vshll.u32 %v3100_v52, 16  ;;  %v3125_v32 = vld [vmem:[%s2899_s27 + $0x58] sm:$0xf] }
  0x44   : > { %v504_v59 = vsel %vm2926_vm3, %v499_v45, %v503_v25  ;;  %v647_v60 = vunpack.c.l.b16 %v494_v53  ;;  %v584_v63 = vor.u32 %v583_v49, %v580_v46  ;;  %v594_v7 = vor.u32 %v593_v55, %v589_v54  ;;  %v3130_v46 = vld [vmem:[%s2899_s27 + $0x5c] sm:$0x1]  ;;  %4121 = vst [vmem:[#allocation11_spill] sm:$0xff] %v3164_v17 }
  0x45   : > { %v648_v5 = vunpack.c.l.b16 %v504_v59  ;;  %v299_v20 = vshll.u32 %v3105_v56, 16  ;;  %v303_v21 = vshrl.u32 %v3105_v56, 16  ;;  %v309_v22 = vshll.u32 %v3108_v57, 16 }
  0x46   : > { %v585_v14 = vrot.slane %v584_v63, 4  ;;  %v595_v27 = vrot.slane %v594_v7, 4  ;;  %v292_v30 = vrot.slane %v290_v6, 4  ;;  %v295_v31 = vrot.slane %v293_v13, 5  ;;  %v3140_v7 = vld [vmem:[%s2899_s27 + $0x84] sm:$0xf] }
  0x47   : > { %v3122_v25 = vpack.c.b16 %v648_v5, %v647_v60  ;;  %v301_v41 = vrot.slane %v299_v20, 5  ;;  %v305_v42 = vrot.slane %v303_v21, 4  ;;  %v311_v45 = vrot.slane %v309_v22, 5  ;;  %4119 = vst [vmem:[#allocation9_spill] sm:$0xff] %v3140_v7 }
  0x48   : > { %v590_v33 = vsel %vm2926_vm3, %v585_v14, %v589_v54  ;;  %v600_v49 = vsel %vm2926_vm3, %v595_v27, %v599_v0  ;;  %v296_v55 = vor.u32 %v295_v31, %v292_v30  ;;  %v410_v59 = vshrl.u32 %v3120_v26, 16  ;;  %v3147_v30 = vld [vmem:[%s2899_s27 + $0x88] sm:$0xf] }
  0x49   : > { %2565 = vmatmul.msk.bf16.gmra.mxu2 %vm675_vm4, %v3122_v25  ;;  %v655_v53 = vunpack.c.l.b16 %v590_v33  ;;  %v656_v60 = vunpack.c.l.b16 %v600_v49  ;;  %v306_v63 = vor.u32 %v305_v42, %v301_v41  ;;  %v413_v54 = vshll.u32 %v3120_v26, 16  ;;  %v3152_v49 = vld [vmem:[%s2899_s27 + $0x8c] sm:$0x1] }
  0x4a   : > { %v419_v5 = vshll.u32 %v3125_v32, 16  ;;  %v297_v6 = vrot.slane %v296_v55, 4  ;;  %v412_v13 = vrot.slane %v410_v59, 4  ;;  %v423_v14 = vshrl.u32 %v3125_v32, 16 }
  0x4b   : > { %v429_v0 = vshll.u32 %v3130_v46, 16  ;;  %v3144_v20 = vpack.c.b16 %v656_v60, %v655_v53  ;;  %v307_v21 = vrot.slane %v306_v63, 4  ;;  %v415_v22 = vrot.slane %v413_v54, 5 }
  0x4c   : > { %v421_v27 = vrot.slane %v419_v5, 5  ;;  %v302_v31 = vsel %vm2926_vm3, %v297_v6, %v301_v41  ;;  %v425_v33 = vrot.slane %v423_v14, 4  ;;  %v506_v55 = vshrl.u32 %v3140_v7, 16 }
  0x4d   : > { %4120 = vst [vmem:[#allocation10_spill] sm:$0xff] %v3144_v20  ;;  %v431_v42 = vrot.slane %v429_v0, 5  ;;  %2569 = vmatmul.msk.bf16.gmra.mxu3 %vm675_vm4, %v3144_v20  ;;  %v312_v53 = vsel %vm2926_vm3, %v307_v21, %v311_v45  ;;  %v631_v59 = vunpack.c.l.b16 %v302_v31  ;;  %v416_v60 = vor.u32 %v415_v22, %v412_v13  ;;  %v3169_v22 = vld [vmem:[%s2899_s27 + $0xb8] sm:$0xf] }
  0x4e   : > { %v509_v63 = vshll.u32 %v3140_v7, 16  ;;  %v632_v54 = vunpack.c.l.b16 %v312_v53  ;;  %v426_v41 = vor.u32 %v425_v33, %v421_v27  ;;  %v508_v5 = vrot.slane %v506_v55, 4  ;;  %4122 = vst [vmem:[#allocation12_spill] sm:$0xff] %v3169_v22 }
  0x4f   : > { %v515_v6 = vshll.u32 %v3147_v30, 16  ;;  %v417_v14 = vrot.slane %v416_v60, 4  ;;  %v519_v8 = vshrl.u32 %v3147_v30, 16  ;;  %v525_v20 = vshll.u32 %v3152_v49, 16  ;;  %v3174_v60 = vld [vmem:[%s2899_s27 + $0xbc] sm:$0x1] }
  0x50   : > { %v511_v0 = vrot.slane %v509_v63, 5  ;;  %v3166_v45 = vpack.c.b16 %v632_v54, %v631_v59  ;;  %v427_v21 = vrot.slane %v426_v41, 4  ;;  %4123 = vst [vmem:[#allocation13_spill] sm:$0xff] %v3174_v60  ;;  %v602_v54 = vshrl.u32 %v3164_v17, 16 }
  0x51   : > { %v517_v13 = vrot.slane %v515_v6, 5  ;;  %v422_v31 = vsel %vm2926_vm3, %v417_v14, %v421_v27  ;;  %v521_v55 = vrot.slane %v519_v8, 4  ;;  %v527_v53 = vrot.slane %v525_v20, 5 }
  0x52   : > { %v512_v33 = vor.u32 %v511_v0, %v508_v5  ;;  %2557 = vmatmul.msk.bf16.gmra.mxu0 %vm675_vm4, %v3166_v45  ;;  %v432_v59 = vsel %vm2926_vm3, %v427_v21, %v431_v42  ;;  %v641_v63 = vunpack.c.l.b16 %v422_v31  ;;  %v605_v41 = vshll.u32 %v3164_v17, 16 }
  0x53   : > { %v642_v6 = vunpack.c.l.b16 %v432_v59  ;;  %v522_v5 = vor.u32 %v521_v55, %v517_v13  ;;  %v611_v8 = vshll.u32 %v3169_v22, 16  ;;  %v604_v20 = vrot.slane %v602_v54, 4 }
  0x54   : > { %v513_v27 = vrot.slane %v512_v33, 4  ;;  %v607_v14 = vrot.slane %v605_v41, 5  ;;  %v615_v0 = vshrl.u32 %v3169_v22, 16  ;;  %v621_v16 = vshll.u32 %v3174_v60, 16  ;;  %v3193_v33 = vld [vmem:[%s2899_s27 + $0x28] sm:$0xf] }
  0x55   : > { %v3188_v42 = vpack.c.b16 %v642_v6, %v641_v63  ;;  %v523_v31 = vrot.slane %v522_v5, 4  ;;  %v613_v59 = vrot.slane %v611_v8, 5  ;;  %v1061_v55 = vrot.slane %v2946_v2, 5 }
  0x56   : > { %v518_v21 = vsel %vm2926_vm3, %v513_v27, %v517_v13  ;;  %v608_v54 = vor.u32 %v607_v14, %v604_v20  ;;  %v617_v41 = vrot.slane %v615_v0, 4  ;;  %v623_v6 = vrot.slane %v621_v16, 5 }
  0x57   : > { %4124 = vst [vmem:[#allocation14_spill] sm:$0xff] %v3188_v42  ;;  %v649_v17 = vunpack.c.l.b16 %v518_v21  ;;  %2562 = vmatmul.msk.bf16.gmra.mxu1 %vm675_vm4, %v3188_v42  ;;  %v528_v63 = vsel %vm2926_vm3, %v523_v31, %v527_v53  ;;  %v314_v13 = vshrl.u32 %v3186_v40, 16  ;;  %v317_v27 = vshll.u32 %v3186_v40, 16 }
  0x58   : > { %v650_v5 = vunpack.c.l.b16 %v528_v63  ;;  %v609_v8 = vrot.slane %v608_v54, 4  ;;  %v618_v60 = vor.u32 %v617_v41, %v613_v59  ;;  %v323_v2 = vshll.u32 %v3193_v33, 16  ;;  %v2740_v54 = vld [vmem:[%s4067_s1 + $0x18] sm:$0xf]  ;;  %v2761_v41 = vld [vmem:[%s4067_s1 + $0x1c] sm:$0xf] }
  0x59   : > { %v316_v20 = vrot.slane %v314_v13, 4  ;;  %v319_v14 = vrot.slane %v317_v27, 5  ;;  %v327_v0 = vshrl.u32 %v3193_v33, 16  ;;  %v333_v21 = vshll.u32 %v3197_v39, 16 }
  0x5a   : > { %v3208_v22 = vpack.c.b16 %v650_v5, %v649_v17  ;;  %v614_v16 = vsel %vm2926_vm3, %v609_v8, %v613_v59  ;;  %v619_v53 = vrot.slane %v618_v60, 4  ;;  %v325_v31 = vrot.slane %v323_v2, 5  ;;  %v2723_v17 = vld [vmem:[%s4067_s1 + $0x14] sm:$0xf]  ;;  %v2779_v60 = vld [vmem:[%s4067_s1 + $0x20] sm:$0xf] }
  0x5b   : > { %v657_v63 = vunpack.c.l.b16 %v614_v16  ;;  %v320_v13 = vor.u32 %v319_v14, %v316_v20  ;;  %v329_v27 = vrot.slane %v327_v0, 4  ;;  %v335_v7 = vrot.slane %v333_v21, 5 }
  0x5c   : > { %4125 = vst [vmem:[#allocation15_spill] sm:$0xff] %v3208_v22  ;;  %2566 = vmatmul.msk.bf16.gmra.mxu2 %vm675_vm4, %v3208_v22  ;;  %v624_v59 = vsel %vm2926_vm3, %v619_v53, %v623_v6  ;;  %v2651_v5 = vrot.slane %v2936_v61, 9  ;;  %v1058_v0 = vrot.slane %v2943_v1, 5  ;;  %v1831_v21 = vsel %vm724_vm0, %v2740_v54, 0 }
  0x5d   : > { %v658_v8 = vunpack.c.l.b16 %v624_v59  ;;  %v321_v2 = vrot.slane %v320_v13, 4  ;;  %v330_v20 = vor.u32 %v329_v27, %v325_v31  ;;  %v1987_v16 = vsel %vm724_vm0, %v2761_v41, 0  ;;  %1840 = vmatpush.bf16.msra.mxu2 %v1831_v21  ;;  %v2800_v21 = vld [vmem:[%s2899_s27 + $0xc] sm:$0xff] }
  0x5e   : > { %v1697_v22 = vsel %vm724_vm0, %v2723_v17, 0  ;;  %v2127_v6 = vsel %vm724_vm0, %v2779_v60, 0  ;;  %v1059_v27 = vsel %vm3229_vm7, %v2651_v5, %v1058_v0  ;;  %1996 = vmatpush.bf16.msra.mxu3 %v1987_v16  ;;  %v1060_v54 = vrot.slane %v1058_v0, 4 }
  0x5f   : > { %v3238_v53 = vpack.c.b16 %v658_v8, %v657_v63  ;;  %v326_v61 = vsel %vm2926_vm3, %v321_v2, %v325_v31  ;;  %v331_v13 = vrot.slane %v330_v20, 4  ;;  %1706 = vmatpush.bf16.msra.mxu1 %v1697_v22  ;;  %2136 = vmatpush.bf16.msra.mxu0 %v2127_v6  ;;  %v2652_v41 = vrot.slane %v3010_v35, 9  ;;  %v2799_v22 = vld [vmem:[%s2899_s27] sm:$0xff]  ;;  %v3275_v6 = vld [vmem:[%s2899_s27 + $0x18] sm:$0xff] }
  0x60   : > { %v633_v1 = vunpack.c.l.b16 %v326_v61  ;;  %v1170_v31 = vunpack.c.l.b16 %v1059_v27  ;;  %v1065_v17 = vrot.slane %v3017_v43, 5  ;;  %v1068_v60 = vrot.slane %v3020_v48, 5 }
  0x61   : > { %2570 = vmatmul.msk.bf16.gmra.mxu3 %vm675_vm4, %v3238_v53  ;;  %v336_v63 = vsel %vm2926_vm3, %v331_v13, %v335_v7  ;;  %v1062_v5 = vsel %vm3229_vm7, %v1060_v54, %v1061_v55  ;;  %v1072_v16 = vrot.slane %v3105_v56, 5  ;;  %v2653_v61 = vrot.slane %v3100_v52, 9 }
  0x62   : > { %v634_v59 = vunpack.c.l.b16 %v336_v63  ;;  %v1171_v8 = vunpack.c.l.b16 %v1062_v5  ;;  %v1066_v35 = vsel %vm3229_vm7, %v2652_v41, %v1065_v17  ;;  %v1067_v2 = vrot.slane %v1065_v17, 4  ;;  %v3295_v41 = vld [vmem:[%s2899_s27 + $0x24] sm:$0xff] }
  0x63   : > { %v1172_v7 = vunpack.c.l.b16 %v1066_v35  ;;  %v1074_v13 = vrot.slane %v1072_v16, 4  ;;  %v1075_v27 = vrot.slane %v3108_v57, 5  ;;  %v1079_v57 = vrot.slane %v3193_v33, 5 }
  0x64   : > { %v3256_v20 = vpack.c.b16 %v634_v59, %v633_v1  ;;  %v1202_v0 = vpack.c.b16 %v1171_v8, %v1170_v31  ;;  %v1069_v43 = vsel %vm3229_vm7, %v1067_v2, %v1068_v60  ;;  %v2654_v63 = vrot.slane %v3186_v40, 9  ;;  %v3317_v8 = vld [vmem:[%s2899_s27 + $0x30] sm:$0xff] }
  0x65   : > { %v1173_v48 = vunpack.c.l.b16 %v1069_v43  ;;  %v1076_v56 = vsel %vm3229_vm7, %v1074_v13, %v1075_v27  ;;  %v1081_v31 = vrot.slane %v1079_v57, 4  ;;  %v1082_v17 = vrot.slane %v3197_v39, 5  ;;  %v3345_v27 = vld [vmem:[%s2899_s27 + $0x3c] sm:$0xff] }
  0x66   : > { %2558 = vmatmul.msk.bf16.gmra.mxu0 %vm675_vm4, %v3256_v20  ;;  %v1175_v54 = vunpack.c.l.b16 %v1076_v56  ;;  %v1080_v60 = vsel %vm3229_vm7, %v2654_v63, %v1079_v57  ;;  %v1086_v39 = vrot.slane %v2905_v11, 5  ;;  %v2655_v35 = vrot.slane %v2902_v10, 9 }
  0x67   : > { %2635 = vmatmul.msk.bf16.vlgmr.msrb.gmra.mxu1 %vm675_vm4, %v2799_v22  ;;  %v3263_v55 = vpack.c.b16 %v1173_v48, %v1172_v7  ;;  %v1083_v33 = vsel %vm3229_vm7, %v1081_v31, %v1082_v17  ;;  %v1176_v59 = vunpack.c.l.b16 %v1080_v60  ;;  %v1089_v7 = vrot.slane %v2908_v12, 5 }
  0x68   : > { %v1177_v5 = vunpack.c.l.b16 %v1083_v33  ;;  %v1088_v2 = vrot.slane %v1086_v39, 4  ;;  %v1093_v13 = vrot.slane %v2965_v24, 5  ;;  %v2656_v56 = vrot.slane %v2962_v23, 9 }
  0x6a   : > { %v3309_v40 = vpack.c.b16 %v1177_v5, %v1176_v59  ;;  %v1090_v11 = vsel %vm3229_vm7, %v1088_v2, %v1089_v7  ;;  %v1094_v24 = vsel %vm3229_vm7, %v2656_v56, %v1093_v13  ;;  %v1100_v5 = vrot.slane %v3035_v3, 5 }
  0x6b   : > { %v1180_v23 = vunpack.c.l.b16 %v1094_v24  ;;  %v2657_v7 = vrot.slane %v3030_v58, 9  ;;  %v1107_v24 = vrot.slane %v3125_v32, 5 }
  0x6c   : > { %2668 = vmatmul.msk.bf16.vlgmr.msrb.gmra.mxu2 %vm675_vm4, %v1202_v0  ;;  %v1087_v0 = vsel %vm3229_vm7, %v2655_v35, %v1086_v39  ;;  %v3379_v35 = vld [vmem:[%s2899_s27 + $0x48] sm:$0xff] }
  0x6d   : > { %v1178_v48 = vunpack.c.l.b16 %v1087_v0  ;;  %4130 = vst [vmem:[#allocation18_spill] sm:$0xff] %v3379_v35  ;;  %v1102_v0 = vrot.slane %v1100_v5, 4 }
  0x71   : > { %2689 = vmatmul.msk.bf16.vlgmr.msrb.gmra.mxu3 %vm675_vm4, %v2800_v21 }
  0x76   : > { %2706 = vmatmul.msk.bf16.vlgmr.msrb.gmra.mxu0 %vm675_vm4, %v3078_v9  ;;  %v1073_v9 = vsel %vm3229_vm7, %v2653_v61, %v1072_v16 }
  0x77   : > { %2636 = vmatmul.msk.bf16.gmra.mxu1 %vm675_vm4, %v2800_v21  ;;  %v1174_v1 = vunpack.c.l.b16 %v1073_v9  ;;  %v1179_v21 = vunpack.c.l.b16 %v1090_v11  ;;  %v1103_v11 = vrot.slane %v3042_v15, 5 }
  0x79   : > { %v3289_v52 = vpack.c.b16 %v1175_v54, %v1174_v1  ;;  %v3337_v12 = vpack.c.b16 %v1179_v21, %v1178_v48  ;;  %v1095_v1 = vrot.slane %v1093_v13, 4  ;;  %v1096_v54 = vrot.slane %v2970_v29, 5 }
  0x7a   : > { %v1101_v21 = vsel %vm3229_vm7, %v2657_v7, %v1100_v5  ;;  %v1104_v13 = vsel %vm3229_vm7, %v1102_v0, %v1103_v11  ;;  %v2658_v5 = vrot.slane %v3120_v26, 9  ;;  %v1109_v7 = vrot.slane %v1107_v24, 4 }
  0x7b   : > { %v1097_v63 = vsel %vm3229_vm7, %v1095_v1, %v1096_v54  ;;  %v1182_v56 = vunpack.c.l.b16 %v1101_v21  ;;  %v1183_v1 = vunpack.c.l.b16 %v1104_v13  ;;  %v1110_v0 = vrot.slane %v3130_v46, 5 }
  0x7c   : > { %2669 = vmatmul.msk.bf16.gmra.mxu2 %vm675_vm4, %v3263_v55  ;;  %v1181_v60 = vunpack.c.l.b16 %v1097_v63  ;;  %v1108_v32 = vsel %vm3229_vm7, %v2658_v5, %v1107_v24  ;;  %v1114_v5 = vrot.slane %v2917_v19, 5 }
  0x7d   : > { %v3403_v54 = vpack.c.b16 %v1183_v1, %v1182_v56  ;;  %v1111_v13 = vsel %vm3229_vm7, %v1109_v7, %v1110_v0  ;;  %v1184_v56 = vunpack.c.l.b16 %v1108_v32  ;;  %v2829_v32 = vld [vmem:[%s2899_s27 + $0x68] sm:$0x1] }
  0x7e   : > { %v3369_v33 = vpack.c.b16 %v1181_v60, %v1180_v23  ;;  %v3413_v60 = vld [vmem:[%s2899_s27 + $0x54] sm:$0xff]  ;;  %v1185_v46 = vunpack.c.l.b16 %v1111_v13  ;;  %v1117_v13 = vrot.slane %v2829_v32, 5 }
  0x7f   : > { %4133 = vst [vmem:[#allocation21_spill] sm:$0xff] %v3403_v54 }
  0x80   : > { %4134 = vst [vmem:[#allocation22_spill] sm:$0xff] %v3413_v60 }
  0x81   : > { %2690 = vmatmul.msk.bf16.gmra.mxu3 %vm675_vm4, %v3275_v6 }
  0x86   : > { %2707 = vmatmul.msk.bf16.gmra.mxu0 %vm675_vm4, %v3166_v45 }
  0x87   : > { %2637 = vmatmul.msk.bf16.gmra.mxu1 %vm675_vm4, %v3275_v6 }
  0x8c   : > { %2670 = vmatmul.msk.bf16.gmra.mxu2 %vm675_vm4, %v3289_v52 }
  0x91   : > { %2691 = vmatmul.msk.bf16.gmra.mxu3 %vm675_vm4, %v3295_v41 }
  0x96   : > { %2708 = vmatmul.msk.bf16.gmra.mxu0 %vm675_vm4, %v3256_v20 }
  0x97   : > { %2638 = vmatmul.msk.bf16.gmra.mxu1 %vm675_vm4, %v3295_v41 }
  0x9c   : > { %v3312_v22 = vpop.f32.mrf.mxu1  ;;  %2671 = vmatmul.msk.bf16.gmra.mxu2 %vm675_vm4, %v3309_v40 }
  0xa1   : > { %2692 = vmatmul.msk.bf16.gmra.mxu3 %vm675_vm4, %v3317_v8 }
  0xa4   : > { %v3327_v43 = vpop.f32.mrf.mxu1 }
  0xa6   : > { %v3329_v16 = vpop.f32.mrf.mxu2  ;;  %2709 = vmatmul.msk.bf16.gmra.mxu0 %vm675_vm4, %v2938_v62 }
  0xa7   : > { %2639 = vmatmul.msk.bf16.gmra.mxu1 %vm675_vm4, %v3317_v8 }
  0xa9   : > { %v3335_v10 = vpop.f32.mrf.mxu0 }
  0xaa   : > { %v3339_v61 = vpop.f32.mrf.mxu3 }
  0xab   : > { %4128 = vst [vmem:[#allocation16_spill] sm:$0xff] %v3339_v61 }
  0xac   : > { %2672 = vmatmul.msk.bf16.gmra.mxu2 %vm675_vm4, %v3337_v12 }
  0xae   : > { %v3347_v9 = vpop.f32.mrf.mxu1  ;;  %v3351_v57 = vpop.f32.mrf.mxu2 }
  0xb1   : > { %2693 = vmatmul.msk.bf16.gmra.mxu3 %vm675_vm4, %v3345_v27  ;;  %v3359_v31 = vpop.f32.mrf.mxu0 }
  0xb2   : > { %v3361_v17 = vpop.f32.mrf.mxu3 }
  0xb3   : > { %4129 = vst [vmem:[#allocation17_spill] sm:$0xff] %v3361_v17 }
  0xb6   : > { %2710 = vmatmul.msk.bf16.gmra.mxu0 %vm675_vm4, %v3012_v37  ;;  %v3365_v29 = vpop.f32.mrf.mxu1 }
  0xb7   : > { %2640 = vmatmul.msk.bf16.gmra.mxu1 %vm675_vm4, %v3345_v27 }
  0xb9   : > { %v3371_v59 = vpop.f32.mrf.mxu2 }
  0xbc   : > { %2673 = vmatmul.msk.bf16.gmra.mxu2 %vm675_vm4, %v3369_v33 }
  0xbd   : > { %v3374_v39 = vpop.f32.mrf.mxu0 }
  0xbe   : > { %v3381_v2 = vpop.f32.mrf.mxu3 }
  0xbf   : > { %4131 = vst [vmem:[#allocation19_spill] sm:$0xff] %v3381_v2 }
  0xc0   : > { %v3385_v48 = vpop.f32.mrf.mxu1 }
  0xc1   : > { %2694 = vmatmul.msk.bf16.gmra.mxu3 %vm675_vm4, %v3379_v35  ;;  %v3389_v3 = vpop.f32.mrf.mxu2 }
  0xc5   : > { %v3395_v58 = vpop.f32.mrf.mxu0 }
  0xc6   : > { %2711 = vmatmul.msk.bf16.gmra.mxu0 %vm675_vm4, %v3097_v44  ;;  %v3399_v15 = vpop.f32.mrf.mxu3 }
  0xc7   : > { %4132 = vst [vmem:[#allocation20_spill] sm:$0xff] %v3399_v15  ;;  %2641 = vmatmul.msk.bf16.gmra.mxu1 %vm675_vm4, %v3379_v35  ;;  %v3448_v15 = vld [vmem:[%s2899_s27 + $0x60] sm:$0xff] }
  0xc8   : > { %v3406_v63 = vpop.f32.mrf.mxu1  ;;  %4138 = vst [vmem:[#allocation26_spill] sm:$0xff] %v3448_v15 }
  0xcc   : > { %v3408_v23 = vpop.f32.mrf.mxu2  ;;  %2674 = vmatmul.msk.bf16.gmra.mxu2 %vm675_vm4, %v3403_v54 }
  0xcf   : > { %v3417_v11 = vpop.f32.mrf.mxu0 }
  0xd0   : > { %v3419_v21 = vpop.f32.mrf.mxu3 }
  0xd1   : > { %4135 = vst [vmem:[#allocation23_spill] sm:$0xff] %v3419_v21  ;;  %2695 = vmatmul.msk.bf16.gmra.mxu3 %vm675_vm4, %v3413_v60  ;;  %v3435_v21 = vpack.c.b16 %v1185_v46, %v1184_v56 }
  0xd3   : > { %4136 = vst [vmem:[#allocation24_spill] sm:$0xff] %v3435_v21 }
  0xd4   : > { %v3427_v26 = vpop.f32.mrf.mxu1  ;;  %v3429_v1 = vpop.f32.mrf.mxu2 }
  0xd6   : > { %2712 = vmatmul.msk.bf16.gmra.mxu0 %vm675_vm4, %v3188_v42  ;;  %v2830_v42 = vld [vmem:[%s2899_s27 + $0x60] sm:$0xf] }
  0xd7   : > { %2642 = vmatmul.msk.bf16.gmra.mxu1 %vm675_vm4, %v3413_v60  ;;  %v3437_v24 = vpop.f32.mrf.mxu0  ;;  %v2659_v2 = vrot.slane %v2830_v42, 9  ;;  %v1116_v60 = vrot.slane %v1114_v5, 4 }
  0xd8   : > { %v3440_v7 = vpop.f32.mrf.mxu3 }
  0xd9   : > { %4137 = vst [vmem:[#allocation25_spill] sm:$0xff] %v3440_v7  ;;  %v1115_v19 = vsel %vm3229_vm7, %v2659_v2, %v1114_v5  ;;  %v1118_v46 = vsel %vm3229_vm7, %v1116_v60, %v1117_v13  ;;  %v1121_v60 = vrot.slane %v2985_v47, 5 }
  0xda   : > { %v1186_v17 = vunpack.c.l.b16 %v1115_v19  ;;  %v1187_v42 = vunpack.c.l.b16 %v1118_v46  ;;  %v3481_v19 = vld [vmem:[%s2899_s27 + $0x6c] sm:$0xff] }
  0xdc   : > { %2675 = vmatmul.msk.bf16.gmra.mxu2 %vm675_vm4, %v3435_v21  ;;  %v3444_v0 = vpop.f32.mrf.mxu1  ;;  %v3470_v2 = vpack.c.b16 %v1187_v42, %v1186_v17  ;;  %v1123_v17 = vrot.slane %v1121_v60, 4 }
  0xde   : > { %4140 = vst [vmem:[#allocation28_spill] sm:$0xff] %v3470_v2 }
  0xdf   : > { %v3451_v56 = vpop.f32.mrf.mxu2 }
  0xe1   : > { %2696 = vmatmul.msk.bf16.gmra.mxu3 %vm675_vm4, %v3448_v15 }
  0xe3   : > { %v3459_v7 = vpop.f32.mrf.mxu0 }
  0xe4   : > { %v3461_v32 = vpop.f32.mrf.mxu3  ;;  %v957_v21 = vpop.f32.mrf.mxu1 }
  0xe5   : > { %4139 = vst [vmem:[#allocation27_spill] sm:$0xff] %v3461_v32  ;;  %v958_v54 = vadd.f32 %v957_v21, %v3335_v10  ;;  %v1124_v21 = vrot.slane %v2992_v51, 5  ;;  %v2660_v32 = vrot.slane %v2978_v38, 9 }
  0xe6   : > { %2713 = vmatmul.msk.bf16.gmra.mxu0 %vm675_vm4, %v2957_v18 }
  0xe7   : > { %v3466_v44 = vpop.f32.mrf.mxu2  ;;  %2643 = vmatmul.msk.bf16.gmra.mxu1 %vm675_vm4, %v3448_v15  ;;  %v1122_v47 = vsel %vm3229_vm7, %v2660_v32, %v1121_v60 }
  0xe8   : > { %v1188_v61 = vunpack.c.l.b16 %v1122_v47 }
  0xeb   : > { %v3473_v5 = vpop.f32.mrf.mxu0 }
  0xec   : > { %v3475_v13 = vpop.f32.mrf.mxu3  ;;  %2676 = vmatmul.msk.bf16.gmra.mxu2 %vm675_vm4, %v3470_v2  ;;  %v959_v10 = vpop.f32.mrf.mxu1 }
  0xed   : > { %4141 = vst [vmem:[#allocation29_spill] sm:$0xff] %v3475_v13  ;;  %v960_v46 = vadd.f32 %v959_v10, %v3359_v31  ;;  %v1125_v13 = vsel %vm3229_vm7, %v1123_v17, %v1124_v21  ;;  %v1128_v21 = vrot.slane %v3057_v34, 5 }
  0xee   : > { %v1189_v35 = vunpack.c.l.b16 %v1125_v13  ;;  %v1131_v13 = vrot.slane %v3064_v50, 5 }
  0xef   : > { %v1278_v42 = vpop.f32.mrf.mxu2 }
  0xf0   : > { %v1358_v18 = vadd.f32 %v1278_v42, %v958_v54  ;;  %v3498_v10 = vpack.c.b16 %v1189_v35, %v1188_v61  ;;  %v3505_v42 = vld [vmem:[%s2899_s27 + $0x78] sm:$0xff] }
  0xf1   : > { %2697 = vmatmul.msk.bf16.gmra.mxu3 %vm675_vm4, %v3481_v19 }
  0xf3   : > { %v1568_v2 = vpop.f32.mrf.mxu0 }
  0xf4   : > { %v1412_v51 = vpop.f32.mrf.mxu3  ;;  %v962_v15 = vpop.f32.mrf.mxu1 }
  0xf5   : > { %v1492_v31 = vadd.f32 %v1412_v51, %v1358_v18  ;;  %v963_v38 = vadd.f32 %v962_v15, %v3374_v39 }
  0xf6   : > { %2714 = vmatmul.msk.bf16.gmra.mxu0 %vm675_vm4, %v3037_v4 }
  0xf7   : > { %v1280_v54 = vpop.f32.mrf.mxu2  ;;  %2644 = vmatmul.msk.bf16.gmra.mxu1 %vm675_vm4, %v3481_v19  ;;  %v3496_v32 = vadd.f32 %v1568_v2, %v1492_v31  ;;  %v2661_v2 = vrot.slane %v3053_v28, 9 }
  0xf8   : > { %v1359_v60 = vadd.f32 %v1280_v54, %v960_v46  ;;  %v1130_v46 = vrot.slane %v1128_v21, 4 }
  0xf9   : > { %v1129_v50 = vsel %vm3229_vm7, %v2661_v2, %v1128_v21 }
  0xfa   : > { %v1132_v51 = vsel %vm3229_vm7, %v1130_v46, %v1131_v13  ;;  %v1138_v46 = vrot.slane %v3152_v49, 5 }
  0xfb   : > { %v1570_v17 = vpop.f32.mrf.mxu0 }
  0xfc   : > { %v1414_v18 = vpop.f32.mrf.mxu3  ;;  %2677 = vmatmul.msk.bf16.gmra.mxu2 %vm675_vm4, %v3498_v10  ;;  %v964_v39 = vpop.f32.mrf.mxu1 }
  0xfd   : > { %v1493_v15 = vadd.f32 %v1414_v18, %v1359_v60  ;;  %v965_v47 = vadd.f32 %v964_v39, %v3395_v58  ;;  %v1190_v58 = vunpack.c.l.b16 %v1129_v50  ;;  %v1191_v18 = vunpack.c.l.b16 %v1132_v51  ;;  %v3531_v50 = vld [vmem:[%s2899_s27 + $0x84] sm:$0xff] }
  0xff   : > { %v1283_v61 = vpop.f32.mrf.mxu2  ;;  %v3509_v35 = vadd.f32 %v1570_v17, %v1493_v15  ;;  %v3524_v13 = vpack.c.b16 %v1191_v18, %v1190_v58  ;;  %v1135_v15 = vrot.slane %v3147_v30, 5 }
 0x100   : > { %v1360_v34 = vadd.f32 %v1283_v61, %v963_v38 }
 0x101   : > { %2698 = vmatmul.msk.bf16.gmra.mxu3 %vm675_vm4, %v3505_v42 }
 0x103   : > { %v1573_v31 = vpop.f32.mrf.mxu0 }
 0x104   : > { %v1417_v54 = vpop.f32.mrf.mxu3  ;;  %v967_v60 = vpop.f32.mrf.mxu1 }
 0x105   : > { %v1494_v28 = vadd.f32 %v1417_v54, %v1360_v34  ;;  %v968_v17 = vadd.f32 %v967_v60, %v3417_v11 }
 0x106   : > { %2715 = vmatmul.msk.bf16.gmra.mxu0 %vm675_vm4, %v3122_v25 }
 0x107   : > { %v1285_v38 = vpop.f32.mrf.mxu2  ;;  %2645 = vmatmul.msk.bf16.gmra.mxu1 %vm675_vm4, %v3505_v42  ;;  %v3522_v21 = vadd.f32 %v1573_v31, %v1494_v28  ;;  %v4142_v31 = vld [vmem:[#allocation9_spill] sm:$0xff] }
 0x108   : > { %v1361_v39 = vadd.f32 %v1285_v38, %v965_v47  ;;  %v2662_v54 = vrot.slane %v4142_v31, 9  ;;  %v1137_v47 = vrot.slane %v1135_v15, 4 }
 0x10a   : > { %v1136_v49 = vsel %vm3229_vm7, %v2662_v54, %v1135_v15  ;;  %v1139_v18 = vsel %vm3229_vm7, %v1137_v47, %v1138_v46  ;;  %v2831_v54 = vld [vmem:[%s2899_s27 + $0x94] sm:$0xf] }
 0x10b   : > { %v1575_v2 = vpop.f32.mrf.mxu0  ;;  %v1142_v47 = vrot.slane %v2831_v54, 5 }
 0x10c   : > { %v1419_v61 = vpop.f32.mrf.mxu3  ;;  %2678 = vmatmul.msk.bf16.gmra.mxu2 %vm675_vm4, %v3524_v13  ;;  %v969_v11 = vpop.f32.mrf.mxu1 }
 0x10d   : > { %v1495_v34 = vadd.f32 %v1419_v61, %v1361_v39  ;;  %v970_v51 = vadd.f32 %v969_v11, %v3437_v24  ;;  %v1192_v39 = vunpack.c.l.b16 %v1136_v49  ;;  %v1193_v61 = vunpack.c.l.b16 %v1139_v18 }
 0x10f   : > { %v1288_v60 = vpop.f32.mrf.mxu2  ;;  %v3535_v58 = vadd.f32 %v1575_v2, %v1495_v34  ;;  %v3550_v31 = vpack.c.b16 %v1193_v61, %v1192_v39 }
 0x110   : > { %v1362_v30 = vadd.f32 %v1288_v60, %v968_v17  ;;  %v4144_v17 = vld [vmem:[#allocation15_spill] sm:$0xff] }
 0x111   : > { %4143 = vst [vmem:[#allocation9_spill] sm:$0xff] %v3535_v58  ;;  %2699 = vmatmul.msk.bf16.gmra.mxu3 %vm675_vm4, %v3531_v50 }
 0x112   : > { %4146 = vst [vmem:[#allocation31_spill] sm:$0xff] %v3550_v31 }
 0x113   : > { %v1578_v28 = vpop.f32.mrf.mxu0 }
 0x114   : > { %v1422_v24 = vpop.f32.mrf.mxu3  ;;  %v972_v38 = vpop.f32.mrf.mxu1 }
 0x115   : > { %v1496_v11 = vadd.f32 %v1422_v24, %v1362_v30  ;;  %v973_v2 = vadd.f32 %v972_v38, %v3459_v7  ;;  %v2832_v30 = vld [vmem:[%s2899_s27 + $0x98] sm:$0x1]  ;;  %v3557_v38 = vld [vmem:[%s2899_s27 + $0x90] sm:$0xff] }
 0x116   : > { %2716 = vmatmul.msk.bf16.gmra.mxu0 %vm675_vm4, %v4144_v17  ;;  %v1145_v49 = vrot.slane %v2832_v30, 5  ;;  %4147 = vst [vmem:[#allocation32_spill] sm:$0xff] %v3557_v38 }
 0x117   : > { %v1290_v34 = vpop.f32.mrf.mxu2  ;;  %2646 = vmatmul.msk.bf16.gmra.mxu1 %vm675_vm4, %v3531_v50  ;;  %v3548_v15 = vadd.f32 %v1578_v28, %v1496_v11  ;;  %v2833_v28 = vld [vmem:[%s2899_s27 + $0x90] sm:$0xf] }
 0x118   : > { %v1363_v46 = vadd.f32 %v1290_v34, %v970_v51  ;;  %v2663_v11 = vrot.slane %v2833_v28, 9  ;;  %v1144_v51 = vrot.slane %v1142_v47, 4 }
 0x119   : > { %4145 = vst [vmem:[#allocation30_spill] sm:$0xff] %v3548_v15 }
 0x11a   : > { %v1143_v54 = vsel %vm3229_vm7, %v2663_v11, %v1142_v47  ;;  %v2834_v11 = vld [vmem:[%s2899_s27 + $0xa0] sm:$0xf] }
 0x11b   : > { %v1580_v60 = vpop.f32.mrf.mxu0 }
 0x11c   : > { %v1424_v7 = vpop.f32.mrf.mxu3  ;;  %2679 = vmatmul.msk.bf16.gmra.mxu2 %vm675_vm4, %v3550_v31  ;;  %v974_v18 = vpop.f32.mrf.mxu1  ;;  %v2836_v31 = vld [vmem:[%s2899_s27 + $0x9c] sm:$0xf] }
 0x11d   : > { %v1497_v24 = vadd.f32 %v1424_v7, %v1363_v46  ;;  %v975_v58 = vadd.f32 %v974_v18, %v3473_v5  ;;  %v1146_v46 = vsel %vm3229_vm7, %v1144_v51, %v1145_v49  ;;  %v1194_v18 = vunpack.c.l.b16 %v1143_v54 }
 0x11e   : > { %v1195_v28 = vunpack.c.l.b16 %v1146_v46  ;;  %v1149_v51 = vrot.slane %v2834_v11, 5  ;;  %v2835_v46 = vld [vmem:[%s2899_s27 + $0xa4] sm:$0x1] }
 0x11f   : > { %v1293_v39 = vpop.f32.mrf.mxu2  ;;  %v3561_v61 = vadd.f32 %v1580_v60, %v1497_v24  ;;  %v4149_v60 = vld [vmem:[#allocation3_spill] sm:$0xff] }
 0x120   : > { %v1364_v34 = vadd.f32 %v1293_v39, %v973_v2  ;;  %v3575_v49 = vpack.c.b16 %v1195_v28, %v1194_v18 }
 0x121   : > { %4148 = vst [vmem:[#allocation33_spill] sm:$0xff] %v3561_v61  ;;  %2700 = vmatmul.msk.bf16.gmra.mxu3 %vm675_vm4, %v3557_v38 }
 0x122   : > { %4151 = vst [vmem:[#allocation35_spill] sm:$0xff] %v3575_v49 }
 0x123   : > { %v1583_v30 = vpop.f32.mrf.mxu0 }
 0x124   : > { %v1427_v7 = vpop.f32.mrf.mxu3  ;;  %v977_v5 = vpop.f32.mrf.mxu1 }
 0x125   : > { %v1498_v15 = vadd.f32 %v1427_v7, %v1364_v34  ;;  %v1152_v7 = vrot.slane %v2835_v46, 5 }
 0x126   : > { %2717 = vmatmul.msk.bf16.gmra.mxu0 %vm675_vm4, %v4149_v60  ;;  %v3582_v60 = vld [vmem:[%s2899_s27 + $0x9c] sm:$0xff] }
 0x127   : > { %v1295_v2 = vpop.f32.mrf.mxu2  ;;  %2647 = vmatmul.msk.bf16.gmra.mxu1 %vm675_vm4, %v3557_v38  ;;  %v3573_v47 = vadd.f32 %v1583_v30, %v1498_v15  ;;  %4152 = vst [vmem:[#allocation36_spill] sm:$0xff] %v3582_v60  ;;  %v2664_v38 = vrot.slane %v2836_v31, 9  ;;  %v1151_v15 = vrot.slane %v1149_v51, 4 }
 0x128   : > { %v1365_v24 = vadd.f32 %v1295_v2, %v975_v58  ;;  %v978_v58 = vadd.f32 %v977_v5, %v3312_v22  ;;  %v4154_v5 = vld [vmem:[#allocation4_spill] sm:$0xff] }
 0x129   : > { %4150 = vst [vmem:[#allocation34_spill] sm:$0xff] %v3573_v47  ;;  %v1150_v2 = vsel %vm3229_vm7, %v2664_v38, %v1149_v51 }
 0x12a   : > { %v1196_v31 = vunpack.c.l.b16 %v1150_v2 }
 0x12b   : > { %v1585_v39 = vpop.f32.mrf.mxu0 }
 0x12c   : > { %v1429_v54 = vpop.f32.mrf.mxu3  ;;  %2680 = vmatmul.msk.bf16.gmra.mxu2 %vm675_vm4, %v3575_v49  ;;  %v979_v34 = vpop.f32.mrf.mxu1 }
 0x12d   : > { %v1499_v61 = vadd.f32 %v1429_v54, %v1365_v24  ;;  %v1153_v24 = vsel %vm3229_vm7, %v1151_v15, %v1152_v7  ;;  %v4157_v15 = vld [vmem:[#allocation6_spill] sm:$0xff] }
 0x12e   : > { %v1197_v47 = vunpack.c.l.b16 %v1153_v24  ;;  %v4158_v24 = vld [vmem:[#allocation7_spill] sm:$0xff] }
 0x12f   : > { %v1298_v30 = vpop.f32.mrf.mxu2  ;;  %v3586_v18 = vadd.f32 %v1585_v39, %v1499_v61  ;;  %v980_v61 = vadd.f32 %v979_v34, %v3327_v43  ;;  %v3608_v34 = vld [vmem:[%s2899_s27 + $0xa8] sm:$0xff] }
 0x130   : > { %v1366_v28 = vadd.f32 %v1298_v30, %v978_v58  ;;  %v3601_v7 = vpack.c.b16 %v1197_v47, %v1196_v31  ;;  %v1156_v58 = vrot.slane %v4157_v15, 5  ;;  %4159 = vst [vmem:[#allocation6_spill] sm:$0xff] %v3608_v34 }
 0x131   : > { %4153 = vst [vmem:[#allocation37_spill] sm:$0xff] %v3586_v18  ;;  %2701 = vmatmul.msk.bf16.gmra.mxu3 %vm675_vm4, %v3582_v60  ;;  %v4160_v18 = vld [vmem:[#allocation5_spill] sm:$0xff] }
 0x132   : > { %4156 = vst [vmem:[#allocation39_spill] sm:$0xff] %v3601_v7 }
 0x133   : > { %v1588_v11 = vpop.f32.mrf.mxu0 }
 0x134   : > { %v1432_v54 = vpop.f32.mrf.mxu3  ;;  %v982_v46 = vpop.f32.mrf.mxu1 }
 0x135   : > { %v1500_v22 = vadd.f32 %v1432_v54, %v1366_v28  ;;  %v1159_v54 = vrot.slane %v4158_v24, 5 }
 0x136   : > { %2718 = vmatmul.msk.bf16.gmra.mxu0 %vm675_vm4, %v4154_v5  ;;  %v2665_v5 = vrot.slane %v4160_v18, 9 }
 0x137   : > { %v1300_v39 = vpop.f32.mrf.mxu2  ;;  %2648 = vmatmul.msk.bf16.gmra.mxu1 %vm675_vm4, %v3582_v60  ;;  %v3599_v38 = vadd.f32 %v1588_v11, %v1500_v22  ;;  %v1158_v11 = vrot.slane %v1156_v58, 4  ;;  %v983_v22 = vadd.f32 %v982_v46, %v3347_v9 }
 0x138   : > { %v1367_v51 = vadd.f32 %v1300_v39, %v980_v61  ;;  %v1157_v39 = vsel %vm3229_vm7, %v2665_v5, %v1156_v58  ;;  %v3626_v5 = vld [vmem:[%s2899_s27 + $0xc0] sm:$0xf] }
 0x139   : > { %4155 = vst [vmem:[#allocation38_spill] sm:$0xff] %v3599_v38  ;;  %v1198_v24 = vunpack.c.l.b16 %v1157_v39  ;;  %v4162_v38 = vld [vmem:[#allocation10_spill] sm:$0xff]  ;;  %v1525_v39 = vshrl.u32 %v3626_v5, 16 }
 0x13a   : > { %4163 = vst [vmem:[#allocation5_spill] sm:$0xff] %v3626_v5 }
 0x13b   : > { %v1590_v30 = vpop.f32.mrf.mxu0 }
 0x13c   : > { %v1434_v2 = vpop.f32.mrf.mxu3  ;;  %2681 = vmatmul.msk.bf16.gmra.mxu2 %vm675_vm4, %v3601_v7  ;;  %v984_v28 = vpop.f32.mrf.mxu1 }
 0x13d   : > { %v1501_v43 = vadd.f32 %v1434_v2, %v1367_v51  ;;  %v1160_v51 = vsel %vm3229_vm7, %v1158_v11, %v1159_v54 }
 0x13e   : > { %v1199_v9 = vunpack.c.l.b16 %v1160_v51 }
 0x13f   : > { %v1303_v47 = vpop.f32.mrf.mxu2  ;;  %v3612_v31 = vadd.f32 %v1590_v30, %v1501_v43  ;;  %v985_v30 = vadd.f32 %v984_v28, %v3365_v29  ;;  %v1528_v29 = vshll.u32 %v3626_v5, 16 }
 0x140   : > { %v1368_v61 = vadd.f32 %v1303_v47, %v983_v22  ;;  %v3630_v11 = vpack.c.b16 %v1199_v9, %v1198_v24  ;;  %v3633_v22 = vld [vmem:[%s2899_s27 + $0xc4] sm:$0xf]  ;;  %v4167_v47 = vld [vmem:[#allocation12_spill] sm:$0xff]  ;;  %v4168_v24 = vld [vmem:[#allocation13_spill] sm:$0xff] }
 0x141   : > { %4161 = vst [vmem:[#allocation7_spill] sm:$0xff] %v3612_v31  ;;  %2702 = vmatmul.msk.bf16.gmra.mxu3 %vm675_vm4, %v3608_v34  ;;  %v1534_v28 = vshll.u32 %v3633_v22, 16  ;;  %v1166_v9 = vrot.slane %v4168_v24, 5  ;;  %v1530_v7 = vrot.slane %v1528_v29, 5 }
 0x142   : > { %4165 = vst [vmem:[#allocation41_spill] sm:$0xff] %v3630_v11 }
 0x143   : > { %v1593_v15 = vpop.f32.mrf.mxu0  ;;  %4166 = vst [vmem:[#allocation42_spill] sm:$0xff] %v3633_v22 }
 0x144   : > { %v1437_v18 = vpop.f32.mrf.mxu3  ;;  %v987_v2 = vpop.f32.mrf.mxu1 }
 0x145   : > { %v1502_v46 = vadd.f32 %v1437_v18, %v1368_v61  ;;  %v1163_v61 = vrot.slane %v4167_v47, 5  ;;  %v1538_v18 = vshrl.u32 %v3633_v22, 16  ;;  %v988_v5 = vadd.f32 %v987_v2, %v3385_v48 }
 0x146   : > { %2719 = vmatmul.msk.bf16.gmra.mxu0 %vm675_vm4, %v4162_v38  ;;  %v1527_v38 = vrot.slane %v1525_v39, 4  ;;  %v1536_v22 = vrot.slane %v1534_v28, 5 }
 0x147   : > { %v1305_v43 = vpop.f32.mrf.mxu2  ;;  %2649 = vmatmul.msk.bf16.gmra.mxu1 %vm675_vm4, %v3608_v34  ;;  %v3628_v58 = vadd.f32 %v1593_v15, %v1502_v46  ;;  %v1540_v60 = vrot.slane %v1538_v18, 4 }
 0x148   : > { %v1369_v54 = vadd.f32 %v1305_v43, %v985_v30  ;;  %v3644_v30 = vld [vmem:[%s2899_s27 + $0xb4] sm:$0xff]  ;;  %v4169_v43 = vld [vmem:[#allocation11_spill] sm:$0xff]  ;;  %v1531_v2 = vor.u32 %v1530_v7, %v1527_v38 }
 0x149   : > { %4164 = vst [vmem:[#allocation40_spill] sm:$0xff] %v3628_v58  ;;  %v2666_v47 = vrot.slane %v4169_v43, 9  ;;  %v1165_v58 = vrot.slane %v1163_v61, 4  ;;  %v1541_v39 = vor.u32 %v1540_v60, %v1536_v22 }
 0x14b   : > { %v1595_v51 = vpop.f32.mrf.mxu0  ;;  %v1542_v38 = vrot.slane %v1541_v39, 4 }
 0x14c   : > { %v1439_v31 = vpop.f32.mrf.mxu3  ;;  %2682 = vmatmul.msk.bf16.gmra.mxu2 %vm675_vm4, %v3630_v11  ;;  %v989_v15 = vpop.f32.mrf.mxu1  ;;  %v3651_v11 = vld [vmem:[%s2899_s27 + $0xc8] sm:$0x1] }
 0x14d   : > { %v1503_v46 = vadd.f32 %v1439_v31, %v1369_v54  ;;  %v1164_v31 = vsel %vm3229_vm7, %v2666_v47, %v1163_v61  ;;  %v1167_v54 = vsel %vm3229_vm7, %v1165_v58, %v1166_v9  ;;  %v1544_v29 = vshll.u32 %v3651_v11, 16 }
 0x14e   : > { %v1200_v18 = vunpack.c.l.b16 %v1164_v31  ;;  %v990_v24 = vadd.f32 %v989_v15, %v3406_v63  ;;  %v1532_v58 = vrot.slane %v1531_v2, 4 }
 0x14f   : > { %v1308_v34 = vpop.f32.mrf.mxu2  ;;  %v3648_v49 = vadd.f32 %v1595_v51, %v1503_v46  ;;  %v1546_v60 = vrot.slane %v1544_v29, 5 }
 0x150   : > { %v1370_v17 = vadd.f32 %v1308_v34, %v988_v5  ;;  %v1201_v34 = vunpack.c.l.b16 %v1167_v54  ;;  %v3676_v54 = vld [vmem:[%s2899_s27 + $0xc0] sm:$0xff] }
 0x151   : > { %2703 = vmatmul.msk.bf16.gmra.mxu3 %vm675_vm4, %v3644_v30  ;;  %v1547_v63 = vsel %vm2926_vm3, %v1542_v38, %v1546_v60 }
 0x152   : > { %v3667_v46 = vpack.c.b16 %v1201_v34, %v1200_v18  ;;  %v1551_v39 = vunpack.c.l.b16 %v1547_v63 }
 0x153   : > { %v1598_v48 = vpop.f32.mrf.mxu0 }
 0x154   : > { %v1442_v28 = vpop.f32.mrf.mxu3  ;;  %v992_v51 = vpop.f32.mrf.mxu1 }
 0x155   : > { %v1504_v5 = vadd.f32 %v1442_v28, %v1370_v17  ;;  %v1537_v17 = vsel %vm2926_vm3, %v1532_v58, %v1536_v22 }
 0x156   : > { %2720 = vmatmul.msk.bf16.gmra.mxu0 %vm675_vm4, %v3238_v53  ;;  %v1550_v2 = vunpack.c.l.b16 %v1537_v17 }
 0x157   : > { %v1310_v61 = vpop.f32.mrf.mxu2  ;;  %2650 = vmatmul.msk.bf16.gmra.mxu1 %vm675_vm4, %v3644_v30  ;;  %v3665_v7 = vadd.f32 %v1598_v48, %v1504_v5  ;;  %v993_v48 = vadd.f32 %v992_v51, %v3427_v26 }
 0x158   : > { %v1371_v9 = vadd.f32 %v1310_v61, %v990_v24  ;;  %v3683_v22 = vpack.c.b16 %v1551_v39, %v1550_v2 }
 0x15b   : > { %v1600_v43 = vpop.f32.mrf.mxu0 }
 0x15c   : > { %v1444_v15 = vpop.f32.mrf.mxu3  ;;  %2683 = vmatmul.msk.bf16.gmra.mxu2 %vm675_vm4, %v3667_v46  ;;  %v994_v47 = vpop.f32.mrf.mxu1 }
 0x15d   : > { %v1505_v31 = vadd.f32 %v1444_v15, %v1371_v9  ;;  %v995_v26 = vadd.f32 %v994_v47, %v3444_v0 }
 0x15f   : > { %v1313_v29 = vpop.f32.mrf.mxu2  ;;  %v3679_v28 = vadd.f32 %v1600_v43, %v1505_v31 }
 0x160   : > { %v1372_v18 = vadd.f32 %v1313_v29, %v993_v48 }
 0x161   : > { %2704 = vmatmul.msk.bf16.gmra.mxu3 %vm675_vm4, %v3676_v54 }
 0x163   : > { %v1603_v34 = vpop.f32.mrf.mxu0 }
 0x164   : > { %v1447_v5 = vpop.f32.mrf.mxu3  ;;  %v997_v24 = vpop.f32.mrf.mxu1 }
 0x165   : > { %v1506_v61 = vadd.f32 %v1447_v5, %v1372_v18  ;;  %v998_v63 = vadd.f32 %v997_v24, %v3329_v16 }
 0x166   : > { %2721 = vmatmul.msk.bf16.gmra.mxu0 %vm675_vm4, %v3683_v22 }
 0x167   : > { %v1315_v51 = vpop.f32.mrf.mxu2  ;;  %2724 = vmatmul.msk.bf16.vlgmr.msra.gmra.mxu1 %vm675_vm4, %v3263_v55  ;;  %v3690_v58 = vadd.f32 %v1603_v34, %v1506_v61 }
 0x168   : > { %v1373_v38 = vadd.f32 %v1315_v51, %v995_v26 }
 0x16b   : > { %v1605_v60 = vpop.f32.mrf.mxu0 }
 0x16c   : > { %v1449_v9 = vpop.f32.mrf.mxu3  ;;  %2745 = vmatmul.msk.bf16.vlgmr.msra.gmra.mxu2 %vm675_vm4, %v3275_v6  ;;  %v999_v43 = vpop.f32.mrf.mxu1 }
 0x16d   : > { %v1507_v17 = vadd.f32 %v1449_v9, %v1373_v38  ;;  %v1000_v6 = vadd.f32 %v999_v43, %v3351_v57 }
 0x16f   : > { %v1318_v15 = vpop.f32.mrf.mxu2  ;;  %v3695_v31 = vadd.f32 %v1605_v60, %v1507_v17 }
 0x170   : > { %v1374_v0 = vadd.f32 %v1318_v15, %v998_v63 }
 0x171   : > { %2762 = vmatmul.msk.bf16.vlgmr.msra.gmra.mxu3 %vm675_vm4, %v3166_v45 }
 0x173   : > { %v1608_v55 = vpop.f32.mrf.mxu0 }
 0x174   : > { %v1452_v47 = vpop.f32.mrf.mxu3  ;;  %v1002_v48 = vpop.f32.mrf.mxu1 }
 0x175   : > { %v1508_v2 = vadd.f32 %v1452_v47, %v1374_v0  ;;  %v1003_v24 = vadd.f32 %v1002_v48, %v3371_v59 }
 0x176   : > { %2780 = vmatmul.msk.bf16.vlgmr.msra.gmra.mxu0 %vm675_vm4, %v3289_v52 }
 0x177   : > { %v1320_v39 = vpop.f32.mrf.mxu2  ;;  %2725 = vmatmul.msk.bf16.gmra.mxu1 %vm675_vm4, %v3289_v52  ;;  %v3704_v16 = vadd.f32 %v1608_v55, %v1508_v2 }
 0x178   : > { %v1375_v29 = vadd.f32 %v1320_v39, %v1000_v6 }
 0x17b   : > { %v1610_v18 = vpop.f32.mrf.mxu0 }
 0x17c   : > { %v1454_v34 = vpop.f32.mrf.mxu3  ;;  %2746 = vmatmul.msk.bf16.gmra.mxu2 %vm675_vm4, %v3295_v41  ;;  %v1004_v45 = vpop.f32.mrf.mxu1 }
 0x17d   : > { %v1509_v5 = vadd.f32 %v1454_v34, %v1375_v29  ;;  %v1005_v41 = vadd.f32 %v1004_v45, %v3389_v3 }
 0x17f   : > { %v1323_v61 = vpop.f32.mrf.mxu2  ;;  %v3709_v26 = vadd.f32 %v1610_v18, %v1509_v5 }
 0x180   : > { %v1376_v57 = vadd.f32 %v1323_v61, %v1003_v24 }
 0x181   : > { %2763 = vmatmul.msk.bf16.gmra.mxu3 %vm675_vm4, %v3256_v20 }
 0x183   : > { %v1613_v52 = vpop.f32.mrf.mxu0 }
 0x184   : > { %v1457_v51 = vpop.f32.mrf.mxu3  ;;  %v1007_v38 = vpop.f32.mrf.mxu1 }
 0x185   : > { %v1510_v60 = vadd.f32 %v1457_v51, %v1376_v57  ;;  %v1008_v0 = vadd.f32 %v1007_v38, %v3408_v23 }
 0x186   : > { %2781 = vmatmul.msk.bf16.gmra.mxu0 %vm675_vm4, %v3309_v40 }
 0x187   : > { %v1325_v9 = vpop.f32.mrf.mxu2  ;;  %2726 = vmatmul.msk.bf16.gmra.mxu1 %vm675_vm4, %v3309_v40  ;;  %v3718_v59 = vadd.f32 %v1613_v52, %v1510_v60 }
 0x188   : > { %v1377_v43 = vadd.f32 %v1325_v9, %v1005_v41 }
 0x18b   : > { %v1615_v17 = vpop.f32.mrf.mxu0 }
 0x18c   : > { %v1459_v63 = vpop.f32.mrf.mxu3  ;;  %2747 = vmatmul.msk.bf16.gmra.mxu2 %vm675_vm4, %v3317_v8  ;;  %v1009_v20 = vpop.f32.mrf.mxu1 }
 0x18d   : > { %v1511_v15 = vadd.f32 %v1459_v63, %v1377_v43  ;;  %v1010_v8 = vadd.f32 %v1009_v20, %v3429_v1  ;;  %v4170_v43 = vld [vmem:[#allocation18_spill] sm:$0xff]  ;;  %v4171_v63 = vld [vmem:[#allocation16_spill] sm:$0xff] }
 0x18f   : > { %v1328_v55 = vpop.f32.mrf.mxu2  ;;  %v3723_v47 = vadd.f32 %v1615_v17, %v1511_v15 }
 0x190   : > { %v1378_v3 = vadd.f32 %v1328_v55, %v1008_v0  ;;  %v4172_v55 = vld [vmem:[#allocation8_spill] sm:$0xff] }
 0x191   : > { %2764 = vmatmul.msk.bf16.gmra.mxu3 %vm675_vm4, %v2938_v62 }
 0x193   : > { %v1618_v40 = vpop.f32.mrf.mxu0 }
 0x194   : > { %v1462_v48 = vpop.f32.mrf.mxu3  ;;  %v1012_v2 = vpop.f32.mrf.mxu1 }
 0x195   : > { %v1512_v6 = vadd.f32 %v1462_v48, %v1378_v3  ;;  %v1013_v5 = vadd.f32 %v1012_v2, %v3451_v56  ;;  %v4173_v2 = vld [vmem:[#allocation21_spill] sm:$0xff] }
 0x196   : > { %2782 = vmatmul.msk.bf16.gmra.mxu0 %vm675_vm4, %v3337_v12 }
 0x197   : > { %v1330_v39 = vpop.f32.mrf.mxu2  ;;  %2727 = vmatmul.msk.bf16.gmra.mxu1 %vm675_vm4, %v3337_v12  ;;  %v3732_v23 = vadd.f32 %v1618_v40, %v1512_v6  ;;  %v4174_v6 = vld [vmem:[#allocation17_spill] sm:$0xff] }
 0x198   : > { %v1379_v29 = vadd.f32 %v1330_v39, %v1010_v8 }
 0x19b   : > { %v1620_v18 = vpop.f32.mrf.mxu0 }
 0x19c   : > { %v1464_v34 = vpop.f32.mrf.mxu3  ;;  %2748 = vmatmul.msk.bf16.gmra.mxu2 %vm675_vm4, %v3345_v27  ;;  %v1014_v62 = vpop.f32.mrf.mxu1 }
 0x19d   : > { %v1513_v45 = vadd.f32 %v1464_v34, %v1379_v29  ;;  %v1015_v27 = vadd.f32 %v1014_v62, %v3466_v44 }
 0x19f   : > { %v1333_v24 = vpop.f32.mrf.mxu2  ;;  %v3737_v61 = vadd.f32 %v1620_v18, %v1513_v45  ;;  %v4175_v45 = vld [vmem:[#allocation22_spill] sm:$0xff] }
 0x1a0   : > { %v1380_v1 = vadd.f32 %v1333_v24, %v1013_v5 }
 0x1a1   : > { %2765 = vmatmul.msk.bf16.gmra.mxu3 %vm675_vm4, %v3012_v37 }
 0x1a3   : > { %v1623_v12 = vpop.f32.mrf.mxu0 }
 0x1a4   : > { %v1467_v57 = vpop.f32.mrf.mxu3  ;;  %v1017_v52 = vpop.f32.mrf.mxu1 }
 0x1a5   : > { %v1514_v51 = vadd.f32 %v1467_v57, %v1380_v1  ;;  %v1018_v20 = vadd.f32 %v1017_v52, %v4171_v63  ;;  %v4176_v1 = vld [vmem:[#allocation19_spill] sm:$0xff] }
 0x1a6   : > { %2783 = vmatmul.msk.bf16.gmra.mxu0 %vm675_vm4, %v3369_v33 }
 0x1a7   : > { %v1335_v38 = vpop.f32.mrf.mxu2  ;;  %2728 = vmatmul.msk.bf16.gmra.mxu1 %vm675_vm4, %v3369_v33  ;;  %v3746_v56 = vadd.f32 %v1623_v12, %v1514_v51 }
 0x1a8   : > { %v1381_v60 = vadd.f32 %v1335_v38, %v1015_v27  ;;  %v4177_v27 = vld [vmem:[#allocation14_spill] sm:$0xff] }
 0x1ab   : > { %v1625_v41 = vpop.f32.mrf.mxu0 }
 0x1ac   : > { %v1469_v9 = vpop.f32.mrf.mxu3  ;;  %2749 = vmatmul.msk.bf16.gmra.mxu2 %vm675_vm4, %v4170_v43  ;;  %v1019_v37 = vpop.f32.mrf.mxu1  ;;  %v4178_v43 = vld [vmem:[#allocation24_spill] sm:$0xff] }
 0x1ad   : > { %v1515_v17 = vadd.f32 %v1469_v9, %v1381_v60  ;;  %v1020_v8 = vadd.f32 %v1019_v37, %v4174_v6  ;;  %v4179_v37 = vld [vmem:[#allocation20_spill] sm:$0xff] }
 0x1af   : > { %v1338_v15 = vpop.f32.mrf.mxu2  ;;  %v3751_v0 = vadd.f32 %v1625_v41, %v1515_v17 }
 0x1b0   : > { %v1382_v44 = vadd.f32 %v1338_v15, %v1018_v20 }
 0x1b1   : > { %2766 = vmatmul.msk.bf16.gmra.mxu3 %vm675_vm4, %v4172_v55 }
 0x1b3   : > { %v1628_v33 = vpop.f32.mrf.mxu0 }
 0x1b4   : > { %v1472_v3 = vpop.f32.mrf.mxu3  ;;  %v1022_v40 = vpop.f32.mrf.mxu1 }
 0x1b5   : > { %v1516_v48 = vadd.f32 %v1472_v3, %v1382_v44  ;;  %v1023_v12 = vadd.f32 %v1022_v40, %v4176_v1  ;;  %v4184_v1 = vld [vmem:[#allocation25_spill] sm:$0xff] }
 0x1b6   : > { %2784 = vmatmul.msk.bf16.gmra.mxu0 %vm675_vm4, %v4173_v2 }
 0x1b7   : > { %v1340_v39 = vpop.f32.mrf.mxu2  ;;  %2729 = vmatmul.msk.bf16.gmra.mxu1 %vm675_vm4, %v4173_v2  ;;  %v3760_v29 = vadd.f32 %v1628_v33, %v1516_v48  ;;  %v4180_v33 = vld [vmem:[#allocation26_spill] sm:$0xff]  ;;  %v4181_v48 = vld [vmem:[#allocation23_spill] sm:$0xff] }
 0x1b8   : > { %v1383_v18 = vadd.f32 %v1340_v39, %v1020_v8 }
 0x1bb   : > { %v1630_v34 = vpop.f32.mrf.mxu0 }
 0x1bc   : > { %v1474_v62 = vpop.f32.mrf.mxu3  ;;  %2750 = vmatmul.msk.bf16.gmra.mxu2 %vm675_vm4, %v4175_v45  ;;  %v1024_v5 = vpop.f32.mrf.mxu1 }
 0x1bd   : > { %v1517_v24 = vadd.f32 %v1474_v62, %v1383_v18  ;;  %v1025_v17 = vadd.f32 %v1024_v5, %v4179_v37  ;;  %v4182_v18 = vld [vmem:[#allocation2_spill] sm:$0xff] }
 0x1bf   : > { %v1343_v57 = vpop.f32.mrf.mxu2  ;;  %v3765_v52 = vadd.f32 %v1630_v34, %v1517_v24  ;;  %v4183_v24 = vld [vmem:[#allocation28_spill] sm:$0xff] }
 0x1c0   : > { %v1384_v51 = vadd.f32 %v1343_v57, %v1023_v12 }
 0x1c1   : > { %2767 = vmatmul.msk.bf16.gmra.mxu3 %vm675_vm4, %v4177_v27 }
 0x1c3   : > { %v1633_v38 = vpop.f32.mrf.mxu0 }
 0x1c4   : > { %v1477_v60 = vpop.f32.mrf.mxu3  ;;  %v1027_v41 = vpop.f32.mrf.mxu1 }
 0x1c5   : > { %v1518_v9 = vadd.f32 %v1477_v60, %v1384_v51  ;;  %v1028_v2 = vadd.f32 %v1027_v41, %v4181_v48 }
 0x1c6   : > { %2785 = vmatmul.msk.bf16.gmra.mxu0 %vm675_vm4, %v4178_v43 }
 0x1c7   : > { %v1345_v63 = vpop.f32.mrf.mxu2  ;;  %2730 = vmatmul.msk.bf16.gmra.mxu1 %vm675_vm4, %v4178_v43  ;;  %v3774_v20 = vadd.f32 %v1633_v38, %v1518_v9  ;;  %v4185_v43 = vld [vmem:[#allocation27_spill] sm:$0xff] }
 0x1c8   : > { %v1385_v15 = vadd.f32 %v1345_v63, %v1025_v17 }
 0x1cb   : > { %v1635_v44 = vpop.f32.mrf.mxu0 }
 0x1cc   : > { %v1479_v55 = vpop.f32.mrf.mxu3  ;;  %2751 = vmatmul.msk.bf16.gmra.mxu2 %vm675_vm4, %v4180_v33  ;;  %v1029_v3 = vpop.f32.mrf.mxu1 }
 0x1cd   : > { %v1519_v40 = vadd.f32 %v1479_v55, %v1385_v15  ;;  %v1030_v12 = vadd.f32 %v1029_v3, %v4184_v1 }
 0x1cf   : > { %v1348_v6 = vpop.f32.mrf.mxu2  ;;  %v3779_v8 = vadd.f32 %v1635_v44, %v1519_v40  ;;  %v4186_v40 = vld [vmem:[#allocation29_spill] sm:$0xff] }
 0x1d0   : > { %v1386_v39 = vadd.f32 %v1348_v6, %v1028_v2 }
 0x1d1   : > { %2768 = vmatmul.msk.bf16.gmra.mxu3 %vm675_vm4, %v4182_v18 }
 0x1d3   : > { %v1638_v34 = vpop.f32.mrf.mxu0 }
 0x1d4   : > { %v1482_v62 = vpop.f32.mrf.mxu3  ;;  %v1032_v45 = vpop.f32.mrf.mxu1 }
 0x1d5   : > { %v1520_v5 = vadd.f32 %v1482_v62, %v1386_v39  ;;  %v1033_v37 = vadd.f32 %v1032_v45, %v4185_v43 }
 0x1d6   : > { %2786 = vmatmul.msk.bf16.gmra.mxu0 %vm675_vm4, %v4183_v24 }
 0x1d7   : > { %v1350_v57 = vpop.f32.mrf.mxu2  ;;  %2731 = vmatmul.msk.bf16.gmra.mxu1 %vm675_vm4, %v4183_v24  ;;  %v3788_v51 = vadd.f32 %v1638_v34, %v1520_v5 }
 0x1d8   : > { %v1387_v27 = vadd.f32 %v1350_v57, %v1030_v12 }
 0x1db   : > { %v1640_v38 = vpop.f32.mrf.mxu0 }
 0x1dc   : > { %v1484_v60 = vpop.f32.mrf.mxu3  ;;  %2752 = vmatmul.msk.bf16.gmra.mxu2 %vm675_vm4, %v3481_v19  ;;  %v1034_v41 = vpop.f32.mrf.mxu1 }
 0x1dd   : > { %v1521_v9 = vadd.f32 %v1484_v60, %v1387_v27  ;;  %v1035_v19 = vadd.f32 %v1034_v41, %v4186_v40 }
 0x1df   : > { %v1353_v17 = vpop.f32.mrf.mxu2  ;;  %v3793_v63 = vadd.f32 %v1640_v38, %v1521_v9 }
 0x1e0   : > { %v1388_v15 = vadd.f32 %v1353_v17, %v1033_v37 }
 0x1e1   : > { %2769 = vmatmul.msk.bf16.gmra.mxu3 %vm675_vm4, %v3037_v4 }
 0x1e3   : > { %v1643_v44 = vpop.f32.mrf.mxu0 }
 0x1e4   : > { %v1487_v55 = vpop.f32.mrf.mxu3  ;;  %v1708_v33 = vpop.f32.mrf.mxu1 }
 0x1e5   : > { %v1522_v3 = vadd.f32 %v1487_v55, %v1388_v15  ;;  %v1788_v62 = vadd.f32 %v1708_v33, %v3496_v32  ;;  %v4187_v55 = vld [vmem:[#allocation15_spill] sm:$0xff] }
 0x1e6   : > { %2787 = vmatmul.msk.bf16.gmra.mxu0 %vm675_vm4, %v3498_v10 }
 0x1e7   : > { %v1355_v48 = vpop.f32.mrf.mxu2  ;;  %2732 = vmatmul.msk.bf16.gmra.mxu1 %vm675_vm4, %v3498_v10  ;;  %v3802_v2 = vadd.f32 %v1643_v44, %v1522_v3 }
 0x1e8   : > { %v1389_v6 = vadd.f32 %v1355_v48, %v1035_v19 }
 0x1eb   : > { %v1645_v39 = vpop.f32.mrf.mxu0 }
 0x1ec   : > { %v1489_v18 = vpop.f32.mrf.mxu3  ;;  %2753 = vmatmul.msk.bf16.gmra.mxu2 %vm675_vm4, %v3505_v42  ;;  %v1710_v4 = vpop.f32.mrf.mxu1 }
 0x1ed   : > { %v1523_v34 = vadd.f32 %v1489_v18, %v1389_v6  ;;  %v1789_v42 = vadd.f32 %v1710_v4, %v3509_v35  ;;  %v4188_v18 = vld [vmem:[#allocation31_spill] sm:$0xff] }
 0x1ef   : > { %v1842_v45 = vpop.f32.mrf.mxu2  ;;  %v3807_v5 = vadd.f32 %v1645_v39, %v1523_v34  ;;  %v4189_v34 = vld [vmem:[#allocation9_spill] sm:$0xff] }
 0x1f0   : > { %v1922_v24 = vadd.f32 %v1842_v45, %v1788_v62 }
 0x1f1   : > { %2770 = vmatmul.msk.bf16.gmra.mxu3 %vm675_vm4, %v3122_v25 }
 0x1f3   : > { %v2138_v10 = vpop.f32.mrf.mxu0 }
 0x1f4   : > { %v1998_v1 = vpop.f32.mrf.mxu3  ;;  %v1713_v12 = vpop.f32.mrf.mxu1 }
 0x1f5   : > { %v2078_v57 = vadd.f32 %v1998_v1, %v1922_v24  ;;  %v1790_v17 = vadd.f32 %v1713_v12, %v3522_v21 }
 0x1f6   : > { %2788 = vmatmul.msk.bf16.gmra.mxu0 %vm675_vm4, %v3524_v13 }
 0x1f7   : > { %v2218_v32 = vadd.f32 %v2138_v10, %v2078_v57  ;;  %v1844_v25 = vpop.f32.mrf.mxu2  ;;  %2733 = vmatmul.msk.bf16.gmra.mxu1 %vm675_vm4, %v3524_v13 }
 0x1f8   : > { %v1923_v27 = vadd.f32 %v1844_v25, %v1789_v42 }
 0x1f9   : > { %2250 = vst.msk [vmem:[%s3817_s14] sm:$0xff] %vm675_vm4, %v2218_v32  ;;  %v2351_v43 = vmul.f32 %v2218_v32, %v2218_v32  ;;  %v2282_v35 = vsel %vm675_vm4, %v2218_v32, 0.0 }
 0x1fb   : > { %v2140_v38 = vpop.f32.mrf.mxu0  ;;  %v2383_v3 = vsel %vm675_vm4, %v2351_v43, 0.0 }
 0x1fc   : > { %v2000_v60 = vpop.f32.mrf.mxu3  ;;  %2754 = vmatmul.msk.bf16.gmra.mxu2 %vm675_vm4, %v3531_v50  ;;  %v1715_v41 = vpop.f32.mrf.mxu1 }
 0x1fd   : > { %v2079_v9 = vadd.f32 %v2000_v60, %v1923_v27  ;;  %v1791_v62 = vadd.f32 %v1715_v41, %v4189_v34  ;;  %v4190_v27 = vld [vmem:[#allocation32_spill] sm:$0xff] }
 0x1ff   : > { %v2219_v37 = vadd.f32 %v2140_v38, %v2079_v9  ;;  %v1847_v15 = vpop.f32.mrf.mxu2  ;;  %v4191_v9 = vld [vmem:[#allocation30_spill] sm:$0xff] }
 0x200   : > { %v1924_v33 = vadd.f32 %v1847_v15, %v1790_v17 }
 0x201   : > { %2251 = vst.msk [vmem:[%s3817_s14 + $0x8] sm:$0xff] %vm675_vm4, %v2219_v37  ;;  %v2283_v13 = vsel %vm675_vm4, %v2219_v37, 0.0  ;;  %v2352_v44 = vmul.f32 %v2219_v37, %v2219_v37  ;;  %2771 = vmatmul.msk.bf16.gmra.mxu3 %vm675_vm4, %v4187_v55 }
 0x202   : > { %v2284_v50 = vadd.f32 %v2283_v13, %v2282_v35  ;;  %v4192_v35 = vld [vmem:[#allocation3_spill] sm:$0xff] }
 0x203   : > { %v2384_v40 = vsel %vm675_vm4, %v2352_v44, 0.0  ;;  %v2143_v19 = vpop.f32.mrf.mxu0 }
 0x204   : > { %v2385_v21 = vadd.f32 %v2384_v40, %v2383_v3  ;;  %v2003_v48 = vpop.f32.mrf.mxu3  ;;  %v1718_v6 = vpop.f32.mrf.mxu1 }
 0x205   : > { %v2080_v39 = vadd.f32 %v2003_v48, %v1924_v33  ;;  %v1792_v43 = vadd.f32 %v1718_v6, %v4191_v9  ;;  %v4194_v6 = vld [vmem:[#allocation33_spill] sm:$0xff] }
 0x206   : > { %2789 = vmatmul.msk.bf16.gmra.mxu0 %vm675_vm4, %v4188_v18 }
 0x207   : > { %v2220_v4 = vadd.f32 %v2143_v19, %v2080_v39  ;;  %v1849_v45 = vpop.f32.mrf.mxu2  ;;  %2734 = vmatmul.msk.bf16.gmra.mxu1 %vm675_vm4, %v4188_v18 }
 0x208   : > { %v1925_v1 = vadd.f32 %v1849_v45, %v1791_v62 }
 0x209   : > { %2252 = vst.msk [vmem:[%s3817_s14 + $0x10] sm:$0xff] %vm675_vm4, %v2220_v4  ;;  %v2285_v24 = vsel %vm675_vm4, %v2220_v4, 0.0  ;;  %v2353_v10 = vmul.f32 %v2220_v4, %v2220_v4 }
 0x20a   : > { %v2286_v12 = vadd.f32 %v2285_v24, %v2284_v50 }
 0x20b   : > { %v2386_v57 = vsel %vm675_vm4, %v2353_v10, 0.0  ;;  %v2145_v32 = vpop.f32.mrf.mxu0 }
 0x20c   : > { %v2387_v42 = vadd.f32 %v2386_v57, %v2385_v21  ;;  %v2005_v25 = vpop.f32.mrf.mxu3  ;;  %2755 = vmatmul.msk.bf16.gmra.mxu2 %vm675_vm4, %v4190_v27  ;;  %v1720_v38 = vpop.f32.mrf.mxu1  ;;  %v4193_v21 = vld [vmem:[#allocation35_spill] sm:$0xff]  ;;  %v4195_v57 = vld [vmem:[#allocation36_spill] sm:$0xff]  ;;  %v4196_v27 = vld [vmem:[#allocation34_spill] sm:$0xff] }
 0x20d   : > { %v2081_v60 = vadd.f32 %v2005_v25, %v1925_v1  ;;  %v1793_v39 = vadd.f32 %v1720_v38, %v4194_v6 }
 0x20f   : > { %v2221_v41 = vadd.f32 %v2145_v32, %v2081_v60  ;;  %v1852_v37 = vpop.f32.mrf.mxu2 }
 0x210   : > { %v1926_v13 = vadd.f32 %v1852_v37, %v1792_v43  ;;  %v4197_v43 = vld [vmem:[#allocation4_spill] sm:$0xff] }
 0x211   : > { %2253 = vst.msk [vmem:[%s3817_s14 + $0x18] sm:$0xff] %vm675_vm4, %v2221_v41  ;;  %v2287_v17 = vsel %vm675_vm4, %v2221_v41, 0.0  ;;  %v2354_v15 = vmul.f32 %v2221_v41, %v2221_v41  ;;  %2772 = vmatmul.msk.bf16.gmra.mxu3 %vm675_vm4, %v4192_v35 }
 0x212   : > { %v2288_v44 = vadd.f32 %v2287_v17, %v2286_v12 }
 0x213   : > { %v2388_v55 = vsel %vm675_vm4, %v2354_v15, 0.0  ;;  %v2148_v33 = vpop.f32.mrf.mxu0 }
 0x214   : > { %v2389_v50 = vadd.f32 %v2388_v55, %v2387_v42  ;;  %v2008_v3 = vpop.f32.mrf.mxu3  ;;  %v1723_v40 = vpop.f32.mrf.mxu1 }
 0x215   : > { %v2082_v19 = vadd.f32 %v2008_v3, %v1926_v13  ;;  %v1794_v38 = vadd.f32 %v1723_v40, %v4196_v27  ;;  %v4199_v40 = vld [vmem:[#allocation37_spill] sm:$0xff] }
 0x216   : > { %2790 = vmatmul.msk.bf16.gmra.mxu0 %vm675_vm4, %v4193_v21 }
 0x217   : > { %v2222_v48 = vadd.f32 %v2148_v33, %v2082_v19  ;;  %v1854_v18 = vpop.f32.mrf.mxu2  ;;  %2735 = vmatmul.msk.bf16.gmra.mxu1 %vm675_vm4, %v4193_v21 }
 0x218   : > { %v1927_v62 = vadd.f32 %v1854_v18, %v1793_v39 }
 0x219   : > { %2254 = vst.msk [vmem:[%s3817_s14 + $0x20] sm:$0xff] %vm675_vm4, %v2222_v48  ;;  %v2289_v4 = vsel %vm675_vm4, %v2222_v48, 0.0  ;;  %v2355_v34 = vmul.f32 %v2222_v48, %v2222_v48 }
 0x21a   : > { %v2290_v45 = vadd.f32 %v2289_v4, %v2288_v44 }
 0x21b   : > { %v2390_v24 = vsel %vm675_vm4, %v2355_v34, 0.0  ;;  %v2150_v10 = vpop.f32.mrf.mxu0 }
 0x21c   : > { %v2391_v1 = vadd.f32 %v2390_v24, %v2389_v50  ;;  %v2010_v12 = vpop.f32.mrf.mxu3  ;;  %2756 = vmatmul.msk.bf16.gmra.mxu2 %vm675_vm4, %v4195_v57  ;;  %v1725_v32 = vpop.f32.mrf.mxu1  ;;  %v4198_v50 = vld [vmem:[#allocation39_spill] sm:$0xff]  ;;  %v4200_v24 = vld [vmem:[#allocation6_spill] sm:$0xff] }
 0x21d   : > { %v2083_v42 = vadd.f32 %v2010_v12, %v1927_v62  ;;  %v1795_v19 = vadd.f32 %v1725_v32, %v4199_v40  ;;  %v4201_v57 = vld [vmem:[#allocation38_spill] sm:$0xff] }
 0x21f   : > { %v2223_v25 = vadd.f32 %v2150_v10, %v2083_v42  ;;  %v1857_v60 = vpop.f32.mrf.mxu2 }
 0x220   : > { %v1928_v37 = vadd.f32 %v1857_v60, %v1794_v38  ;;  %v4202_v38 = vld [vmem:[#allocation10_spill] sm:$0xff] }
 0x221   : > { %2255 = vst.msk [vmem:[%s3817_s14 + $0x28] sm:$0xff] %vm675_vm4, %v2223_v25  ;;  %v2291_v41 = vsel %vm675_vm4, %v2223_v25, 0.0  ;;  %v2356_v9 = vmul.f32 %v2223_v25, %v2223_v25  ;;  %2773 = vmatmul.msk.bf16.gmra.mxu3 %vm675_vm4, %v4197_v43 }
 0x222   : > { %v2292_v17 = vadd.f32 %v2291_v41, %v2290_v45 }
 0x223   : > { %v2392_v15 = vsel %vm675_vm4, %v2356_v9, 0.0  ;;  %v2153_v35 = vpop.f32.mrf.mxu0 }
 0x224   : > { %v2393_v13 = vadd.f32 %v2392_v15, %v2391_v1  ;;  %v2013_v44 = vpop.f32.mrf.mxu3  ;;  %v1728_v55 = vpop.f32.mrf.mxu1 }
 0x225   : > { %v2084_v33 = vadd.f32 %v2013_v44, %v1928_v37  ;;  %v1796_v32 = vadd.f32 %v1728_v55, %v4201_v57  ;;  %v4204_v55 = vld [vmem:[#allocation7_spill] sm:$0xff] }
 0x226   : > { %2791 = vmatmul.msk.bf16.gmra.mxu0 %vm675_vm4, %v4198_v50 }
 0x227   : > { %v2224_v3 = vadd.f32 %v2153_v35, %v2084_v33  ;;  %v1859_v21 = vpop.f32.mrf.mxu2  ;;  %2736 = vmatmul.msk.bf16.gmra.mxu1 %vm675_vm4, %v4198_v50 }
 0x228   : > { %v1929_v39 = vadd.f32 %v1859_v21, %v1795_v19 }
 0x229   : > { %2256 = vst.msk [vmem:[%s3817_s14 + $0x30] sm:$0xff] %vm675_vm4, %v2224_v3  ;;  %v2293_v48 = vsel %vm675_vm4, %v2224_v3, 0.0  ;;  %v2357_v6 = vmul.f32 %v2224_v3, %v2224_v3 }
 0x22a   : > { %v2294_v18 = vadd.f32 %v2293_v48, %v2292_v17 }
 0x22b   : > { %v2394_v4 = vsel %vm675_vm4, %v2357_v6, 0.0  ;;  %v2155_v34 = vpop.f32.mrf.mxu0 }
 0x22c   : > { %v2395_v62 = vadd.f32 %v2394_v4, %v2393_v13  ;;  %v2015_v45 = vpop.f32.mrf.mxu3  ;;  %2757 = vmatmul.msk.bf16.gmra.mxu2 %vm675_vm4, %v4200_v24  ;;  %v1730_v10 = vpop.f32.mrf.mxu1  ;;  %v4203_v13 = vld [vmem:[#allocation41_spill] sm:$0xff] }
 0x22d   : > { %v2085_v1 = vadd.f32 %v2015_v45, %v1929_v39  ;;  %v1797_v33 = vadd.f32 %v1730_v10, %v4204_v55  ;;  %v4205_v45 = vld [vmem:[#allocation40_spill] sm:$0xff] }
 0x22f   : > { %v2225_v12 = vadd.f32 %v2155_v34, %v2085_v1  ;;  %v1862_v42 = vpop.f32.mrf.mxu2 }
 0x230   : > { %v1930_v60 = vadd.f32 %v1862_v42, %v1796_v32  ;;  %v3907_v32 = vld [vmem:[%s2899_s27 + $0xcc] sm:$0xf] }
 0x231   : > { %2257 = vst.msk [vmem:[%s3817_s14 + $0x38] sm:$0xff] %vm675_vm4, %v2225_v12  ;;  %v2295_v25 = vsel %vm675_vm4, %v2225_v12, 0.0  ;;  %v2358_v27 = vmul.f32 %v2225_v12, %v2225_v12  ;;  %2774 = vmatmul.msk.bf16.gmra.mxu3 %vm675_vm4, %v4202_v38 }
 0x232   : > { %v2296_v41 = vadd.f32 %v2295_v25, %v2294_v18 }
 0x233   : > { %v2396_v9 = vsel %vm675_vm4, %v2358_v27, 0.0  ;;  %v2158_v43 = vpop.f32.mrf.mxu0  ;;  %v4206_v27 = vld [vmem:[#allocation42_spill] sm:$0xff] }
 0x234   : > { %v2397_v37 = vadd.f32 %v2396_v9, %v2395_v62  ;;  %v2018_v17 = vpop.f32.mrf.mxu3  ;;  %v1733_v15 = vpop.f32.mrf.mxu1  ;;  %v1683_v38 = vrot.slane %v4206_v27, 5 }
 0x235   : > { %v2086_v35 = vadd.f32 %v2018_v17, %v1930_v60  ;;  %v1798_v24 = vadd.f32 %v1733_v15, %v4205_v45  ;;  %v3912_v60 = vld [vmem:[%s2899_s27 + $0xd0] sm:$0xf]  ;;  %v4207_v15 = vld [vmem:[#allocation5_spill] sm:$0xff]  ;;  %v236_v45 = vld [vmem:[%s2899_s27 + $0xd4] sm:$0x1] }
 0x236   : > { %2792 = vmatmul.msk.bf16.gmra.mxu0 %vm675_vm4, %v4203_v13  ;;  %v1974_v27 = vshll.u32 %v236_v45, 16 }
 0x237   : > { %v2226_v44 = vadd.f32 %v2158_v43, %v2086_v35  ;;  %v1864_v50 = vpop.f32.mrf.mxu2  ;;  %2737 = vmatmul.msk.bf16.gmra.mxu1 %vm675_vm4, %v4203_v13  ;;  %v2722_v35 = vrot.slane %v4207_v15, 9  ;;  %v1964_v13 = vshll.u32 %v3912_v60, 16 }
 0x238   : > { %v1931_v19 = vadd.f32 %v1864_v50, %v1797_v33 }
 0x239   : > { %2258 = vst.msk [vmem:[%s3817_s14 + $0x40] sm:$0xff] %vm675_vm4, %v2226_v44  ;;  %v2297_v3 = vsel %vm675_vm4, %v2226_v44, 0.0  ;;  %v2359_v40 = vmul.f32 %v2226_v44, %v2226_v44  ;;  %v1968_v44 = vshrl.u32 %v3912_v60, 16 }
 0x23a   : > { %v2298_v21 = vadd.f32 %v2297_v3, %v2296_v41  ;;  %v1685_v3 = vrot.slane %v1683_v38, 4 }
 0x23b   : > { %v2398_v48 = vsel %vm675_vm4, %v2359_v40, 0.0  ;;  %v2160_v6 = vpop.f32.mrf.mxu0  ;;  %v1686_v40 = vrot.slane %v3651_v11, 5 }
 0x23c   : > { %v2399_v39 = vadd.f32 %v2398_v48, %v2397_v37  ;;  %v2020_v18 = vpop.f32.mrf.mxu3  ;;  %2758 = vmatmul.msk.bf16.gmra.mxu2 %vm675_vm4, %v3644_v30  ;;  %v1735_v4 = vpop.f32.mrf.mxu1  ;;  %v1955_v37 = vshrl.u32 %v3907_v32, 16 }
 0x23d   : > { %v2087_v34 = vadd.f32 %v2020_v18, %v1931_v19  ;;  %v1799_v33 = vadd.f32 %v1735_v4, %v3648_v49  ;;  %v1687_v11 = vsel %vm3229_vm7, %v1685_v3, %v1686_v40 }
 0x23e   : > { %v1957_v19 = vrot.slane %v1955_v37, 4 }
 0x23f   : > { %v2227_v62 = vadd.f32 %v2160_v6, %v2087_v34  ;;  %v1867_v10 = vpop.f32.mrf.mxu2  ;;  %v1966_v34 = vrot.slane %v1964_v13, 5 }
 0x240   : > { %v1932_v57 = vadd.f32 %v1867_v10, %v1798_v24 }
 0x241   : > { %2259 = vst.msk [vmem:[%s3817_s14 + $0x48] sm:$0xff] %vm675_vm4, %v2227_v62  ;;  %v2299_v1 = vsel %vm675_vm4, %v2227_v62, 0.0  ;;  %v2360_v12 = vmul.f32 %v2227_v62, %v2227_v62  ;;  %2775 = vmatmul.msk.bf16.gmra.mxu3 %vm675_vm4, %v3238_v53  ;;  %v1958_v53 = vshll.u32 %v3907_v32, 16  ;;  %v1970_v62 = vrot.slane %v1968_v44, 4 }
 0x242   : > { %v2300_v42 = vadd.f32 %v2299_v1, %v2298_v21  ;;  %v1976_v44 = vrot.slane %v1974_v27, 5 }
 0x243   : > { %v2400_v30 = vsel %vm675_vm4, %v2360_v12, 0.0  ;;  %v2163_v25 = vpop.f32.mrf.mxu0 }
 0x244   : > { %v2401_v41 = vadd.f32 %v2400_v30, %v2399_v39  ;;  %v2023_v9 = vpop.f32.mrf.mxu3  ;;  %v1738_v43 = vpop.f32.mrf.mxu1  ;;  %v1960_v39 = vrot.slane %v1958_v53, 5  ;;  %v1691_v30 = vunpack.c.l.b16 %v1687_v11 }
 0x245   : > { %v2088_v17 = vadd.f32 %v2023_v9, %v1932_v57 }
 0x246   : > { %2793 = vmatmul.msk.bf16.gmra.mxu0 %vm675_vm4, %v3667_v46  ;;  %v1961_v57 = vor.u32 %v1960_v39, %v1957_v19 }
 0x247   : > { %v2228_v55 = vadd.f32 %v2163_v25, %v2088_v17  ;;  %v1869_v50 = vpop.f32.mrf.mxu2  ;;  %2738 = vmatmul.msk.bf16.gmra.mxu1 %vm675_vm4, %v3667_v46  ;;  %v1684_v46 = vsel %vm3229_vm7, %v2722_v35, %v1683_v38  ;;  %v1971_v25 = vor.u32 %v1970_v62, %v1966_v34  ;;  %v1800_v38 = vadd.f32 %v1738_v43, %v3665_v7  ;;  %v2816_v62 = vld [vmem:[%s2899_s27 + $0xcc] sm:$0xff] }
 0x248   : > { %v1933_v6 = vadd.f32 %v1869_v50, %v1799_v33  ;;  %v1962_v53 = vrot.slane %v1961_v57, 4  ;;  %v2113_v7 = vrot.slane %v3912_v60, 5 }
 0x249   : > { %2260 = vst.msk [vmem:[%s3817_s14 + $0x50] sm:$0xff] %vm675_vm4, %v2228_v55  ;;  %v2301_v21 = vsel %vm675_vm4, %v2228_v55, 0.0  ;;  %v2361_v48 = vmul.f32 %v2228_v55, %v2228_v55  ;;  %v1972_v13 = vrot.slane %v1971_v25, 4 }
 0x24a   : > { %v2302_v18 = vadd.f32 %v2301_v21, %v2300_v42  ;;  %v1690_v42 = vunpack.c.l.b16 %v1684_v46  ;;  %v2778_v21 = vrot.slane %v3907_v32, 9  ;;  %v2115_v60 = vrot.slane %v2113_v7, 4 }
 0x24b   : > { %v2402_v49 = vsel %vm675_vm4, %v2361_v48, 0.0  ;;  %v2165_v4 = vpop.f32.mrf.mxu0  ;;  %v1977_v19 = vsel %vm2926_vm3, %v1972_v13, %v1976_v44 }
 0x24c   : > { %v2403_v24 = vadd.f32 %v2402_v49, %v2401_v41  ;;  %v2025_v10 = vpop.f32.mrf.mxu3  ;;  %2759 = vmatmul.msk.bf16.gmra.mxu2 %vm675_vm4, %v3676_v54  ;;  %v1740_v1 = vpop.f32.mrf.mxu1  ;;  %v1692_v35 = vpack.c.b16 %v1691_v30, %v1690_v42  ;;  %v1981_v36 = vunpack.c.l.b16 %v1977_v19 }
 0x24d   : > { %v2089_v12 = vadd.f32 %v2025_v10, %v1933_v6  ;;  %v1801_v6 = vadd.f32 %v1740_v1, %v3679_v28  ;;  %v2114_v28 = vsel %vm3229_vm7, %v2778_v21, %v2113_v7 }
 0x24e   : > { %v2120_v30 = vunpack.c.l.b16 %v2114_v28 }
 0x24f   : > { %v2229_v9 = vadd.f32 %v2165_v4, %v2089_v12  ;;  %v1872_v37 = vpop.f32.mrf.mxu2 }
 0x250   : > { %v1934_v54 = vadd.f32 %v1872_v37, %v1800_v38 }
 0x251   : > { %2261 = vst.msk [vmem:[%s3817_s14 + $0x58] sm:$0xff] %vm675_vm4, %v2229_v9  ;;  %v2303_v17 = vsel %vm675_vm4, %v2229_v9, 0.0  ;;  %v2362_v41 = vmul.f32 %v2229_v9, %v2229_v9  ;;  %2776 = vmatmul.msk.bf16.gmra.mxu3 %vm675_vm4, %v3683_v22  ;;  %v1967_v22 = vsel %vm2926_vm3, %v1962_v53, %v1966_v34 }
 0x252   : > { %v2304_v15 = vadd.f32 %v2303_v17, %v2302_v18  ;;  %v2116_v18 = vrot.slane %v236_v45, 5  ;;  %v1980_v49 = vunpack.c.l.b16 %v1967_v22 }
 0x253   : > { %v2404_v55 = vsel %vm675_vm4, %v2362_v41, 0.0  ;;  %v2168_v33 = vpop.f32.mrf.mxu0 }
 0x254   : > { %v2405_v43 = vadd.f32 %v2404_v55, %v2403_v24  ;;  %v2028_v50 = vpop.f32.mrf.mxu3  ;;  %v1743_v3 = vpop.f32.mrf.mxu1  ;;  %v2117_v45 = vsel %vm3229_vm7, %v2115_v60, %v2116_v18  ;;  %v1982_v42 = vpack.c.b16 %v1981_v36, %v1980_v49 }
 0x255   : > { %v2090_v40 = vadd.f32 %v2028_v50, %v1934_v54  ;;  %v2121_v25 = vunpack.c.l.b16 %v2117_v45  ;;  %v1802_v9 = vadd.f32 %v1743_v3, %v3690_v58 }
 0x256   : > { %2794 = vmatmul.msk.bf16.gmra.mxu0 %vm675_vm4, %v1692_v35 }
 0x257   : > { %v2230_v48 = vadd.f32 %v2168_v33, %v2090_v40  ;;  %v1874_v39 = vpop.f32.mrf.mxu2  ;;  %2739 = vmatmul.msk.bf16.gmra.mxu1 %vm675_vm4, %v1692_v35  ;;  %v2122_v54 = vpack.c.b16 %v2121_v25, %v2120_v30 }
 0x258   : > { %v1935_v46 = vadd.f32 %v1874_v39, %v1801_v6 }
 0x259   : > { %2262 = vst.msk [vmem:[%s3817_s14 + $0x60] sm:$0xff] %vm675_vm4, %v2230_v48  ;;  %v2305_v34 = vsel %vm675_vm4, %v2230_v48, 0.0  ;;  %v2363_v4 = vmul.f32 %v2230_v48, %v2230_v48 }
 0x25a   : > { %v2306_v11 = vadd.f32 %v2305_v34, %v2304_v15 }
 0x25b   : > { %v2406_v32 = vsel %vm675_vm4, %v2363_v4, 0.0  ;;  %v2170_v24 = vpop.f32.mrf.mxu0 }
 0x25c   : > { %v2407_v10 = vadd.f32 %v2406_v32, %v2405_v43  ;;  %v2030_v1 = vpop.f32.mrf.mxu3  ;;  %2760 = vmatmul.msk.bf16.gmra.mxu2 %vm675_vm4, %v2816_v62  ;;  %v1745_v12 = vpop.f32.mrf.mxu1 }
 0x25d   : > { %v2091_v57 = vadd.f32 %v2030_v1, %v1935_v46  ;;  %v1803_v33 = vadd.f32 %v1745_v12, %v3695_v31 }
 0x25f   : > { %v2231_v27 = vadd.f32 %v2170_v24, %v2091_v57  ;;  %v1877_v38 = vpop.f32.mrf.mxu2 }
 0x260   : > { %v1936_v17 = vadd.f32 %v1877_v38, %v1802_v9 }
 0x261   : > { %2263 = vst.msk [vmem:[%s3817_s14 + $0x68] sm:$0xff] %vm675_vm4, %v2231_v27  ;;  %v2307_v37 = vsel %vm675_vm4, %v2231_v27, 0.0  ;;  %v2364_v14 = vmul.f32 %v2231_v27, %v2231_v27  ;;  %2777 = vmatmul.msk.bf16.gmra.mxu3 %vm675_vm4, %v1982_v42 }
 0x262   : > { %v2308_v41 = vadd.f32 %v2307_v37, %v2306_v11 }
 0x263   : > { %v2408_v53 = vsel %vm675_vm4, %v2364_v14, 0.0  ;;  %v2173_v15 = vpop.f32.mrf.mxu0 }
 0x264   : > { %v2409_v35 = vadd.f32 %v2408_v53, %v2407_v10  ;;  %v2033_v13 = vpop.f32.mrf.mxu3  ;;  %v1748_v44 = vpop.f32.mrf.mxu1 }
 0x265   : > { %v2092_v55 = vadd.f32 %v2033_v13, %v1936_v17  ;;  %v1804_v18 = vadd.f32 %v1748_v44, %v3704_v16 }
 0x266   : > { %2795 = vmatmul.msk.bf16.gmra.mxu0 %vm675_vm4, %v2122_v54 }
 0x267   : > { %v2232_v58 = vadd.f32 %v2173_v15, %v2092_v55  ;;  %v1879_v7 = vpop.f32.mrf.mxu2 }
 0x268   : > { %v1937_v3 = vadd.f32 %v1879_v7, %v1803_v33 }
 0x269   : > { %2264 = vst.msk [vmem:[%s3817_s14 + $0x70] sm:$0xff] %vm675_vm4, %v2232_v58  ;;  %v2309_v43 = vsel %vm675_vm4, %v2232_v58, 0.0  ;;  %v2365_v50 = vmul.f32 %v2232_v58, %v2232_v58 }
 0x26a   : > { %v2310_v40 = vadd.f32 %v2309_v43, %v2308_v41 }
 0x26b   : > { %v2410_v22 = vsel %vm675_vm4, %v2365_v50, 0.0  ;;  %v2175_v19 = vpop.f32.mrf.mxu0 }
 0x26c   : > { %v2411_v21 = vadd.f32 %v2410_v22, %v2409_v35  ;;  %v2035_v48 = vpop.f32.mrf.mxu3  ;;  %v1750_v6 = vpop.f32.mrf.mxu1 }
 0x26d   : > { %v2093_v39 = vadd.f32 %v2035_v48, %v1937_v3  ;;  %v1805_v10 = vadd.f32 %v1750_v6, %v3709_v26 }
 0x26f   : > { %v2233_v60 = vadd.f32 %v2175_v19, %v2093_v39  ;;  %v1882_v31 = vpop.f32.mrf.mxu2 }
 0x270   : > { %v1938_v34 = vadd.f32 %v1882_v31, %v1804_v18 }
 0x271   : > { %2265 = vst.msk [vmem:[%s3817_s14 + $0x78] sm:$0xff] %vm675_vm4, %v2233_v60  ;;  %v2311_v62 = vsel %vm675_vm4, %v2233_v60, 0.0  ;;  %v2366_v49 = vmul.f32 %v2233_v60, %v2233_v60 }
 0x272   : > { %v2312_v4 = vadd.f32 %v2311_v62, %v2310_v40 }
 0x273   : > { %v2412_v46 = vsel %vm675_vm4, %v2366_v49, 0.0  ;;  %v2178_v36 = vpop.f32.mrf.mxu0 }
 0x274   : > { %v2413_v11 = vadd.f32 %v2412_v46, %v2411_v21  ;;  %v2038_v32 = vpop.f32.mrf.mxu3  ;;  %v1753_v24 = vpop.f32.mrf.mxu1 }
 0x275   : > { %v2094_v28 = vadd.f32 %v2038_v32, %v1938_v34  ;;  %v1806_v17 = vadd.f32 %v1753_v24, %v3718_v59 }
 0x277   : > { %v2234_v45 = vadd.f32 %v2178_v36, %v2094_v28  ;;  %v1884_v16 = vpop.f32.mrf.mxu2 }
 0x278   : > { %v1939_v57 = vadd.f32 %v1884_v16, %v1805_v10 }
 0x279   : > { %2266 = vst.msk [vmem:[%s3817_s14 + $0x80] sm:$0xff] %vm675_vm4, %v2234_v45  ;;  %v2313_v1 = vsel %vm675_vm4, %v2234_v45, 0.0  ;;  %v2367_v12 = vmul.f32 %v2234_v45, %v2234_v45 }
 0x27a   : > { %v2314_v42 = vadd.f32 %v2313_v1, %v2312_v4 }
 0x27b   : > { %v2414_v30 = vsel %vm675_vm4, %v2367_v12, 0.0  ;;  %v2180_v25 = vpop.f32.mrf.mxu0 }
 0x27c   : > { %v2415_v27 = vadd.f32 %v2414_v30, %v2413_v11  ;;  %v2040_v9 = vpop.f32.mrf.mxu3  ;;  %v1755_v38 = vpop.f32.mrf.mxu1 }
 0x27d   : > { %v2095_v37 = vadd.f32 %v2040_v9, %v1939_v57  ;;  %v1807_v43 = vadd.f32 %v1755_v38, %v3723_v47 }
 0x27f   : > { %v2235_v14 = vadd.f32 %v2180_v25, %v2095_v37  ;;  %v1887_v26 = vpop.f32.mrf.mxu2 }
 0x280   : > { %v1940_v53 = vadd.f32 %v1887_v26, %v1806_v17 }
 0x281   : > { %2267 = vst.msk [vmem:[%s3817_s14 + $0x88] sm:$0xff] %vm675_vm4, %v2235_v14  ;;  %v2315_v41 = vsel %vm675_vm4, %v2235_v14, 0.0  ;;  %v2368_v54 = vmul.f32 %v2235_v14, %v2235_v14 }
 0x282   : > { %v2316_v15 = vadd.f32 %v2315_v41, %v2314_v42 }
 0x283   : > { %v2416_v35 = vsel %vm675_vm4, %v2368_v54, 0.0  ;;  %v2183_v13 = vpop.f32.mrf.mxu0 }
 0x284   : > { %v2417_v44 = vadd.f32 %v2416_v35, %v2415_v27  ;;  %v2043_v55 = vpop.f32.mrf.mxu3  ;;  %v1758_v58 = vpop.f32.mrf.mxu1 }
 0x285   : > { %v2096_v33 = vadd.f32 %v2043_v55, %v1940_v53  ;;  %v1808_v31 = vadd.f32 %v1758_v58, %v3732_v23 }
 0x287   : > { %v2236_v7 = vadd.f32 %v2183_v13, %v2096_v33  ;;  %v1889_v59 = vpop.f32.mrf.mxu2 }
 0x288   : > { %v1941_v40 = vadd.f32 %v1889_v59, %v1807_v43 }
 0x289   : > { %2268 = vst.msk [vmem:[%s3817_s14 + $0x90] sm:$0xff] %vm675_vm4, %v2236_v7  ;;  %v2317_v50 = vsel %vm675_vm4, %v2236_v7, 0.0  ;;  %v2369_v3 = vmul.f32 %v2236_v7, %v2236_v7 }
 0x28a   : > { %v2318_v22 = vadd.f32 %v2317_v50, %v2316_v15 }
 0x28b   : > { %v2418_v19 = vsel %vm675_vm4, %v2369_v3, 0.0  ;;  %v2185_v21 = vpop.f32.mrf.mxu0 }
 0x28c   : > { %v2419_v48 = vadd.f32 %v2418_v19, %v2417_v44  ;;  %v2045_v6 = vpop.f32.mrf.mxu3  ;;  %v1760_v39 = vpop.f32.mrf.mxu1 }
 0x28d   : > { %v2097_v60 = vadd.f32 %v2045_v6, %v1941_v40  ;;  %v1809_v10 = vadd.f32 %v1760_v39, %v3737_v61 }
 0x28f   : > { %v2237_v18 = vadd.f32 %v2185_v21, %v2097_v60  ;;  %v1892_v47 = vpop.f32.mrf.mxu2 }
 0x290   : > { %v1942_v34 = vadd.f32 %v1892_v47, %v1808_v31 }
 0x291   : > { %2269 = vst.msk [vmem:[%s3817_s14 + $0x98] sm:$0xff] %vm675_vm4, %v2237_v18  ;;  %v2319_v62 = vsel %vm675_vm4, %v2237_v18, 0.0  ;;  %v2370_v49 = vmul.f32 %v2237_v18, %v2237_v18 }
 0x292   : > { %v2320_v4 = vadd.f32 %v2319_v62, %v2318_v22 }
 0x293   : > { %v2420_v46 = vsel %vm675_vm4, %v2370_v49, 0.0  ;;  %v2188_v36 = vpop.f32.mrf.mxu0 }
 0x294   : > { %v2421_v11 = vadd.f32 %v2420_v46, %v2419_v48  ;;  %v2048_v32 = vpop.f32.mrf.mxu3  ;;  %v1763_v24 = vpop.f32.mrf.mxu1 }
 0x295   : > { %v2098_v28 = vadd.f32 %v2048_v32, %v1942_v34  ;;  %v1810_v14 = vadd.f32 %v1763_v24, %v3746_v56 }
 0x297   : > { %v2238_v45 = vadd.f32 %v2188_v36, %v2098_v28  ;;  %v1894_v23 = vpop.f32.mrf.mxu2 }
 0x298   : > { %v1943_v12 = vadd.f32 %v1894_v23, %v1809_v10 }
 0x299   : > { %2270 = vst.msk [vmem:[%s3817_s14 + $0xa0] sm:$0xff] %vm675_vm4, %v2238_v45  ;;  %v2321_v16 = vsel %vm675_vm4, %v2238_v45, 0.0  ;;  %v2371_v1 = vmul.f32 %v2238_v45, %v2238_v45 }
 0x29a   : > { %v2322_v57 = vadd.f32 %v2321_v16, %v2320_v4 }
 0x29b   : > { %v2422_v42 = vsel %vm675_vm4, %v2371_v1, 0.0  ;;  %v2190_v30 = vpop.f32.mrf.mxu0 }
 0x29c   : > { %v2423_v25 = vadd.f32 %v2422_v42, %v2421_v11  ;;  %v2050_v27 = vpop.f32.mrf.mxu3  ;;  %v1765_v9 = vpop.f32.mrf.mxu1 }
 0x29d   : > { %v2099_v38 = vadd.f32 %v2050_v27, %v1943_v12  ;;  %v1811_v33 = vadd.f32 %v1765_v9, %v3751_v0 }
 0x29f   : > { %v2239_v37 = vadd.f32 %v2190_v30, %v2099_v38  ;;  %v1897_v61 = vpop.f32.mrf.mxu2 }
 0x2a0   : > { %v1944_v41 = vadd.f32 %v1897_v61, %v1810_v14 }
 0x2a1   : > { %2271 = vst.msk [vmem:[%s3817_s14 + $0xa8] sm:$0xff] %vm675_vm4, %v2239_v37  ;;  %v2323_v17 = vsel %vm675_vm4, %v2239_v37, 0.0  ;;  %v2372_v26 = vmul.f32 %v2239_v37, %v2239_v37 }
 0x2a2   : > { %v2324_v54 = vadd.f32 %v2323_v17, %v2322_v57 }
 0x2a3   : > { %v2424_v53 = vsel %vm675_vm4, %v2372_v26, 0.0  ;;  %v2193_v15 = vpop.f32.mrf.mxu0 }
 0x2a4   : > { %v2425_v35 = vadd.f32 %v2424_v53, %v2423_v25  ;;  %v2053_v13 = vpop.f32.mrf.mxu3  ;;  %v1768_v44 = vpop.f32.mrf.mxu1 }
 0x2a5   : > { %v2100_v55 = vadd.f32 %v2053_v13, %v1944_v41  ;;  %v1812_v39 = vadd.f32 %v1768_v44, %v3760_v29 }
 0x2a7   : > { %v2240_v58 = vadd.f32 %v2193_v15, %v2100_v55  ;;  %v1899_v56 = vpop.f32.mrf.mxu2 }
 0x2a8   : > { %v1945_v59 = vadd.f32 %v1899_v56, %v1811_v33 }
 0x2a9   : > { %2272 = vst.msk [vmem:[%s3817_s14 + $0xb0] sm:$0xff] %vm675_vm4, %v2240_v58  ;;  %v2325_v7 = vsel %vm675_vm4, %v2240_v58, 0.0  ;;  %v2373_v43 = vmul.f32 %v2240_v58, %v2240_v58 }
 0x2aa   : > { %v2326_v50 = vadd.f32 %v2325_v7, %v2324_v54 }
 0x2ab   : > { %v2426_v3 = vsel %vm675_vm4, %v2373_v43, 0.0  ;;  %v2195_v40 = vpop.f32.mrf.mxu0 }
 0x2ac   : > { %v2427_v22 = vadd.f32 %v2426_v3, %v2425_v35  ;;  %v2055_v19 = vpop.f32.mrf.mxu3  ;;  %v1770_v21 = vpop.f32.mrf.mxu1 }
 0x2ad   : > { %v2101_v48 = vadd.f32 %v2055_v19, %v1945_v59  ;;  %v1813_v32 = vadd.f32 %v1770_v21, %v3765_v52 }
 0x2af   : > { %v2241_v6 = vadd.f32 %v2195_v40, %v2101_v48  ;;  %v1902_v0 = vpop.f32.mrf.mxu2 }
 0x2b0   : > { %v1946_v31 = vadd.f32 %v1902_v0, %v1812_v39 }
 0x2b1   : > { %2273 = vst.msk [vmem:[%s3817_s14 + $0xb8] sm:$0xff] %vm675_vm4, %v2241_v6  ;;  %v2327_v60 = vsel %vm675_vm4, %v2241_v6, 0.0  ;;  %v2374_v18 = vmul.f32 %v2241_v6, %v2241_v6 }
 0x2b2   : > { %v2328_v47 = vadd.f32 %v2327_v60, %v2326_v50 }
 0x2b3   : > { %v2428_v62 = vsel %vm675_vm4, %v2374_v18, 0.0  ;;  %v2198_v49 = vpop.f32.mrf.mxu0 }
 0x2b4   : > { %v2429_v34 = vadd.f32 %v2428_v62, %v2427_v22  ;;  %v2058_v4 = vpop.f32.mrf.mxu3  ;;  %v1773_v46 = vpop.f32.mrf.mxu1 }
 0x2b5   : > { %v2102_v36 = vadd.f32 %v2058_v4, %v1946_v31  ;;  %v1814_v25 = vadd.f32 %v1773_v46, %v3774_v20 }
 0x2b7   : > { %v2242_v11 = vadd.f32 %v2198_v49, %v2102_v36  ;;  %v1904_v29 = vpop.f32.mrf.mxu2 }
 0x2b8   : > { %v1947_v45 = vadd.f32 %v1904_v29, %v1813_v32 }
 0x2b9   : > { %2274 = vst.msk [vmem:[%s3817_s14 + $0xc0] sm:$0xff] %vm675_vm4, %v2242_v11  ;;  %v2329_v24 = vsel %vm675_vm4, %v2242_v11, 0.0  ;;  %v2375_v28 = vmul.f32 %v2242_v11, %v2242_v11 }
 0x2ba   : > { %v2330_v10 = vadd.f32 %v2329_v24, %v2328_v47 }
 0x2bb   : > { %v2430_v23 = vsel %vm675_vm4, %v2375_v28, 0.0  ;;  %v2200_v16 = vpop.f32.mrf.mxu0 }
 0x2bc   : > { %v2431_v1 = vadd.f32 %v2430_v23, %v2429_v34  ;;  %v2060_v12 = vpop.f32.mrf.mxu3  ;;  %v1775_v57 = vpop.f32.mrf.mxu1 }
 0x2bd   : > { %v2103_v42 = vadd.f32 %v2060_v12, %v1947_v45  ;;  %v1815_v15 = vadd.f32 %v1775_v57, %v3779_v8 }
 0x2bf   : > { %v2243_v30 = vadd.f32 %v2200_v16, %v2103_v42  ;;  %v1907_v52 = vpop.f32.mrf.mxu2 }
 0x2c0   : > { %v1948_v38 = vadd.f32 %v1907_v52, %v1814_v25 }
 0x2c1   : > { %2275 = vst.msk [vmem:[%s3817_s14 + $0xc8] sm:$0xff] %vm675_vm4, %v2243_v30  ;;  %v2331_v27 = vsel %vm675_vm4, %v2243_v30, 0.0  ;;  %v2376_v9 = vmul.f32 %v2243_v30, %v2243_v30 }
 0x2c2   : > { %v2332_v37 = vadd.f32 %v2331_v27, %v2330_v10 }
 0x2c3   : > { %v2432_v14 = vsel %vm675_vm4, %v2376_v9, 0.0  ;;  %v2203_v61 = vpop.f32.mrf.mxu0 }
 0x2c4   : > { %v2433_v17 = vadd.f32 %v2432_v14, %v2431_v1  ;;  %v2063_v26 = vpop.f32.mrf.mxu3  ;;  %v1778_v54 = vpop.f32.mrf.mxu1 }
 0x2c5   : > { %v2104_v41 = vadd.f32 %v2063_v26, %v1948_v38  ;;  %v1816_v50 = vadd.f32 %v1778_v54, %v3788_v51 }
 0x2c7   : > { %v2244_v53 = vadd.f32 %v2203_v61, %v2104_v41  ;;  %v1909_v20 = vpop.f32.mrf.mxu2 }
 0x2c8   : > { %v1949_v44 = vadd.f32 %v1909_v20, %v1815_v15 }
 0x2c9   : > { %2276 = vst.msk [vmem:[%s3817_s14 + $0xd0] sm:$0xff] %vm675_vm4, %v2244_v53  ;;  %v2333_v35 = vsel %vm675_vm4, %v2244_v53, 0.0  ;;  %v2377_v13 = vmul.f32 %v2244_v53, %v2244_v53 }
 0x2ca   : > { %v2334_v55 = vadd.f32 %v2333_v35, %v2332_v37 }
 0x2cb   : > { %v2434_v58 = vsel %vm675_vm4, %v2377_v13, 0.0  ;;  %v2205_v33 = vpop.f32.mrf.mxu0 }
 0x2cc   : > { %v2435_v56 = vadd.f32 %v2434_v58, %v2433_v17  ;;  %v2065_v7 = vpop.f32.mrf.mxu3  ;;  %v1780_v3 = vpop.f32.mrf.mxu1 }
 0x2cd   : > { %v2105_v43 = vadd.f32 %v2065_v7, %v1949_v44  ;;  %v1817_v31 = vadd.f32 %v1780_v3, %v3793_v63 }
 0x2cf   : > { %v2245_v59 = vadd.f32 %v2205_v33, %v2105_v43  ;;  %v1912_v8 = vpop.f32.mrf.mxu2  ;;  %v2452_v33 = vlaneseq }
 0x2d0   : > { %v1950_v19 = vadd.f32 %v1912_v8, %v1816_v50 }
 0x2d1   : > { %2277 = vst.msk [vmem:[%s3817_s14 + $0xd8] sm:$0xff] %vm675_vm4, %v2245_v59  ;;  %v2335_v40 = vsel %vm675_vm4, %v2245_v59, 0.0  ;;  %v2378_v22 = vmul.f32 %v2245_v59, %v2245_v59  ;;  %v2453_v50 = vshrl.u32 %v2452_v33, 7 }
 0x2d2   : > { %v2336_v21 = vadd.f32 %v2335_v40, %v2334_v55 }
 0x2d3   : > { %v2436_v48 = vsel %vm675_vm4, %v2378_v22, 0.0  ;;  %v2208_v6 = vpop.f32.mrf.mxu0  ;;  %vm2455_vm8 = vcmp.eq.s32.totalorder %v2453_v50, 1  ;;  %vm2454_vm9 = vcmp.eq.s32.totalorder %v2453_v50, 0 }
 0x2d4   : > { %v2437_v39 = vadd.f32 %v2436_v48, %v2435_v56  ;;  %v2068_v0 = vpop.f32.mrf.mxu3  ;;  %v1783_v34 = vpop.f32.mrf.mxu1 }
 0x2d5   : > { %v2106_v60 = vadd.f32 %v2068_v0, %v1950_v19  ;;  %v1818_v28 = vadd.f32 %v1783_v34, %v3802_v2 }
 0x2d7   : > { %v2246_v18 = vadd.f32 %v2208_v6, %v2106_v60  ;;  %v1914_v51 = vpop.f32.mrf.mxu2 }
 0x2d8   : > { %v1951_v49 = vadd.f32 %v1914_v51, %v1817_v31 }
 0x2d9   : > { %2278 = vst.msk [vmem:[%s3817_s14 + $0xe0] sm:$0xff] %vm675_vm4, %v2246_v18  ;;  %v2337_v47 = vsel %vm675_vm4, %v2246_v18, 0.0  ;;  %v2379_v62 = vmul.f32 %v2246_v18, %v2246_v18 }
 0x2da   : > { %v2338_v4 = vadd.f32 %v2337_v47, %v2336_v21 }
 0x2db   : > { %v2438_v46 = vsel %vm675_vm4, %v2379_v62, 0.0  ;;  %v2210_v36 = vpop.f32.mrf.mxu0 }
 0x2dc   : > { %v2439_v11 = vadd.f32 %v2438_v46, %v2437_v39  ;;  %v2070_v32 = vpop.f32.mrf.mxu3  ;;  %v1785_v12 = vpop.f32.mrf.mxu1 }
 0x2dd   : > { %v2107_v29 = vadd.f32 %v2070_v32, %v1951_v49  ;;  %v1819_v2 = vadd.f32 %v1785_v12, %v3807_v5 }
 0x2df   : > { %v2247_v24 = vadd.f32 %v2210_v36, %v2107_v29  ;;  %v1917_v63 = vpop.f32.mrf.mxu2 }
 0x2e0   : > { %v1952_v23 = vadd.f32 %v1917_v63, %v1818_v28 }
 0x2e1   : > { %2279 = vst.msk [vmem:[%s3817_s14 + $0xe8] sm:$0xff] %vm675_vm4, %v2247_v24  ;;  %v2339_v45 = vsel %vm675_vm4, %v2247_v24, 0.0  ;;  %v2380_v10 = vmul.f32 %v2247_v24, %v2247_v24 }
 0x2e2   : > { %v2340_v16 = vadd.f32 %v2339_v45, %v2338_v4 }
 0x2e3   : > { %v2440_v1 = vsel %vm675_vm4, %v2380_v10, 0.0  ;;  %v2213_v42 = vpop.f32.mrf.mxu0 }
 0x2e4   : > { %v2441_v57 = vadd.f32 %v2440_v1, %v2439_v11  ;;  %v2073_v30 = vpop.f32.mrf.mxu3 }
 0x2e5   : > { %v2108_v25 = vadd.f32 %v2073_v30, %v1952_v23 }
 0x2e7   : > { %v2248_v52 = vadd.f32 %v2213_v42, %v2108_v25  ;;  %v1919_v27 = vpop.f32.mrf.mxu2 }
 0x2e8   : > { %v1953_v37 = vadd.f32 %v1919_v27, %v1819_v2 }
 0x2e9   : > { %2280 = vst.msk [vmem:[%s3817_s14 + $0xf0] sm:$0xff] %vm675_vm4, %v2248_v52  ;;  %v2341_v9 = vsel %vm675_vm4, %v2248_v52, 0.0  ;;  %v2381_v38 = vmul.f32 %v2248_v52, %v2248_v52 }
 0x2ea   : > { %v2342_v14 = vadd.f32 %v2341_v9, %v2340_v16 }
 0x2eb   : > { %v2442_v61 = vsel %vm675_vm4, %v2381_v38, 0.0  ;;  %v2215_v54 = vpop.f32.mrf.mxu0 }
 0x2ec   : > { %v2443_v17 = vadd.f32 %v2442_v61, %v2441_v57  ;;  %v2075_v26 = vpop.f32.mrf.mxu3 }
 0x2ed   : > { %v2109_v41 = vadd.f32 %v2075_v26, %v1953_v37 }
 0x2ef   : > { %v2249_v53 = vadd.f32 %v2215_v54, %v2109_v41 }
 0x2f1   : > { %2281 = vst.msk [vmem:[%s3817_s14 + $0xf8] sm:$0xff] %vm675_vm4, %v2249_v53  ;;  %v2343_v15 = vsel %vm675_vm4, %v2249_v53, 0.0  ;;  %v2382_v5 = vmul.f32 %v2249_v53, %v2249_v53 }
 0x2f2   : > { %v2344_v20 = vadd.f32 %v2343_v15, %v2342_v14 }
 0x2f3   : > { %v2444_v35 = vsel %vm675_vm4, %v2382_v5, 0.0 }
 0x2f4   : > { %v2345_v13 = vrot.slane %v2344_v20, 4  ;;  %v2445_v44 = vadd.f32 %v2444_v35, %v2443_v17 }
 0x2f6   : > { %v2346_v55 = vadd.f32 %v2345_v13, %v2344_v20  ;;  %v2446_v58 = vrot.slane %v2445_v44, 4 }
 0x2f8   : > { %v2347_v56 = vrot.slane %v2346_v55, 2  ;;  %v2447_v7 = vadd.f32 %v2446_v58, %v2445_v44 }
 0x2fa   : > { %v2348_v43 = vadd.f32 %v2347_v56, %v2346_v55  ;;  %v2448_v59 = vrot.slane %v2447_v7, 2 }
 0x2fc   : > { %v2449_v8 = vadd.f32 %v2448_v59, %v2447_v7  ;;  %v2349_v3 = vrot.slane %v2348_v43, 1 }
 0x2fe   : > { %v2450_v40 = vrot.slane %v2449_v8, 1  ;;  %v2350_v19 = vadd.f32 %v2349_v3, %v2348_v43 }
 0x300   : > { %v2451_v22 = vadd.f32 %v2450_v40, %v2449_v8 }
 0x302   : > { %v2456_v21 = vsel %vm2455_vm8, %v2451_v22, 0.0 }
 0x303   : > { %v2457_v48 = vsel %vm2454_vm9, %v2350_v19, %v2456_v21 }
 0x304   : > { %2458 = vst.msk [vmem:[%s181_s18] sm:$0xff] %vm675_vm4, %v2457_v48 }
 0x305 PF: > { %s14_s12 = sadd.s32 1, %s2843_s12  }
 0x306   : > { %p11_p4 = scmp.ge.s32.totalorder %s14_s12, 4  }
 0x308   :  { %13 = sbr.rel (!%p11_p4) target bundleno = 1 (0x1), region = 78 }

</bundles_post_ra>
